<compile_context>
chip_gen: v5e
topology: v5e:2x2
jax: 0.10.0
libtpu: 0.0.40
codegen_flags: <defaults>
</compile_context>

<pallas_src>
import functools

import jax
import jax.numpy as jnp
from jax import lax
from jax.experimental import pallas as pl
from jax.experimental.pallas import tpu as pltpu


def _round_up(x, m):
    return (x + m - 1) // m * m


# ----------------------------------------------------------------------------
# Path 1: small tables -- VMEM-resident tables, one-hot MXU gathers, no DMAs.
# ----------------------------------------------------------------------------
def _distmult_small_kernel(h_ref, r_ref, t_ref, ent_ref, rel_ref, out_ref, *,
                           tile_b, e_pad, r_pad):
    ent = ent_ref[...]                                     # (e_pad, d_pad) f32
    rel = rel_ref[...]                                     # (r_pad, d_pad) f32

    ent_iota = lax.broadcasted_iota(jnp.int32, (tile_b, e_pad), 1)
    rel_iota = lax.broadcasted_iota(jnp.int32, (tile_b, r_pad), 1)
    h_oh = (h_ref[...] == ent_iota).astype(ent.dtype)      # (tile_b, e_pad)
    t_oh = (t_ref[...] == ent_iota).astype(ent.dtype)
    r_oh = (r_ref[...] == rel_iota).astype(rel.dtype)

    hp = lax.Precision.HIGHEST                             # exact row selection
    h_emb = jnp.dot(h_oh, ent, precision=hp, preferred_element_type=jnp.float32)
    t_emb = jnp.dot(t_oh, ent, precision=hp, preferred_element_type=jnp.float32)
    r_emb = jnp.dot(r_oh, rel, precision=hp, preferred_element_type=jnp.float32)

    prod = h_emb * r_emb * t_emb                           # (tile_b, d_pad) VPU
    out_ref[...] = jnp.sum(prod, axis=1).reshape(1, tile_b)


# ----------------------------------------------------------------------------
# Path 2: large entity table -- HBM row gathers, double-buffered across tiles.
# ----------------------------------------------------------------------------
def _distmult_gather_kernel(
    h_idx_ref, t_idx_ref,          # scalar-prefetch (SMEM) row ids, shape (b_pad,)
    r_idx_ref,                     # (tile_b, 1) i32 relation ids (VMEM)
    ent_hbm,                       # (E, d_pad) f32 entity table, HBM (pl.ANY)
    rel_ref,                       # (r_pad, d_pad) f32 relation table, VMEM-resident
    out_ref,                       # (1, tile_b) f32 output slab
    h_buf, t_buf,                  # (2, tile_b, d_pad) f32 double buffers
    sems,                          # DMA semaphores, shape (2, 2): [slot, {head, tail}]
    *, tile_b, r_pad,
):
    i = pl.program_id(0)
    n = pl.num_programs(0)

    def issue(tile_idx, slot):
        """Issue every head/tail row-gather DMA of one batch tile into `slot`."""
        base = tile_idx * tile_b

        def body(b, carry):
            h = h_idx_ref[base + b]
            t = t_idx_ref[base + b]
            pltpu.make_async_copy(
                ent_hbm.at[pl.ds(h, 1), :], h_buf.at[slot, pl.ds(b, 1), :],
                sems.at[slot, 0]).start()
            pltpu.make_async_copy(
                ent_hbm.at[pl.ds(t, 1), :], t_buf.at[slot, pl.ds(b, 1), :],
                sems.at[slot, 1]).start()
            return carry

        # Partially unrolled: the issue loop is pure scalar/misc-slot work, so
        # unrolling lets the scheduler interleave index reads + descriptor pushes.
        lax.fori_loop(0, tile_b, body, 0, unroll=8)

    @pl.when(i == 0)
    def _():                       # prime the pipeline with tile 0
        issue(0, 0)

    @pl.when(i + 1 < n)
    def _():                       # prefetch next tile while this one is consumed
        issue(i + 1, (i + 1) % 2)

    # Relation rows: one-hot MXU gather from the VMEM-resident relation table.
    # Runs while the entity-row DMAs are still in flight (MXU is otherwise idle).
    r_oh = (r_idx_ref[...] ==
            lax.broadcasted_iota(jnp.int32, (tile_b, r_pad), 1)).astype(rel_ref.dtype)
    r_emb = jnp.dot(r_oh, rel_ref[...], precision=lax.Precision.HIGHEST,
                    preferred_element_type=jnp.float32)

    # Bulk wait: ONE descriptor covering the whole (tile_b, d_pad) slot per
    # semaphore (DMA semaphores count bytes; every row copy on a semaphore has
    # identical size, so the totals match exactly).
    slot = i % 2
    pltpu.make_async_copy(h_buf.at[slot], h_buf.at[slot], sems.at[slot, 0]).wait()
    pltpu.make_async_copy(t_buf.at[slot], t_buf.at[slot], sems.at[slot, 1]).wait()

    prod = h_buf[slot] * r_emb * t_buf[slot]               # (tile_b, d_pad) VPU
    out_ref[...] = jnp.sum(prod, axis=1).reshape(1, tile_b)


# ----------------------------------------------------------------------------
# Wrapper / dispatch
# ----------------------------------------------------------------------------
def distmult_forward(head, relation, tail, entity_table, relation_table, *,
                     tile_b=512, force_gather=False):
    """head/relation/tail: (B,) int arrays; tables: (E, D) / (R, D) float."""
    B = head.shape[0]
    E, D = entity_table.shape
    R, Dr = relation_table.shape
    assert D == Dr, "entity/relation embedding dims must match"

    entity_table = entity_table.astype(jnp.float32)
    relation_table = relation_table.astype(jnp.float32)
    # TODO(synk): add a bf16 table option for v6e/v7x (halves HBM gather bytes);
    # kept f32 here for bit-accurate parity with the PyTorch module.

    d_pad = _round_up(D, 128)
    e_pad = _round_up(E, 128)
    r_pad = _round_up(R, 128)

    # Lane-pad the embedding dim (zero columns don't change the score); pad the
    # relation rows so the VMEM-resident one-hot gather runs on full tiles.
    if d_pad != D:
        entity_table = jnp.pad(entity_table, ((0, 0), (0, d_pad - D)))
        relation_table = jnp.pad(relation_table, ((0, 0), (0, d_pad - D)))
    relation_table_p = (jnp.pad(relation_table, ((0, r_pad - R), (0, 0)))
                        if r_pad != R else relation_table)

    small_ok = (not force_gather
                and e_pad <= 2048
                and e_pad * d_pad * 4 <= (4 << 20)
                and r_pad * d_pad * 4 <= (2 << 20))

    # ---- batch tiling --------------------------------------------------------
    tile_b = max(128, min(tile_b, _round_up(B, 128)))
    # v7x megacore: prefer >= 2 batch tiles when the batch is large enough.
    while _round_up(B, tile_b) // tile_b < 2 and tile_b >= 256:
        tile_b = _round_up(tile_b // 2, 128)
    if not small_ok:
        # Per-TensorCore VMEM budget (v7x: 64 MiB total): keep the 2x
        # double-buffered (tile_b, d_pad) gather buffers under ~16 MiB.
        while 4 * tile_b * d_pad * 4 > (16 << 20) and tile_b > 128:
            tile_b = max(128, _round_up(tile_b // 2, 128))
    b_pad = _round_up(B, tile_b)
    num_tiles = b_pad // tile_b

    def prep(idx, limit):
        # Clamp out-of-range ids (manual DMA / one-hot gather has no bounds
        # check); PyTorch's embedding lookup would raise instead.
        idx = jnp.clip(idx.astype(jnp.int32), 0, limit - 1)
        return jnp.pad(idx, (0, b_pad - B))

    h_idx = prep(head, E)
    r_idx = prep(relation, R)
    t_idx = prep(tail, E)

    if small_ok:
        entity_table_p = (jnp.pad(entity_table, ((0, e_pad - E), (0, 0)))
                          if e_pad != E else entity_table)
        kernel = functools.partial(_distmult_small_kernel,
                                   tile_b=tile_b, e_pad=e_pad, r_pad=r_pad)
        grid_spec = pltpu.PrefetchScalarGridSpec(
            num_scalar_prefetch=0,
            grid=(num_tiles,),
            in_specs=[
                pl.BlockSpec((tile_b, 1), lambda i: (i, 0)),      # head ids
                pl.BlockSpec((tile_b, 1), lambda i: (i, 0)),      # relation ids
                pl.BlockSpec((tile_b, 1), lambda i: (i, 0)),      # tail ids
                pl.BlockSpec((e_pad, d_pad), lambda i: (0, 0)),   # entity table (VMEM-resident)
                pl.BlockSpec((r_pad, d_pad), lambda i: (0, 0)),   # relation table (VMEM-resident)
            ],
            out_specs=pl.BlockSpec((1, tile_b), lambda i: (i, 0)),
        )
        cost = pl.CostEstimate(
            flops=2 * b_pad * d_pad * (2 * e_pad + r_pad) + 3 * b_pad * d_pad,
            transcendentals=0,
            bytes_accessed=(e_pad + r_pad) * d_pad * 4 + 4 * b_pad * 4,
        )
        out = pl.pallas_call(
            kernel,
            out_shape=jax.ShapeDtypeStruct((num_tiles, tile_b), jnp.float32),
            grid_spec=grid_spec,
            compiler_params=pltpu.CompilerParams(
                dimension_semantics=("parallel",),
                vmem_limit_bytes=48 * 1024 * 1024,
            ),
            cost_estimate=cost,
        )(
            h_idx.reshape(b_pad, 1), r_idx.reshape(b_pad, 1),
            t_idx.reshape(b_pad, 1), entity_table_p, relation_table_p,
        )
        return out.reshape(b_pad)[:B]

    # ---- large-table gather path --------------------------------------------
    assert r_pad * d_pad * 4 <= (8 << 20), "relation table too large for VMEM"
    # TODO(synk): row-gather the relation table too when R * d_pad exceeds VMEM.

    kernel = functools.partial(_distmult_gather_kernel, tile_b=tile_b, r_pad=r_pad)
    grid_spec = pltpu.PrefetchScalarGridSpec(
        num_scalar_prefetch=2,                                  # head/tail ids -> SMEM
        grid=(num_tiles,),
        in_specs=[
            pl.BlockSpec((tile_b, 1), lambda i, h, t: (i, 0)),  # relation ids
            pl.BlockSpec(memory_space=pl.ANY),                  # entity table stays in HBM
            pl.BlockSpec((r_pad, d_pad), lambda i, h, t: (0, 0)),  # relation table VMEM-resident
        ],
        out_specs=pl.BlockSpec((1, tile_b), lambda i, h, t: (i, 0)),
        scratch_shapes=[
            pltpu.VMEM((2, tile_b, d_pad), jnp.float32),        # head rows (double-buffered)
            pltpu.VMEM((2, tile_b, d_pad), jnp.float32),        # tail rows (double-buffered)
            pltpu.SemaphoreType.DMA((2, 2)),                    # [slot, {head, tail}]
        ],
    )
    cost = pl.CostEstimate(
        flops=2 * b_pad * r_pad * d_pad + 3 * b_pad * d_pad,
        transcendentals=0,
        bytes_accessed=2 * b_pad * d_pad * 4 + r_pad * d_pad * 4 + 4 * b_pad * 4,
    )
    out = pl.pallas_call(
        kernel,
        out_shape=jax.ShapeDtypeStruct((num_tiles, tile_b), jnp.float32),
        grid_spec=grid_spec,
        compiler_params=pltpu.CompilerParams(
            # Cross-grid-step double-buffering relies on sequential step order.
            dimension_semantics=("arbitrary",),
            vmem_limit_bytes=48 * 1024 * 1024,
        ),
        cost_estimate=cost,
    )(h_idx, t_idx, r_idx.reshape(b_pad, 1), entity_table, relation_table_p)
    return out.reshape(b_pad)[:B]


def xavier_uniform(key, shape, dtype=jnp.float32):
    fan_in, fan_out = shape[0], shape[1]
    a = (6.0 / (fan_in + fan_out)) ** 0.5
    return jax.random.uniform(key, shape, dtype=dtype, minval=-a, maxval=a)


if __name__ == "__main__":
    # Small, deterministic synthetic setup (graph-derived sizes are synthetic here).
    num_entities = 32
    num_relations = 8
    embedding_dim = 100   # matches the PyTorch spec; padded to 128 inside the wrapper
    batch = 8

    key = jax.random.PRNGKey(0)
    k_ent, k_rel, k_h, k_r, k_t = jax.random.split(key, 5)

    entity_table = xavier_uniform(k_ent, (num_entities, embedding_dim))
    relation_table = xavier_uniform(k_rel, (num_relations, embedding_dim))

    head = jax.random.randint(k_h, (batch,), 0, num_entities, dtype=jnp.int32)
    relation = jax.random.randint(k_r, (batch,), 0, num_relations, dtype=jnp.int32)
    tail = jax.random.randint(k_t, (batch,), 0, num_entities, dtype=jnp.int32)

    # Reference in plain JAX (same semantics as the PyTorch forward).
    ref = jnp.sum(
        entity_table[head] * relation_table[relation] * entity_table[tail], axis=1
    )

    # Small-table fast path (VMEM-resident tables, one-hot MXU gathers).
    score = jax.block_until_ready(
        distmult_forward(head, relation, tail, entity_table, relation_table))
    assert score.shape == (batch,)
    assert jnp.allclose(score, ref, atol=1e-5, rtol=1e-5)

    # Large-table gather path (HBM row-gather DMAs, bulk waits, double-buffering).
    score_gather = jax.block_until_ready(
        distmult_forward(head, relation, tail, entity_table, relation_table,
                         force_gather=True))
    assert jnp.allclose(score_gather, ref, atol=1e-5, rtol=1e-5)

    print("KERNEL_OK")
</pallas_src>

<mosaic_0001>
module attributes {stable_mosaic.version = 11 : i64} {
  func.func @_distmult_small_kernel(%arg0: i32, %arg1: memref<128x1xi32, #tpu.memory_space<vmem>>, %arg2: memref<128x1xi32, #tpu.memory_space<vmem>>, %arg3: memref<128x1xi32, #tpu.memory_space<vmem>>, %arg4: memref<128x128xf32, #tpu.memory_space<vmem>>, %arg5: memref<128x128xf32, #tpu.memory_space<vmem>>, %arg6: memref<1x128xf32, #tpu.memory_space<vmem>>) attributes {dimension_semantics = [#tpu.dimension_semantics<parallel>], iteration_bounds = array<i64: 1>, scalar_prefetch = 0 : i64, scratch_operands = 0 : i64, tpu.core_type = #tpu.core_type<tc>, window_params = [{transform_indices = @transform_0, window_bounds = array<i64: 128, 1>}, {transform_indices = @transform_1, window_bounds = array<i64: 128, 1>}, {transform_indices = @transform_2, window_bounds = array<i64: 128, 1>}, {pipeline_mode = #tpu.pipeline_mode<synchronous>, transform_indices = @transform_3, window_bounds = array<i64: 128, 128>}, {pipeline_mode = #tpu.pipeline_mode<synchronous>, transform_indices = @transform_4, window_bounds = array<i64: 128, 128>}, {transform_indices = @transform_5, window_bounds = array<i64: 1, 128>}]} {
    %c0 = arith.constant 0 : index
    %c0_0 = arith.constant 0 : index
    %0 = vector.load %arg4[%c0, %c0_0] : memref<128x128xf32, #tpu.memory_space<vmem>>, vector<128x128xf32>
    %c0_1 = arith.constant 0 : index
    %c0_2 = arith.constant 0 : index
    %1 = vector.load %arg5[%c0_1, %c0_2] : memref<128x128xf32, #tpu.memory_space<vmem>>, vector<128x128xf32>
    %2 = tpu.iota {dimensions = array<i32: 1>} : vector<128x128xi32>
    %3 = tpu.iota {dimensions = array<i32: 1>} : vector<128x128xi32>
    %c0_3 = arith.constant 0 : index
    %c0_4 = arith.constant 0 : index
    %4 = vector.load %arg1[%c0_3, %c0_4] : memref<128x1xi32, #tpu.memory_space<vmem>>, vector<128x1xi32>
    %5 = vector.broadcast %4 : vector<128x1xi32> to vector<128x128xi32>
    %6 = arith.cmpi eq, %5, %2 : vector<128x128xi32>
    %7 = arith.extui %6 : vector<128x128xi1> to vector<128x128xi32>
    %8 = arith.sitofp %7 : vector<128x128xi32> to vector<128x128xf32>
    %c0_5 = arith.constant 0 : index
    %c0_6 = arith.constant 0 : index
    %9 = vector.load %arg3[%c0_5, %c0_6] : memref<128x1xi32, #tpu.memory_space<vmem>>, vector<128x1xi32>
    %10 = vector.broadcast %9 : vector<128x1xi32> to vector<128x128xi32>
    %11 = arith.cmpi eq, %10, %2 : vector<128x128xi32>
    %12 = arith.extui %11 : vector<128x128xi1> to vector<128x128xi32>
    %13 = arith.sitofp %12 : vector<128x128xi32> to vector<128x128xf32>
    %c0_7 = arith.constant 0 : index
    %c0_8 = arith.constant 0 : index
    %14 = vector.load %arg2[%c0_7, %c0_8] : memref<128x1xi32, #tpu.memory_space<vmem>>, vector<128x1xi32>
    %15 = vector.broadcast %14 : vector<128x1xi32> to vector<128x128xi32>
    %16 = arith.cmpi eq, %15, %3 : vector<128x128xi32>
    %17 = arith.extui %16 : vector<128x128xi1> to vector<128x128xi32>
    %18 = arith.sitofp %17 : vector<128x128xi32> to vector<128x128xf32>
    %cst = arith.constant dense<0.000000e+00> : vector<128x128xf32>
    %19 = tpu.matmul %8, %0, %cst {dimension_numbers = #tpu.dot_dimension_numbers<[1], [0], [0], [1], [0, 0, 1, 1], [], []>, precision = #tpu.contract_precision<fp32>} : vector<128x128xf32>, vector<128x128xf32>, vector<128x128xf32> -> vector<128x128xf32>
    %cst_9 = arith.constant dense<0.000000e+00> : vector<128x128xf32>
    %20 = tpu.matmul %13, %0, %cst_9 {dimension_numbers = #tpu.dot_dimension_numbers<[1], [0], [0], [1], [0, 0, 1, 1], [], []>, precision = #tpu.contract_precision<fp32>} : vector<128x128xf32>, vector<128x128xf32>, vector<128x128xf32> -> vector<128x128xf32>
    %cst_10 = arith.constant dense<0.000000e+00> : vector<128x128xf32>
    %21 = tpu.matmul %18, %1, %cst_10 {dimension_numbers = #tpu.dot_dimension_numbers<[1], [0], [0], [1], [0, 0, 1, 1], [], []>, precision = #tpu.contract_precision<fp32>} : vector<128x128xf32>, vector<128x128xf32>, vector<128x128xf32> -> vector<128x128xf32>
    %22 = arith.mulf %19, %21 : vector<128x128xf32>
    %23 = arith.mulf %22, %20 : vector<128x128xf32>
    %cst_11 = arith.constant dense<0.000000e+00> : vector<128xf32>
    %24 = vector.multi_reduction <add>, %23, %cst_11 [1] : vector<128x128xf32> to vector<128xf32>
    %25 = vector.shape_cast %24 : vector<128xf32> to vector<1x128xf32>
    %c0_12 = arith.constant 0 : index
    %c0_13 = arith.constant 0 : index
    %26 = vector.load %arg6[%c0_12, %c0_13] : memref<1x128xf32, #tpu.memory_space<vmem>>, vector<1x128xf32>
    tpu.vector_store %arg6[%c0_12, %c0_13], %25 {strides = array<i32>} : memref<1x128xf32, #tpu.memory_space<vmem>>, vector<1x128xf32>,
    return
  }
  func.func @transform_0(%arg0: i32) -> (i32, i32) {
    %c0_i32 = arith.constant 0 : i32
    %c0_i32_0 = arith.constant 0 : i32
    return %arg0, %c0_i32 : i32, i32
  }
  func.func @transform_1(%arg0: i32) -> (i32, i32) {
    %c0_i32 = arith.constant 0 : i32
    %c0_i32_0 = arith.constant 0 : i32
    return %arg0, %c0_i32 : i32, i32
  }
  func.func @transform_2(%arg0: i32) -> (i32, i32) {
    %c0_i32 = arith.constant 0 : i32
    %c0_i32_0 = arith.constant 0 : i32
    return %arg0, %c0_i32 : i32, i32
  }
  func.func @transform_3(%arg0: i32) -> (i32, i32) {
    %c0_i32 = arith.constant 0 : i32
    %c0_i32_0 = arith.constant 0 : i32
    %c0_i32_1 = arith.constant 0 : i32
    return %c0_i32, %c0_i32_0 : i32, i32
  }
  func.func @transform_4(%arg0: i32) -> (i32, i32) {
    %c0_i32 = arith.constant 0 : i32
    %c0_i32_0 = arith.constant 0 : i32
    %c0_i32_1 = arith.constant 0 : i32
    return %c0_i32, %c0_i32_0 : i32, i32
  }
  func.func @transform_5(%arg0: i32) -> (i32, i32) {
    %c0_i32 = arith.constant 0 : i32
    %c0_i32_0 = arith.constant 0 : i32
    return %arg0, %c0_i32 : i32, i32
  }
}

</mosaic_0001>

<bundles_post_ra>
// kernel: tpu_custom_call.1
= control target key start
LH: loop header
LB: loop body
LE: loop exit
PB: predicated region body
PF: predicated region fallthrough
CT: control target
= control target key end

     0   :  { %v3225_v3 = vmov 0   ;;  %s5779_s0 = inlined_call_operand.vmem [shape: s32[128,1], index: 0, kind: input, shape index: {}]   ;;  %s5780_s1 = inlined_call_operand.vmem [shape: s32[128,1], index: 1, kind: input, shape index: {}]   ;;  %s5781_s2 = inlined_call_operand.vmem [shape: s32[128,1], index: 2, kind: input, shape index: {}]   ;;  %s5782_s3 = inlined_call_operand.vmem [shape: f32[128,128], index: 3, kind: input, shape index: {}]   ;;  %s5783_s4 = inlined_call_operand.vmem [shape: f32[128,128], index: 4, kind: input, shape index: {}]   ;;  %s5784_s5 = inlined_call_operand.hbm [shape: f32[1,128], index: 5, kind: output, shape index: {}]  }
   0x1   :  { %v63_v0 = vld [vmem:[%s5779_s0 + $0x40] sm:$0xff]  ;;  %v56_v1 = vld [vmem:[%s5779_s0 + $0x8] sm:$0xff]  ;;  %3198 = vset.pattern.permute.xlu2 %v3225_v3  ;;  %3197 = vset.pattern.permute.xlu1 %v3225_v3 }
   0x2   :  { %v55_v2 = vld [vmem:[%s5779_s0] sm:$0xff]  ;;  %3196 = vset.pattern.permute.xlu0 %v3225_v3  ;;  %75 = vperm.xlu2 %3198, %v56_v1  }
   0x3   :  { %96 = vperm.xlu0 %3196, %v63_v0   ;;  %72 = vperm.xlu1 %3197, %v55_v2  }
   0x4   :  { %10 = vsyncpa [#allocation3], 0  ;;  %v66_v4 = vld [vmem:[%s5779_s0 + $0x58] sm:$0xff]  ;;  %v64_v5 = vld [vmem:[%s5779_s0 + $0x48] sm:$0xff]  ;;  %s2959_s18 = sshll.u32 %s5784_s5, 4  ;;  %s2960_s18 = int_to_ptr.hbm [resolvable:$true] %s2959_s18 }
   0x5   :  { %v65_v6 = vld [vmem:[%s5779_s0 + $0x50] sm:$0xff]  ;;  %v58_v7 = vld [vmem:[%s5779_s0 + $0x18] sm:$0xff]  ;;  %v67_v9 = vld [vmem:[%s5779_s0 + $0x60] sm:$0xff] }
   0x6   :  { %v57_v8 = vld [vmem:[%s5779_s0 + $0x10] sm:$0xff]  ;;  %v68_v11 = vld [vmem:[%s5779_s0 + $0x68] sm:$0xff]  ;;  %v59_v12 = vld [vmem:[%s5779_s0 + $0x20] sm:$0xff] }
   0x7   :  { %v69_v10 = vld [vmem:[%s5779_s0 + $0x70] sm:$0xff]  ;;  %v60_v14 = vld [vmem:[%s5779_s0 + $0x28] sm:$0xff]  ;;  %v70_v15 = vld [vmem:[%s5779_s0 + $0x78] sm:$0xff] }
   0x8   :  { %v61_v13 = vld [vmem:[%s5779_s0 + $0x30] sm:$0xff]  ;;  %v168_v16 = vld [vmem:[%s5781_s2 + $0x8] sm:$0xff]  ;;  %v62_v17 = vld [vmem:[%s5779_s0 + $0x38] sm:$0xff] }
   0x9   :  { %v167_v18 = vld [vmem:[%s5781_s2] sm:$0xff]  ;;  %v36_v19 = vld [vmem:[%s5782_s3 + $0x78] sm:$0xff]  ;;  %v35_v22 = vld [vmem:[%s5782_s3 + $0x70] sm:$0xff] }
   0xa   :  { %105 = vperm.xlu2 %3198, %v66_v4   ;;  %v3316_v20 = vand.u32 4294901760, %v36_v19  ;;  %v171_v21 = vld [vmem:[%s5781_s2 + $0x20] sm:$0xff]  ;;  %v169_v23 = vld [vmem:[%s5781_s2 + $0x10] sm:$0xff]  ;;  %v170_v24 = vld [vmem:[%s5781_s2 + $0x18] sm:$0xff]  ;;  %v3333_v26 = vand.u32 4294901760, %v35_v22 }
   0xb   :  { %99 = vperm.xlu0 %3196, %v64_v5   ;;  %102 = vperm.xlu1 %3197, %v65_v6   ;;  %v34_v27 = vld [vmem:[%s5782_s3 + $0x68] sm:$0xff]  ;;  %v33_v31 = vld [vmem:[%s5782_s3 + $0x60] sm:$0xff]  ;;  %v32_v36 = vld [vmem:[%s5782_s3 + $0x58] sm:$0xff] }
   0xc   :  { %v3331_v25 = vsub.f32 %v36_v19, %v3316_v20  ;;  %392 = vmatpush.msra.mxu0 %v3316_v20  ;;  %3160 = vmatpush.msra.mxu2 %v3316_v20  ;;  %v3344_v29 = vsub.f32 %v35_v22, %v3333_v26  ;;  %v3346_v30 = vand.u32 4294901760, %v34_v27  ;;  %v3360_v35 = vand.u32 4294901760, %v33_v31  ;;  %v174_v41 = vld [vmem:[%s5781_s2 + $0x38] sm:$0xff]  ;;  %v31_v43 = vld [vmem:[%s5782_s3 + $0x50] sm:$0xff]  ;;  %v172_v44 = vld [vmem:[%s5781_s2 + $0x28] sm:$0xff] }
   0xd   :  { %v3382_v42 = vand.u32 4294901760, %v32_v36  ;;  %v173_v45 = vld [vmem:[%s5781_s2 + $0x30] sm:$0xff]  ;;  %v3402_v49 = vand.u32 4294901760, %v31_v43  ;;  %v30_v51 = vld [vmem:[%s5782_s3 + $0x48] sm:$0xff]  ;;  %v29_v57 = vld [vmem:[%s5782_s3 + $0x40] sm:$0xff] }
   0xe   :  { %v3341_v28 = vand.u32 4294901760, %v3331_v25  ;;  %394 = vmatpush.msra.mxu0 %v3333_v26  ;;  %v3355_v33 = vand.u32 4294901760, %v3344_v29  ;;  %v3358_v34 = vsub.f32 %v34_v27, %v3346_v30  ;;  %3161 = vmatpush.msra.mxu2 %v3333_v26  ;;  %v3375_v40 = vsub.f32 %v33_v31, %v3360_v35  ;;  %v28_v63 = vld [vmem:[%s5782_s3 + $0x38] sm:$0xff]  ;;  %v177_v3 = vld [vmem:[%s5781_s2 + $0x50] sm:$0xff] }
   0xf   :  { %v3405_v50 = vsub.f32 %v32_v36, %v3382_v42  ;;  %v3418_v54 = vsub.f32 %v31_v43, %v3402_v49  ;;  %v3420_v55 = vand.u32 4294901760, %v30_v51  ;;  %v3440_v62 = vand.u32 4294901760, %v29_v57  ;;  %v27_v6 = vld [vmem:[%s5782_s3 + $0x30] sm:$0xff] }
  0x10   :  { %5887 = vst [vmem:[#allocation5_spill] sm:$0xff] %v3341_v28  ;;  %v555_v32 = vsub.f32 %v3331_v25, %v3341_v28  ;;  %396 = vmatpush.msra.mxu0 %v3346_v30  ;;  %v561_v38 = vsub.f32 %v3344_v29, %v3355_v33  ;;  %v3372_v39 = vand.u32 4294901760, %v3358_v34  ;;  %3162 = vmatpush.msra.mxu2 %v3346_v30  ;;  %v3400_v48 = vand.u32 4294901760, %v3375_v40 }
  0x11   :  { %5888 = vst [vmem:[#allocation6_spill] sm:$0xff] %v3355_v33  ;;  %v3423_v56 = vand.u32 4294901760, %v3405_v50  ;;  %v3433_v59 = vand.u32 4294901760, %v3418_v54  ;;  %v3436_v60 = vsub.f32 %v30_v51, %v3420_v55  ;;  %v3454_v2 = vand.u32 4294901760, %v28_v63  ;;  %v178_v51 = vld [vmem:[%s5781_s2 + $0x58] sm:$0xff] }
  0x12   :  { %81 = vperm.xlu2 %3198, %v58_v7   ;;  %v3367_v37 = vand.u32 4294901760, %v555_v32  ;;  %5889 = vst [vmem:[#allocation7_spill] sm:$0xff] %v3372_v39  ;;  %398 = vmatpush.msra.mxu0 %v3360_v35  ;;  %v3395_v46 = vand.u32 4294901760, %v561_v38  ;;  %v567_v47 = vsub.f32 %v3358_v34, %v3372_v39  ;;  %v573_v53 = vsub.f32 %v3375_v40, %v3400_v48  ;;  %v175_v7 = vld [vmem:[%s5781_s2 + $0x40] sm:$0xff]  ;;  %v24_v32 = vld [vmem:[%s5782_s3 + $0x18] sm:$0xff] }
  0x13   :  { %78 = vperm.xlu0 %3196, %v57_v8   ;;  %108 = vperm.xlu1 %3197, %v67_v9   ;;  %5890 = vst [vmem:[#allocation8_spill] sm:$0xff] %v3400_v48  ;;  %v579_v61 = vsub.f32 %v3405_v50, %v3423_v56  ;;  %v585_v0 = vsub.f32 %v3418_v54, %v3433_v59  ;;  %v3452_v1 = vand.u32 4294901760, %v3436_v60  ;;  %v176_v8 = vld [vmem:[%s5781_s2 + $0x48] sm:$0xff] }
  0x14   :  { %557 = vmatpush.msra.mxu1 %v3367_v37  ;;  %3176 = vmatpush.msra.mxu3 %v3367_v37  ;;  %v3413_v52 = vand.u32 4294901760, %v567_v47  ;;  %5891 = vst [vmem:[#allocation9_spill] sm:$0xff] %v3423_v56  ;;  %v3430_v58 = vand.u32 4294901760, %v573_v53  ;;  %v3462_v5 = vsub.f32 %v29_v57, %v3440_v62  ;;  %v23_v47 = vld [vmem:[%s5782_s3 + $0x10] sm:$0xff]  ;;  %v179_v53 = vld [vmem:[%s5781_s2 + $0x60] sm:$0xff] }
  0x15   :  { %3163 = vmatpush.msra.mxu2 %v3360_v35  ;;  %400 = vmatpush.msra.mxu0 %v3382_v42  ;;  %5892 = vst [vmem:[#allocation10_spill] sm:$0xff] %v3433_v59  ;;  %v3459_v4 = vand.u32 4294901760, %v579_v61  ;;  %v3476_v9 = vand.u32 4294901760, %v585_v0  ;;  %v3565_v0 = vand.u32 4294901760, %v23_v47 }
  0x16   :  { %563 = vmatpush.msra.mxu1 %v3395_v46  ;;  %3177 = vmatpush.msra.mxu3 %v3395_v46  ;;  %5893 = vst [vmem:[#allocation11_spill] sm:$0xff] %v3452_v1 }
  0x17   :  { %3164 = vmatpush.msra.mxu2 %v3382_v42  ;;  %402 = vmatpush.msra.mxu0 %v3402_v49 }
  0x18   :  { %569 = vmatpush.msra.mxu1 %v3413_v52  ;;  %3178 = vmatpush.msra.mxu3 %v3413_v52 }
  0x19   :  { %3165 = vmatpush.msra.mxu2 %v3402_v49  ;;  %404 = vmatpush.msra.mxu0 %v3420_v55 }
  0x1a   :  { %114 = vperm.xlu2 %3198, %v69_v10   ;;  %575 = vmatpush.msra.mxu1 %v3430_v58  ;;  %v591_v10 = vsub.f32 %v3436_v60, %v3452_v1 }
  0x1b   :  { %111 = vperm.xlu0 %3196, %v68_v11   ;;  %84 = vperm.xlu1 %3197, %v59_v12   ;;  %v3481_v11 = vsub.f32 %v28_v63, %v3454_v2  ;;  %v3483_v12 = vand.u32 4294901760, %v27_v6 }
  0x1c   :  { %3179 = vmatpush.msra.mxu3 %v3430_v58  ;;  %581 = vmatpush.msra.mxu1 %v3459_v4 }
  0x1d   :  { %3166 = vmatpush.msra.mxu2 %v3420_v55  ;;  %406 = vmatpush.msra.mxu0 %v3440_v62 }
  0x1e   :  { %3180 = vmatpush.msra.mxu3 %v3459_v4  ;;  %587 = vmatpush.msra.mxu1 %v3476_v9 }
  0x1f   :  { %3167 = vmatpush.msra.mxu2 %v3440_v62  ;;  %408 = vmatpush.msra.mxu0 %v3454_v2 }
  0x20   :  { %3181 = vmatpush.msra.mxu3 %v3476_v9 }
  0x21   :  { %3168 = vmatpush.msra.mxu2 %v3454_v2  ;;  %410 = vmatpush.msra.mxu0 %v3483_v12 }
  0x22   :  { %90 = vperm.xlu2 %3198, %v61_v13   ;;  %v3487_v13 = vand.u32 4294901760, %v3462_v5 }
  0x23   :  { %87 = vperm.xlu0 %3196, %v60_v14   ;;  %117 = vperm.xlu1 %3197, %v70_v15   ;;  %v26_v14 = vld [vmem:[%s5782_s3 + $0x28] sm:$0xff]  ;;  %v3494_v15 = vand.u32 4294901760, %v591_v10  ;;  %v3581_v10 = vsub.f32 %v23_v47, %v3565_v0 }
  0x24   :  { %5894 = vst [vmem:[#allocation12_spill] sm:$0xff] %v3487_v13  ;;  %v597_v19 = vsub.f32 %v3462_v5, %v3487_v13  ;;  %3169 = vmatpush.msra.mxu2 %v3483_v12 }
  0x25   :  { %5895 = vst [vmem:[#allocation13_spill] sm:$0xff] %v3494_v15  ;;  %593 = vmatpush.msra.mxu1 %v3494_v15  ;;  %3182 = vmatpush.msra.mxu3 %v3494_v15 }
  0x26   :  { %v3521_v31 = vand.u32 4294901760, %v597_v19 }
  0x28   :  { %5898 = vst [vmem:[#allocation16_spill] sm:$0xff] %v3521_v31  ;;  %599 = vmatpush.msra.mxu1 %v3521_v31  ;;  %3183 = vmatpush.msra.mxu3 %v3521_v31 }
  0x2a   :  { %187 = vperm.xlu2 %3198, %v168_v16   ;;  %v3497_v16 = vand.u32 4294901760, %v3481_v11 }
  0x2b   :  { %93 = vperm.xlu0 %3196, %v62_v17   ;;  %184 = vperm.xlu1 %3197, %v167_v18   ;;  %v3500_v17 = vsub.f32 %v27_v6, %v3483_v12  ;;  %v3502_v18 = vand.u32 4294901760, %v26_v14  ;;  %v22_v6 = vld [vmem:[%s5782_s3 + $0x8] sm:$0xff] }
  0x2c   :  { %5896 = vst [vmem:[#allocation14_spill] sm:$0xff] %v3497_v16  ;;  %v603_v22 = vsub.f32 %v3481_v11, %v3497_v16 }
  0x2d   :  { %412 = vmatpush.msra.mxu0 %v3502_v18  ;;  %3170 = vmatpush.msra.mxu2 %v3502_v18 }
  0x2e   :  { %v3530_v36 = vand.u32 4294901760, %v603_v22 }
  0x30   :  { %5899 = vst [vmem:[#allocation17_spill] sm:$0xff] %v3530_v36  ;;  %605 = vmatpush.msra.mxu1 %v3530_v36  ;;  %3184 = vmatpush.msra.mxu3 %v3530_v36 }
  0x32   :  { %196 = vperm.xlu2 %3198, %v171_v21   ;;  %v25_v21 = vld [vmem:[%s5782_s3 + $0x20] sm:$0xff] }
  0x33   :  { %190 = vperm.xlu0 %3196, %v169_v23   ;;  %193 = vperm.xlu1 %3197, %v170_v24   ;;  %v3514_v23 = vand.u32 4294901760, %v3500_v17  ;;  %v3517_v24 = vsub.f32 %v26_v14, %v3502_v18  ;;  %v3519_v27 = vand.u32 4294901760, %v25_v21  ;;  %v3583_v14 = vand.u32 4294901760, %v22_v6 }
  0x35   :  { %5897 = vst [vmem:[#allocation15_spill] sm:$0xff] %v3514_v23  ;;  %v609_v38 = vsub.f32 %v3500_v17, %v3514_v23  ;;  %v3538_v43 = vsub.f32 %v25_v21, %v3519_v27  ;;  %v21_v21 = vld [vmem:[%s5782_s3] sm:$0xff]  ;;  %414 = vmatpush.msra.mxu0 %v3519_v27  ;;  %3171 = vmatpush.msra.mxu2 %v3519_v27 }
  0x37   :  { %v3558_v57 = vand.u32 4294901760, %v609_v38  ;;  %v3563_v63 = vand.u32 4294901760, %v3538_v43  ;;  %v3599_v38 = vsub.f32 %v22_v6, %v3583_v14  ;;  %v279_v6 = vld [vmem:[%s5780_s1] sm:$0xff] }
  0x39   :  { %5901 = vst [vmem:[#allocation19_spill] sm:$0xff] %v3558_v57  ;;  %611 = vmatpush.msra.mxu1 %v3558_v57  ;;  %3185 = vmatpush.msra.mxu3 %v3558_v57  ;;  %v182_v57 = vld [vmem:[%s5781_s2 + $0x78] sm:$0xff] }
  0x3a   :  { %205 = vperm.xlu2 %3198, %v174_v41   ;;  %v3535_v41 = vand.u32 4294901760, %v3517_v24  ;;  %5902 = vst [vmem:[#allocation20_spill] sm:$0xff] %v3563_v63 }
  0x3b   :  { %199 = vperm.xlu0 %3196, %v172_v44   ;;  %202 = vperm.xlu1 %3197, %v173_v45   ;;  %v180_v44 = vld [vmem:[%s5781_s2 + $0x68] sm:$0xff]  ;;  %v3543_v45 = vand.u32 4294901760, %v24_v32 }
  0x3c   :  { %5900 = vst [vmem:[#allocation18_spill] sm:$0xff] %v3535_v41  ;;  %v615_v61 = vsub.f32 %v3517_v24, %v3535_v41 }
  0x3d   :  { %416 = vmatpush.msra.mxu0 %v3543_v45  ;;  %3172 = vmatpush.msra.mxu2 %v3543_v45 }
  0x3f   :  { %418 = vmatpush.msra.mxu0 %v3565_v0  ;;  %3173 = vmatpush.msra.mxu2 %v3565_v0 }
  0x41   :  { %420 = vmatpush.msra.mxu0 %v3583_v14  ;;  %3174 = vmatpush.msra.mxu2 %v3583_v14 }
  0x42   :  { %214 = vperm.xlu2 %3198, %v177_v3   ;;  %v3568_v3 = vsub.f32 %v24_v32, %v3543_v45  ;;  %v3596_v32 = vand.u32 4294901760, %v3581_v10 }
  0x43   :  { %208 = vperm.xlu0 %3196, %v175_v7   ;;  %211 = vperm.xlu1 %3197, %v176_v8   ;;  %v3576_v7 = vand.u32 4294901760, %v615_v61  ;;  %v621_v8 = vsub.f32 %v3538_v43, %v3563_v63 }
  0x44   :  { %v3586_v19 = vand.u32 4294901760, %v3568_v3  ;;  %5905 = vst [vmem:[#allocation23_spill] sm:$0xff] %v3596_v32 }
  0x45   :  { %5903 = vst [vmem:[#allocation21_spill] sm:$0xff] %v3576_v7  ;;  %v3593_v22 = vand.u32 4294901760, %v621_v8  ;;  %617 = vmatpush.msra.mxu1 %v3576_v7  ;;  %v181_v8 = vld [vmem:[%s5781_s2 + $0x70] sm:$0xff]  ;;  %3186 = vmatpush.msra.mxu3 %v3576_v7 }
  0x46   :  { %5904 = vst [vmem:[#allocation22_spill] sm:$0xff] %v3586_v19  ;;  %v627_v47 = vsub.f32 %v3568_v3, %v3586_v19 }
  0x47   :  { %623 = vmatpush.msra.mxu1 %v3593_v22  ;;  %3187 = vmatpush.msra.mxu3 %v3593_v22 }
  0x4a   :  { %223 = vperm.xlu2 %3198, %v180_v44   ;;  %v3601_v44 = vand.u32 4294901760, %v21_v21 }
  0x4b   :  { %217 = vperm.xlu0 %3196, %v178_v51   ;;  %220 = vperm.xlu1 %3197, %v179_v53   ;;  %v633_v51 = vsub.f32 %v3581_v10, %v3596_v32  ;;  %v3612_v53 = vand.u32 4294901760, %v3599_v38 }
  0x4c   :  { %v3615_v61 = vsub.f32 %v21_v21, %v3601_v44  ;;  %v3630_v21 = vand.u32 4294901760, %v627_v47  ;;  %422 = vmatpush.msra.mxu0 %v3601_v44  ;;  %3175 = vmatpush.msra.mxu2 %v3601_v44 }
  0x4d   :  { %v639_v36 = vsub.f32 %v3599_v38, %v3612_v53  ;;  %v3640_v15 = vand.u32 4294901760, %v633_v51 }
  0x4e   :  { %v3635_v31 = vand.u32 4294901760, %v3615_v61  ;;  %629 = vmatpush.msra.mxu1 %v3630_v21  ;;  %3188 = vmatpush.msra.mxu3 %v3630_v21 }
  0x4f   :  { %v3646_v47 = vand.u32 4294901760, %v639_v36  ;;  %v280_v36 = vld [vmem:[%s5780_s1 + $0x8] sm:$0xff]  ;;  %715 = vmatpush.msrb.mxu2 %v3331_v25  ;;  %974 = vmatpush.msrb.mxu0 %v3341_v28 }
  0x50   :  { %v645_v7 = vsub.f32 %v3615_v61, %v3635_v31  ;;  %635 = vmatpush.msra.mxu1 %v3640_v15  ;;  %3189 = vmatpush.msra.mxu3 %v3640_v15 }
  0x51   :  { %718 = vmatpush.msrb.mxu2 %v3344_v29  ;;  %978 = vmatpush.msrb.mxu0 %v3355_v33  ;;  %v293_v33 = vld [vmem:[%s5780_s1 + $0x70] sm:$0xff] }
  0x52   :  { %296 = vperm.xlu2 %3198, %v279_v6   ;;  %v3652_v51 = vand.u32 4294901760, %v645_v7  ;;  %v281_v6 = vld [vmem:[%s5780_s1 + $0x10] sm:$0xff]  ;;  %641 = vmatpush.msra.mxu1 %v3646_v47 }
  0x53   :  { %226 = vperm.xlu0 %3196, %v181_v8   ;;  %229 = vperm.xlu1 %3197, %v182_v57   ;;  %v282_v57 = vld [vmem:[%s5780_s1 + $0x18] sm:$0xff]  ;;  %v285_v7 = vld [vmem:[%s5780_s1 + $0x30] sm:$0xff]  ;;  %v283_v8 = vld [vmem:[%s5780_s1 + $0x20] sm:$0xff] }
  0x54   :  { %3190 = vmatpush.msra.mxu3 %v3646_v47  ;;  %647 = vmatpush.msra.mxu1 %v3652_v51 }
  0x55   :  { %721 = vmatpush.msrb.mxu2 %v3358_v34  ;;  %982 = vmatpush.msrb.mxu0 %v3372_v39  ;;  %v292_v39 = vld [vmem:[%s5780_s1 + $0x68] sm:$0xff] }
  0x56   :  { %3191 = vmatpush.msra.mxu3 %v3652_v51  ;;  %1101 = vmatpush.msrb.mxu1 %v3316_v20 }
  0x57   :  { %724 = vmatpush.msrb.mxu2 %v3375_v40  ;;  %986 = vmatpush.msrb.mxu0 %v3400_v48 }
  0x58   :  { %843 = vmatpush.msrb.mxu3 %v3316_v20  ;;  %1103 = vmatpush.msrb.mxu1 %v3333_v26 }
  0x59   :  { %727 = vmatpush.msrb.mxu2 %v3405_v50  ;;  %990 = vmatpush.msrb.mxu0 %v3423_v56 }
  0x5a   :  { %305 = vperm.xlu2 %3198, %v282_v57   ;;  %845 = vmatpush.msrb.mxu3 %v3333_v26  ;;  %v284_v57 = vld [vmem:[%s5780_s1 + $0x28] sm:$0xff] }
  0x5b   :  { %299 = vperm.xlu0 %3196, %v280_v36   ;;  %302 = vperm.xlu1 %3197, %v281_v6   ;;  %v288_v36 = vld [vmem:[%s5780_s1 + $0x48] sm:$0xff]  ;;  %v286_v6 = vld [vmem:[%s5780_s1 + $0x38] sm:$0xff] }
  0x5c   :  { %847 = vmatpush.msrb.mxu3 %v3346_v30  ;;  %1105 = vmatpush.msrb.mxu1 %v3346_v30 }
  0x5d   :  { %730 = vmatpush.msrb.mxu2 %v3418_v54  ;;  %994 = vmatpush.msrb.mxu0 %v3433_v59 }
  0x5e   :  { %849 = vmatpush.msrb.mxu3 %v3360_v35  ;;  %1107 = vmatpush.msrb.mxu1 %v3360_v35 }
  0x5f   :  { %733 = vmatpush.msrb.mxu2 %v3436_v60  ;;  %998 = vmatpush.msrb.mxu0 %v3452_v1  ;;  %v290_v1 = vld [vmem:[%s5780_s1 + $0x58] sm:$0xff] }
  0x60   :  { %851 = vmatpush.msrb.mxu3 %v3382_v42  ;;  %1109 = vmatpush.msrb.mxu1 %v3382_v42 }
  0x61   :  { %736 = vmatpush.msrb.mxu2 %v3462_v5  ;;  %1002 = vmatpush.msrb.mxu0 %v3487_v13 }
  0x62   :  { %314 = vperm.xlu2 %3198, %v285_v7   ;;  %v287_v7 = vld [vmem:[%s5780_s1 + $0x40] sm:$0xff]  ;;  %853 = vmatpush.msrb.mxu3 %v3402_v49 }
  0x63   :  { %308 = vperm.xlu0 %3196, %v283_v8   ;;  %311 = vperm.xlu1 %3197, %v284_v57   ;;  %v53_v8 = vlaneseq  ;;  %v3720_v57 = vpop.permute.xlu2 %75 }
  0x64   :  { %855 = vmatpush.msrb.mxu3 %v3420_v55  ;;  %1111 = vmatpush.msrb.mxu1 %v3402_v49 }
  0x65   :  { %739 = vmatpush.msrb.mxu2 %v3481_v11  ;;  %1006 = vmatpush.msrb.mxu0 %v3497_v16 }
  0x66   :  { %857 = vmatpush.msrb.mxu3 %v3440_v62  ;;  %1113 = vmatpush.msrb.mxu1 %v3420_v55 }
  0x67   :  { %742 = vmatpush.msrb.mxu2 %v3500_v17  ;;  %1010 = vmatpush.msrb.mxu0 %v3514_v23  ;;  %v294_v23 = vld [vmem:[%s5780_s1 + $0x78] sm:$0xff] }
  0x68   :  { %859 = vmatpush.msrb.mxu3 %v3454_v2  ;;  %1115 = vmatpush.msrb.mxu1 %v3440_v62 }
  0x69   :  { %745 = vmatpush.msrb.mxu2 %v3517_v24  ;;  %1014 = vmatpush.msrb.mxu0 %v3535_v41 }
  0x6a   :  { %323 = vperm.xlu2 %3198, %v288_v36   ;;  %v291_v36 = vld [vmem:[%s5780_s1 + $0x60] sm:$0xff]  ;;  %861 = vmatpush.msrb.mxu3 %v3483_v12 }
  0x6b   :  { %317 = vperm.xlu0 %3196, %v286_v6   ;;  %320 = vperm.xlu1 %3197, %v287_v7   ;;  %v3727_v6 = vand.u32 127, %v53_v8  ;;  %v289_v7 = vld [vmem:[%s5780_s1 + $0x50] sm:$0xff]  ;;  %v5797_v8 = vmov 0.0  }
  0x6c   :  { %1117 = vmatpush.msrb.mxu1 %v3454_v2  ;;  %863 = vmatpush.msrb.mxu3 %v3502_v18 }
  0x6d   :  { %vm120_vm0 = vcmp.eq.s32.totalorder %v3720_v57, %v3727_v6  ;;  %748 = vmatpush.msrb.mxu2 %v3538_v43  ;;  %1018 = vmatpush.msrb.mxu0 %v3563_v63 }
  0x6e   :  { %v2969_v13 = vsel %vm120_vm0, 1.0, %v5797_v8  ;;  %1119 = vmatpush.msrb.mxu1 %v3483_v12  ;;  %865 = vmatpush.msrb.mxu3 %v3519_v27 }
  0x6f   :  { %v3779_v56 = vsub.f32 %v2969_v13, %v2969_v13  ;;  %751 = vmatpush.msrb.mxu2 %v3568_v3  ;;  %1022 = vmatpush.msrb.mxu0 %v3586_v19 }
  0x70   :  { %1121 = vmatpush.msrb.mxu1 %v3502_v18  ;;  %867 = vmatpush.msrb.mxu3 %v3543_v45 }
  0x71   :  { %754 = vmatpush.msrb.mxu2 %v3581_v10  ;;  %v5914_v63 = vand.u32 4294901760, %v3779_v56  ;;  %1026 = vmatpush.msrb.mxu0 %v3596_v32 }
  0x72   :  { %332 = vperm.xlu2 %3198, %v291_v36   ;;  %1123 = vmatpush.msrb.mxu1 %v3519_v27 }
  0x73   :  { %326 = vperm.xlu0 %3196, %v289_v7   ;;  %329 = vperm.xlu1 %3197, %v290_v1   ;;  %v5801_v7 = vmov 1.0  }
  0x74   :  { %1125 = vmatpush.msrb.mxu1 %v3543_v45  ;;  %869 = vmatpush.msrb.mxu3 %v3565_v0 }
  0x75   :  { %v3748_v59 = vpop.permute.xlu0 %96  ;;  %v3750_v16 = vpop.permute.xlu1 %72  ;;  %757 = vmatpush.msrb.mxu2 %v3599_v38  ;;  %1030 = vmatpush.msrb.mxu0 %v3612_v53 }
  0x76   :  { %5906 = vst [vmem:[#allocation24_spill] sm:$0xff] %v3748_v59  ;;  %vm127_vm1 = vcmp.eq.s32.totalorder %v3748_v59, %v3727_v6  ;;  %vm119_vm2 = vcmp.eq.s32.totalorder %v3750_v16, %v3727_v6  ;;  %1127 = vmatpush.msrb.mxu1 %v3565_v0  ;;  %871 = vmatpush.msrb.mxu3 %v3583_v14 }
  0x77   :  { %5907 = vst [vmem:[#allocation25_spill] sm:$0xff] %v3750_v16  ;;  %v2976_v1 = vsel %vm127_vm1, 1.0, %v5797_v8  ;;  %v2968_v36 = vsel %vm119_vm2, 1.0, %v5797_v8  ;;  %3016 = vmatmul.msk.f32.vlgmr.msra.gmra.mxu1 %vm119_vm2, %v5801_v7  ;;  %3024 = vmatmul.msk.f32.vlgmr.msra.gmra.mxu3 %vm127_vm1, %v5801_v7  ;;  %v3793_v7 = vpop.permute.xlu2 %105  ;;  %v434_v16 = vsub.f32 %v3779_v56, %v5914_v63 }
  0x78   :  { %v3781_v48 = vsub.f32 %v2976_v1, %v2976_v1  ;;  %v3783_v8 = vsub.f32 %v2968_v36, %v2968_v36  ;;  %1129 = vmatpush.msrb.mxu1 %v3583_v14  ;;  %873 = vmatpush.msrb.mxu3 %v3601_v44  ;;  %vm130_vm6 = vcmp.eq.s32.totalorder %v3793_v7, %v3727_v6 }
  0x79   :  { %v435_v63 = vand.u32 4294901760, %v434_v16  ;;  %760 = vmatpush.msrb.mxu2 %v3615_v61  ;;  %1034 = vmatpush.msrb.mxu0 %v3635_v31 }
  0x7a   :  { %5908 = vst [vmem:[#allocation26_spill] sm:$0xff] %v3781_v48  ;;  %341 = vperm.xlu2 %3198, %v294_v23   ;;  %v5808_v13 = vand.u32 4294901760, %v3783_v8  ;;  %v5807_v1 = vand.u32 4294901760, %v3781_v48  ;;  %1131 = vmatpush.msrb.mxu1 %v3601_v44 }
  0x7b   :  { %335 = vperm.xlu0 %3196, %v292_v39   ;;  %338 = vperm.xlu1 %3197, %v293_v33   ;;  %v5911_v39 = vmov 0.0  }
  0x7c   :  { %v426_v36 = vsub.f32 %v3783_v8, %v5808_v13  ;;  %v490_v59 = vsub.f32 %v3781_v48, %v5807_v1  ;;  %v5912_v13 = vmov 1.0   ;;  %1363 = vmatpush.msra.mxu3 %v3367_v37  ;;  %1649 = vmatpush.msra.mxu1 %v3316_v20 }
  0x7d   :  { %v3809_v23 = vpop.permute.xlu0 %99  ;;  %v3811_v41 = vpop.permute.xlu1 %102 }
  0x7e   :  { %5909 = vst [vmem:[#allocation27_spill] sm:$0xff] %v3809_v23  ;;  %vm128_vm3 = vcmp.eq.s32.totalorder %v3809_v23, %v3727_v6  ;;  %vm129_vm4 = vcmp.eq.s32.totalorder %v3811_v41, %v3727_v6  ;;  %v427_v33 = vand.u32 4294901760, %v426_v36  ;;  %v491_v36 = vand.u32 4294901760, %v490_v59  ;;  %1369 = vmatpush.msra.mxu3 %v3395_v46  ;;  %1651 = vmatpush.msra.mxu1 %v3333_v26 }
  0x7f   :  { %5910 = vst [vmem:[#allocation28_spill] sm:$0xff] %v3811_v41  ;;  %v2977_v1 = vsel %vm128_vm3, 1.0, %v5911_v39  ;;  %3017 = vmatmul.msk.f32.gmra.mxu1 %vm120_vm0, %v5912_v13  ;;  %3025 = vmatmul.msk.f32.gmra.mxu3 %vm128_vm3, %v5912_v13  ;;  %v2978_v48 = vsel %vm129_vm4, 1.0, %v5911_v39  ;;  %v3847_v59 = vpop.permute.xlu2 %81 }
  0x80   :  { %v3833_v28 = vsub.f32 %v2977_v1, %v2977_v1  ;;  %428 = vmatmul.f32.vlgmr.msra.gmra.mxu0 %v427_v33  ;;  %492 = vmatmul.f32.vlgmr.msra.gmra.mxu2 %v491_v36  ;;  %v3849_v1 = vsub.f32 %v2978_v48, %v2978_v48  ;;  %vm122_vm5 = vcmp.eq.s32.totalorder %v3847_v59, %v3727_v6 }
  0x81   :  { %1198 = vmatpush.msra.mxu2 %v3316_v20  ;;  %v2971_v16 = vsel %vm122_vm5, 1.0, %v5911_v39  ;;  %1375 = vmatpush.msra.mxu3 %v3413_v52 }
  0x82   :  { %5913 = vst [vmem:[#allocation29_spill] sm:$0xff] %v3833_v28  ;;  %v5816_v23 = vand.u32 4294901760, %v3833_v28  ;;  %v3897_v32 = vsub.f32 %v2971_v16, %v2971_v16  ;;  %v5915_v19 = vand.u32 4294901760, %v3849_v1  ;;  %1653 = vmatpush.msra.mxu1 %v3346_v30  ;;  %1521 = vmatpush.msra.mxu0 %v3331_v25 }
  0x83   :  { %1200 = vmatpush.msra.mxu2 %v3333_v26  ;;  %1381 = vmatpush.msra.mxu3 %v3430_v58 }
  0x84   :  { %v498_v33 = vsub.f32 %v3833_v28, %v5816_v23  ;;  %1655 = vmatpush.msra.mxu1 %v3360_v35  ;;  %v5824_v16 = vand.u32 4294901760, %v3897_v32  ;;  %1524 = vmatpush.msra.mxu0 %v3344_v29 }
  0x85   :  { %v3862_v48 = vpop.permute.xlu0 %78  ;;  %v3864_v36 = vpop.permute.xlu1 %108  ;;  %1202 = vmatpush.msra.mxu2 %v3346_v30  ;;  %1387 = vmatpush.msra.mxu3 %v3459_v4 }
  0x86   :  { %vm121_vm7 = vcmp.eq.s32.totalorder %v3862_v48, %v3727_v6  ;;  %v499_v37 = vand.u32 4294901760, %v498_v33  ;;  %v2979_v33 = vsel %vm130_vm6, 1.0, %v5911_v39  ;;  %vm131_vm8 = vcmp.eq.s32.totalorder %v3864_v36, %v3727_v6  ;;  %1527 = vmatpush.msra.mxu0 %v3358_v34  ;;  %1657 = vmatpush.msra.mxu1 %v3382_v42  ;;  %v5917_v34 = vld [vmem:[#allocation13_spill] sm:$0xff] }
  0x87   :  { %v2970_v23 = vsel %vm121_vm7, 1.0, %v5911_v39  ;;  %3018 = vmatmul.msk.f32.gmra.mxu1 %vm121_vm7, %v5912_v13  ;;  %3026 = vmatmul.msk.f32.gmra.mxu3 %vm129_vm4, %v5912_v13  ;;  %v3902_v46 = vsub.f32 %v2979_v33, %v2979_v33  ;;  %v2980_v33 = vsel %vm131_vm8, 1.0, %v5911_v39 }
  0x88   :  { %v3893_v28 = vsub.f32 %v2970_v23, %v2970_v23  ;;  %436 = vmatmul.f32.gmra.mxu0 %v435_v63  ;;  %500 = vmatmul.f32.gmra.mxu2 %v499_v37  ;;  %v506_v23 = vsub.f32 %v3849_v1, %v5915_v19  ;;  %v3955_v29 = vsub.f32 %v2980_v33, %v2980_v33 }
  0x89   :  { %1204 = vmatpush.msra.mxu2 %v3360_v35  ;;  %1393 = vmatpush.msra.mxu3 %v3476_v9  ;;  %v5946_v59 = vld [vmem:[#allocation29_spill] sm:$0xff] }
  0x8a   :  { %v5823_v41 = vand.u32 4294901760, %v3893_v28  ;;  %v507_v58 = vand.u32 4294901760, %v506_v23  ;;  %v450_v23 = vsub.f32 %v3897_v32, %v5824_v16  ;;  %1530 = vmatpush.msra.mxu0 %v3375_v40  ;;  %1659 = vmatpush.msra.mxu1 %v3402_v49  ;;  %v5947_v48 = vand.u32 4294901760, %v5946_v59 }
  0x8b   :  { %1206 = vmatpush.msra.mxu2 %v3382_v42  ;;  %1399 = vmatpush.msra.mxu3 %v5917_v34 }
  0x8c   :  { %v442_v63 = vsub.f32 %v3893_v28, %v5823_v41  ;;  %1533 = vmatpush.msra.mxu0 %v3405_v50  ;;  %v451_v9 = vand.u32 4294901760, %v450_v23  ;;  %1661 = vmatpush.msra.mxu1 %v3420_v55 }
  0x8d   :  { %v3916_v52 = vpop.permute.xlu0 %111  ;;  %v3918_v37 = vpop.permute.xlu1 %84  ;;  %1208 = vmatpush.msra.mxu2 %v3402_v49 }
  0x8e   :  { %vm123_vm9 = vcmp.eq.s32.totalorder %v3918_v37, %v3727_v6  ;;  %v443_v19 = vand.u32 4294901760, %v442_v63  ;;  %v3945_v63 = vpop.permute.xlu2 %114  ;;  %vm132_vm10 = vcmp.eq.s32.totalorder %v3916_v52, %v3727_v6  ;;  %1536 = vmatpush.msra.mxu0 %v3418_v54  ;;  %1663 = vmatpush.msra.mxu1 %v3440_v62  ;;  %v5921_v54 = vld [vmem:[#allocation19_spill] sm:$0xff] }
  0x8f   :  { %v2972_v25 = vsel %vm123_vm9, 1.0, %v5911_v39  ;;  %3019 = vmatmul.msk.f32.gmra.mxu1 %vm122_vm5, %v5912_v13  ;;  %3027 = vmatmul.msk.f32.gmra.mxu3 %vm130_vm6, %v5912_v13  ;;  %vm133_vm13 = vcmp.eq.s32.totalorder %v3945_v63, %v3727_v6 }
  0x90   :  { %444 = vmatmul.f32.gmra.mxu0 %v443_v19  ;;  %508 = vmatmul.f32.gmra.mxu2 %v507_v58  ;;  %v3948_v41 = vsub.f32 %v2972_v25, %v2972_v25  ;;  %v5916_v19 = vand.u32 4294901760, %v3902_v46  ;;  %v5918_v58 = vld [vmem:[#allocation16_spill] sm:$0xff] }
  0x91   :  { %1210 = vmatpush.msra.mxu2 %v3420_v55  ;;  %1405 = vmatpush.msra.mxu3 %v5918_v58 }
  0x92   :  { %v514_v4 = vsub.f32 %v3902_v46, %v5916_v19  ;;  %v5825_v40 = vand.u32 4294901760, %v3948_v41  ;;  %v2981_v19 = vsel %vm132_vm10, 1.0, %v5911_v39  ;;  %1539 = vmatpush.msra.mxu0 %v3436_v60  ;;  %1665 = vmatpush.msra.mxu1 %v3454_v2  ;;  %v5922_v60 = vld [vmem:[#allocation21_spill] sm:$0xff]  ;;  %v5939_v57 = vand.u32 4294901760, %v3948_v41 }
  0x93   :  { %1212 = vmatpush.msra.mxu2 %v3440_v62  ;;  %v4003_v23 = vsub.f32 %v2981_v19, %v2981_v19 }
  0x94   :  { %v515_v50 = vand.u32 4294901760, %v514_v4  ;;  %v458_v58 = vsub.f32 %v3948_v41, %v5825_v40  ;;  %v5919_v4 = vld [vmem:[#allocation17_spill] sm:$0xff]  ;;  %1542 = vmatpush.msra.mxu0 %v3462_v5  ;;  %1667 = vmatpush.msra.mxu1 %v3483_v12 }
  0x95   :  { %v3966_v25 = vpop.permute.xlu0 %87  ;;  %1214 = vmatpush.msra.mxu2 %v3454_v2  ;;  %1411 = vmatpush.msra.mxu3 %v5919_v4  ;;  %v4044_v40 = vpop.permute.xlu1 %117 }
  0x96   :  { %vm124_vm11 = vcmp.eq.s32.totalorder %v3966_v25, %v3727_v6  ;;  %v4001_v16 = vpop.permute.xlu2 %90  ;;  %1545 = vmatpush.msra.mxu0 %v3481_v11  ;;  %1669 = vmatpush.msra.mxu1 %v3502_v18  ;;  %vm134_vm15 = vcmp.eq.s32.totalorder %v4044_v40, %v3727_v6 }
  0x97   :  { %v2973_v33 = vsel %vm124_vm11, 1.0, %v5911_v39  ;;  %3020 = vmatmul.msk.f32.gmra.mxu1 %vm123_vm9, %v5912_v13  ;;  %3028 = vmatmul.msk.f32.gmra.mxu3 %vm131_vm8, %v5912_v13  ;;  %vm125_vm12 = vcmp.eq.s32.totalorder %v4001_v16, %v3727_v6 }
  0x98   :  { %452 = vmatmul.f32.gmra.mxu0 %v451_v9  ;;  %516 = vmatmul.f32.gmra.mxu2 %v515_v50  ;;  %v3994_v34 = vsub.f32 %v2973_v33, %v2973_v33  ;;  %v5920_v9 = vand.u32 4294901760, %v3955_v29  ;;  %v459_v33 = vand.u32 4294901760, %v458_v58  ;;  %v2974_v4 = vsel %vm125_vm12, 1.0, %v5911_v39 }
  0x99   :  { %1216 = vmatpush.msra.mxu2 %v3483_v12  ;;  %1417 = vmatpush.msra.mxu3 %v5921_v54  ;;  %v529_v58 = vand.u32 4294901760, %v4003_v23 }
  0x9a   :  { %v522_v50 = vsub.f32 %v3955_v29, %v5920_v9  ;;  %v465_v19 = vand.u32 4294901760, %v3994_v34  ;;  %v2982_v9 = vsel %vm133_vm13, 1.0, %v5911_v39  ;;  %1548 = vmatpush.msra.mxu0 %v3500_v17  ;;  %1671 = vmatpush.msra.mxu1 %v3519_v27 }
  0x9b   :  { %1218 = vmatpush.msra.mxu2 %v3502_v18  ;;  %1423 = vmatpush.msra.mxu3 %v5922_v60  ;;  %v4042_v60 = vsub.f32 %v2974_v4, %v2974_v4 }
  0x9c   :  { %v523_v5 = vand.u32 4294901760, %v522_v50  ;;  %v466_v50 = vsub.f32 %v3994_v34, %v465_v19  ;;  %1551 = vmatpush.msra.mxu0 %v3517_v24  ;;  %1673 = vmatpush.msra.mxu1 %v3543_v45 }
  0x9d   :  { %v4039_v54 = vpop.permute.xlu0 %93  ;;  %1220 = vmatpush.msra.mxu2 %v3519_v27  ;;  %1429 = vmatpush.msra.mxu3 %v3593_v22  ;;  %v473_v22 = vand.u32 4294901760, %v4042_v60  ;;  %v4348_v36 = vpop.permute.xlu1 %184 }
  0x9e   :  { %vm126_vm14 = vcmp.eq.s32.totalorder %v4039_v54, %v3727_v6  ;;  %v467_v11 = vand.u32 4294901760, %v466_v50  ;;  %1554 = vmatpush.msra.mxu0 %v3538_v43  ;;  %1675 = vmatpush.msra.mxu1 %v3565_v0  ;;  %5953 = vst [vmem:[#allocation13_spill] sm:$0xff] %v4348_v36 }
  0x9f   :  { %3021 = vmatmul.msk.f32.gmra.mxu1 %vm124_vm11, %v5912_v13  ;;  %3029 = vmatmul.msk.f32.gmra.mxu3 %vm132_vm10, %v5912_v13  ;;  %v2975_v17 = vsel %vm126_vm14, 1.0, %v5911_v39 }
  0xa0   :  { %460 = vmatmul.f32.gmra.mxu0 %v459_v33  ;;  %524 = vmatmul.f32.gmra.mxu2 %v523_v5  ;;  %v4051_v33 = vsub.f32 %v2982_v9, %v2982_v9  ;;  %v530_v5 = vsub.f32 %v4003_v23, %v529_v58  ;;  %v4088_v4 = vsub.f32 %v2975_v17, %v2975_v17 }
  0xa1   :  { %1222 = vmatpush.msra.mxu2 %v3543_v45  ;;  %1435 = vmatpush.msra.mxu3 %v3630_v21  ;;  %v474_v9 = vsub.f32 %v4042_v60, %v473_v22 }
  0xa2   :  { %v531_v24 = vand.u32 4294901760, %v530_v5  ;;  %v537_v21 = vand.u32 4294901760, %v4051_v33  ;;  %1557 = vmatpush.msra.mxu0 %v3568_v3  ;;  %1677 = vmatpush.msra.mxu1 %v3583_v14 }
  0xa3   :  { %1224 = vmatpush.msra.mxu2 %v3565_v0  ;;  %1441 = vmatpush.msra.mxu3 %v3640_v15  ;;  %v2983_v15 = vsel %vm134_vm15, 1.0, %v5911_v39  ;;  %v475_v43 = vand.u32 4294901760, %v474_v9 }
  0xa4   :  { %v4095_v50 = vsub.f32 %v2983_v15, %v2983_v15  ;;  %v538_v5 = vsub.f32 %v4051_v33, %v537_v21  ;;  %1560 = vmatpush.msra.mxu0 %v3581_v10  ;;  %1679 = vmatpush.msra.mxu1 %v3601_v44 }
  0xa5   :  { %1226 = vmatpush.msra.mxu2 %v3583_v14  ;;  %1447 = vmatpush.msra.mxu3 %v3646_v47  ;;  %v481_v47 = vand.u32 4294901760, %v4088_v4 }
  0xa6   :  { %v539_v3 = vand.u32 4294901760, %v538_v5  ;;  %1563 = vmatpush.msra.mxu0 %v3599_v38 }
  0xa7   :  { %3022 = vmatmul.msk.f32.gmra.mxu1 %vm125_vm12, %v5912_v13  ;;  %3030 = vmatmul.msk.f32.gmra.mxu3 %vm133_vm13, %v5912_v13  ;;  %v482_v10 = vsub.f32 %v4088_v4, %v481_v47 }
  0xa8   :  { %468 = vmatmul.f32.gmra.mxu0 %v467_v11  ;;  %532 = vmatmul.f32.gmra.mxu2 %v531_v24  ;;  %v5923_v24 = vand.u32 4294901760, %v3783_v8 }
  0xa9   :  { %1453 = vmatpush.msra.mxu3 %v3652_v51  ;;  %1228 = vmatpush.msra.mxu2 %v3601_v44  ;;  %v545_v51 = vand.u32 4294901760, %v4095_v50  ;;  %v483_v17 = vand.u32 4294901760, %v482_v10 }
  0xaa   :  { %1566 = vmatpush.msra.mxu0 %v3615_v61  ;;  %v5925_v61 = vand.u32 4294901760, %v3779_v56 }
  0xab   :  { %v546_v11 = vsub.f32 %v4095_v50, %v545_v51 }
  0xad   :  { %v547_v38 = vand.u32 4294901760, %v546_v11 }
  0xaf   :  { %3023 = vmatmul.msk.f32.gmra.mxu1 %vm126_vm14, %v5912_v13  ;;  %3031 = vmatmul.msk.f32.gmra.mxu3 %vm134_vm15, %v5912_v13 }
  0xb0   :  { %476 = vmatmul.f32.gmra.mxu0 %v475_v43  ;;  %540 = vmatmul.f32.gmra.mxu2 %v539_v3  ;;  %v5951_v3 = vand.u32 4294901760, %v3902_v46 }
  0xb7   :  { %877 = vmatmul.f32.vlgmr.msrb.gmra.mxu3 %v5923_v24  ;;  %3048 = vmatmul.msk.f32.vlgmr.msrb.gmra.mxu1 %vm119_vm2, %v5912_v13 }
  0xb8   :  { %484 = vmatmul.f32.gmra.mxu0 %v483_v17  ;;  %1907 = vmatpush.msrb.mxu3 %v3316_v20  ;;  %v5926_v20 = vld [vmem:[#allocation5_spill] sm:$0xff] }
  0xb9   :  { %548 = vmatmul.f32.gmra.mxu2 %v547_v38  ;;  %v5952_v38 = vand.u32 4294901760, %v3955_v29 }
  0xba   :  { %1909 = vmatpush.msrb.mxu3 %v3333_v26  ;;  %v5927_v26 = vld [vmem:[#allocation6_spill] sm:$0xff] }
  0xbc   :  { %1911 = vmatpush.msrb.mxu3 %v3346_v30  ;;  %v5928_v30 = vld [vmem:[#allocation7_spill] sm:$0xff] }
  0xbe   :  { %1913 = vmatpush.msrb.mxu3 %v3360_v35  ;;  %v5929_v35 = vand.u32 4294901760, %v3893_v28 }
  0xbf   :  { %883 = vmatmul.f32.gmra.mxu3 %v5925_v61  ;;  %3049 = vmatmul.msk.f32.gmra.mxu1 %vm120_vm0, %v5912_v13 }
  0xc0   :  { %3032 = vmatmul.msk.f32.vlgmr.msrb.gmra.mxu0 %vm119_vm2, %v5912_v13  ;;  %1915 = vmatpush.msrb.mxu3 %v3382_v42  ;;  %v5930_v42 = vld [vmem:[#allocation8_spill] sm:$0xff] }
  0xc1   :  { %763 = vmatmul.f32.vlgmr.msrb.gmra.mxu2 %v3783_v8  ;;  %v5934_v8 = vand.u32 4294901760, %v3897_v32 }
  0xc2   :  { %1780 = vmatpush.msrb.mxu2 %v5926_v20  ;;  %1917 = vmatpush.msrb.mxu3 %v3402_v49  ;;  %v5931_v49 = vld [vmem:[#allocation9_spill] sm:$0xff] }
  0xc4   :  { %1784 = vmatpush.msrb.mxu2 %v5927_v26  ;;  %1919 = vmatpush.msrb.mxu3 %v3420_v55  ;;  %v5932_v55 = vld [vmem:[#allocation10_spill] sm:$0xff] }
  0xc6   :  { %1788 = vmatpush.msrb.mxu2 %v5928_v30  ;;  %1921 = vmatpush.msrb.mxu3 %v3440_v62  ;;  %v5933_v62 = vld [vmem:[#allocation11_spill] sm:$0xff] }
  0xc7   :  { %889 = vmatmul.f32.gmra.mxu3 %v5929_v35  ;;  %3050 = vmatmul.msk.f32.gmra.mxu1 %vm121_vm7, %v5912_v13 }
  0xc8   :  { %3033 = vmatmul.msk.f32.gmra.mxu0 %vm120_vm0, %v5912_v13  ;;  %1792 = vmatpush.msrb.mxu2 %v5930_v42  ;;  %vm231_vm0 = vcmp.eq.s32.totalorder %v4348_v36, %v3727_v6 }
  0xc9   :  { %768 = vmatmul.f32.gmra.mxu2 %v3779_v56  ;;  %1923 = vmatpush.msrb.mxu3 %v3454_v2  ;;  %v5935_v56 = vld [vmem:[#allocation12_spill] sm:$0xff]  ;;  %v5936_v2 = vld [vmem:[#allocation14_spill] sm:$0xff] }
  0xca   :  { %1796 = vmatpush.msrb.mxu2 %v5931_v49 }
  0xcb   :  { %1925 = vmatpush.msrb.mxu3 %v3483_v12  ;;  %v5937_v12 = vld [vmem:[#allocation15_spill] sm:$0xff] }
  0xcc   :  { %1800 = vmatpush.msrb.mxu2 %v5932_v55 }
  0xcd   :  { %1927 = vmatpush.msrb.mxu3 %v3502_v18  ;;  %v5938_v18 = vld [vmem:[#allocation18_spill] sm:$0xff] }
  0xce   :  { %1804 = vmatpush.msrb.mxu2 %v5933_v62 }
  0xcf   :  { %895 = vmatmul.f32.gmra.mxu3 %v5934_v8  ;;  %3051 = vmatmul.msk.f32.gmra.mxu1 %vm122_vm5, %v5912_v13 }
  0xd0   :  { %3034 = vmatmul.msk.f32.gmra.mxu0 %vm121_vm7, %v5912_v13  ;;  %1808 = vmatpush.msrb.mxu2 %v5935_v56 }
  0xd1   :  { %773 = vmatmul.f32.gmra.mxu2 %v3893_v28  ;;  %1929 = vmatpush.msrb.mxu3 %v3519_v27  ;;  %v5940_v28 = vld [vmem:[#allocation20_spill] sm:$0xff]  ;;  %v5941_v27 = vld [vmem:[#allocation22_spill] sm:$0xff] }
  0xd2   :  { %1812 = vmatpush.msrb.mxu2 %v5936_v2  ;;  %v4382_v2 = vpop.permute.xlu2 %187 }
  0xd3   :  { %1931 = vmatpush.msrb.mxu3 %v3543_v45  ;;  %v5942_v45 = vld [vmem:[#allocation23_spill] sm:$0xff]  ;;  %5954 = vst [vmem:[#allocation16_spill] sm:$0xff] %v4382_v2 }
  0xd4   :  { %1816 = vmatpush.msrb.mxu2 %v5937_v12 }
  0xd5   :  { %1933 = vmatpush.msrb.mxu3 %v3565_v0 }
  0xd6   :  { %1820 = vmatpush.msrb.mxu2 %v5938_v18 }
  0xd7   :  { %901 = vmatmul.f32.gmra.mxu3 %v5939_v57  ;;  %3052 = vmatmul.msk.f32.gmra.mxu1 %vm123_vm9, %v5912_v13 }
  0xd8   :  { %3035 = vmatmul.msk.f32.gmra.mxu0 %vm122_vm5, %v5912_v13  ;;  %1824 = vmatpush.msrb.mxu2 %v5940_v28 }
  0xd9   :  { %778 = vmatmul.f32.gmra.mxu2 %v3897_v32  ;;  %1935 = vmatpush.msrb.mxu3 %v3583_v14 }
  0xda   :  { %1828 = vmatpush.msrb.mxu2 %v5941_v27 }
  0xdb   :  { %1937 = vmatpush.msrb.mxu3 %v3601_v44 }
  0xdc   :  { %1832 = vmatpush.msrb.mxu2 %v5942_v45 }
  0xde   :  { %1836 = vmatpush.msrb.mxu2 %v3612_v53 }
  0xdf   :  { %907 = vmatmul.f32.gmra.mxu3 %v465_v19  ;;  %3053 = vmatmul.msk.f32.gmra.mxu1 %vm124_vm11, %v5912_v13 }
  0xe0   :  { %3036 = vmatmul.msk.f32.gmra.mxu0 %vm123_vm9, %v5912_v13  ;;  %1840 = vmatpush.msrb.mxu2 %v3635_v31 }
  0xe1   :  { %783 = vmatmul.f32.gmra.mxu2 %v3948_v41  ;;  %v5943_v41 = vld [vmem:[#allocation26_spill] sm:$0xff] }
  0xe2   :  { %v5944_v0 = vand.u32 4294901760, %v5943_v41 }
  0xe7   :  { %913 = vmatmul.f32.gmra.mxu3 %v473_v22  ;;  %3054 = vmatmul.msk.f32.gmra.mxu1 %vm125_vm12, %v5912_v13 }
  0xe8   :  { %3037 = vmatmul.msk.f32.gmra.mxu0 %vm124_vm11, %v5912_v13 }
  0xe9   :  { %788 = vmatmul.f32.gmra.mxu2 %v3994_v34 }
  0xef   :  { %919 = vmatmul.f32.gmra.mxu3 %v481_v47  ;;  %3055 = vmatmul.msk.f32.gmra.mxu1 %vm126_vm14, %v5912_v13 }
  0xf0   :  { %3038 = vmatmul.msk.f32.gmra.mxu0 %vm125_vm12, %v5912_v13 }
  0xf1   :  { %793 = vmatmul.f32.gmra.mxu2 %v4042_v60  ;;  %v5949_v60 = vand.u32 4294901760, %v3849_v1 }
  0xf4   :  { %v4240_v31 = vpop.f32.mrf.mxu1 }
  0xf7   :  { %925 = vmatmul.f32.gmra.mxu3 %v5944_v0  ;;  %3056 = vmatmul.msk.f32.gmra.mxu1 %vm127_vm1, %v5912_v13 }
  0xf8   :  { %3039 = vmatmul.msk.f32.gmra.mxu0 %vm126_vm14, %v5912_v13 }
  0xf9   :  { %798 = vmatmul.f32.gmra.mxu2 %v4088_v4 }
  0xfa   :  { %v682_v32 = vpop.f32.mrf.mxu3 }
  0xfc   :  { %v4253_v44 = vpop.f32.mrf.mxu1 }
  0xfd   :  { %v4255_v53 = vpop.f32.mrf.mxu0 }
  0xff   :  { %931 = vmatmul.f32.gmra.mxu3 %v5947_v48  ;;  %3057 = vmatmul.msk.f32.gmra.mxu1 %vm128_vm3, %v5912_v13 }
 0x100   :  { %3040 = vmatmul.msk.f32.gmra.mxu0 %vm127_vm1, %v5912_v13  ;;  %vm232_vm1 = vcmp.eq.s32.totalorder %v4382_v2, %v3727_v6 }
 0x101   :  { %803 = vmatmul.f32.gmra.mxu2 %v5943_v41 }
 0x102   :  { %v686_v16 = vpop.f32.mrf.mxu3 }
 0x103   :  { %v493_v25 = vpop.f32.mrf.mxu2 }
 0x104   :  { %v4268_v34 = vpop.f32.mrf.mxu1  ;;  %v4270_v19 = vadd.f32 %v682_v32, %v493_v25  ;;  %v2985_v32 = vsel %vm232_vm1, 1.0, %v5911_v39  ;;  %v50_v25 = vld [vmem:[%s5783_s4 + $0x68] sm:$0xff] }
 0x105   :  { %v4272_v54 = vpop.f32.mrf.mxu0  ;;  %v1238_v48 = vsub.f32 %v2985_v32, %v2985_v32  ;;  %v4432_v22 = vand.u32 4294901760, %v50_v25 }
 0x107   :  { %937 = vmatmul.f32.gmra.mxu3 %v5949_v60  ;;  %3058 = vmatmul.msk.f32.gmra.mxu1 %vm129_vm4, %v5912_v13 }
 0x108   :  { %3041 = vmatmul.msk.f32.gmra.mxu0 %vm128_vm3, %v5912_v13 }
 0x109   :  { %808 = vmatmul.f32.gmra.mxu2 %v5946_v59  ;;  %v4415_v59 = vpop.permute.xlu0 %190 }
 0x10a   :  { %v690_v4 = vpop.f32.mrf.mxu3  ;;  %5955 = vst [vmem:[#allocation17_spill] sm:$0xff] %v4415_v59  ;;  %vm233_vm2 = vcmp.eq.s32.totalorder %v4415_v59, %v3727_v6 }
 0x10b   :  { %v501_v9 = vpop.f32.mrf.mxu2 }
 0x10c   :  { %v4285_v5 = vpop.f32.mrf.mxu1  ;;  %v4287_v43 = vadd.f32 %v686_v16, %v501_v9 }
 0x10d   :  { %v4289_v47 = vpop.f32.mrf.mxu0 }
 0x10f   :  { %943 = vmatmul.f32.gmra.mxu3 %v5951_v3  ;;  %3059 = vmatmul.msk.f32.gmra.mxu1 %vm130_vm6, %v5912_v13 }
 0x110   :  { %3042 = vmatmul.msk.f32.gmra.mxu0 %vm129_vm4, %v5912_v13 }
 0x111   :  { %813 = vmatmul.f32.gmra.mxu2 %v3849_v1 }
 0x112   :  { %v694_v10 = vpop.f32.mrf.mxu3 }
 0x113   :  { %v509_v11 = vpop.f32.mrf.mxu2 }
 0x114   :  { %v4302_v17 = vpop.f32.mrf.mxu1  ;;  %v4304_v24 = vadd.f32 %v690_v4, %v509_v11 }
 0x115   :  { %v4306_v15 = vpop.f32.mrf.mxu0 }
 0x117   :  { %949 = vmatmul.f32.gmra.mxu3 %v5952_v38  ;;  %3060 = vmatmul.msk.f32.gmra.mxu1 %vm131_vm8, %v5912_v13  ;;  %v2986_v38 = vsel %vm233_vm2, 1.0, %v5911_v39 }
 0x118   :  { %3043 = vmatmul.msk.f32.gmra.mxu0 %vm130_vm6, %v5912_v13 }
 0x119   :  { %818 = vmatmul.f32.gmra.mxu2 %v3902_v46 }
 0x11a   :  { %v698_v1 = vpop.f32.mrf.mxu3 }
 0x11b   :  { %v517_v61 = vpop.f32.mrf.mxu2 }
 0x11c   :  { %v4319_v20 = vpop.f32.mrf.mxu1  ;;  %v4321_v26 = vadd.f32 %v694_v10, %v517_v61  ;;  %v1239_v10 = vand.u32 4294901760, %v1238_v48 }
 0x11d   :  { %v4323_v30 = vpop.f32.mrf.mxu0 }
 0x11f   :  { %955 = vmatmul.f32.gmra.mxu3 %v529_v58  ;;  %3061 = vmatmul.msk.f32.gmra.mxu1 %vm132_vm10, %v5912_v13  ;;  %v52_v58 = vld [vmem:[%s5783_s4 + $0x78] sm:$0xff] }
 0x120   :  { %3044 = vmatmul.msk.f32.gmra.mxu0 %vm131_vm8, %v5912_v13 }
 0x121   :  { %823 = vmatmul.f32.gmra.mxu2 %v3955_v29 }
 0x122   :  { %v702_v7 = vpop.f32.mrf.mxu3 }
 0x123   :  { %v525_v46 = vpop.f32.mrf.mxu2 }
 0x124   :  { %v4336_v35 = vpop.f32.mrf.mxu1  ;;  %v4338_v42 = vadd.f32 %v698_v1, %v525_v46  ;;  %v1246_v46 = vsub.f32 %v2986_v38, %v2986_v38 }
 0x125   :  { %v4340_v49 = vpop.f32.mrf.mxu0 }
 0x126   :  { %v1247_v32 = vand.u32 4294901760, %v1246_v46 }
 0x127   :  { %961 = vmatmul.f32.gmra.mxu3 %v537_v21  ;;  %3062 = vmatmul.msk.f32.gmra.mxu1 %vm133_vm13, %v5912_v13  ;;  %v4360_v21 = vand.u32 4294901760, %v52_v58 }
 0x128   :  { %3045 = vmatmul.msk.f32.gmra.mxu0 %vm132_vm10, %v5912_v13 }
 0x129   :  { %828 = vmatmul.f32.gmra.mxu2 %v4003_v23  ;;  %2004 = vmatpush.msrb.mxu0 %v4360_v21  ;;  %v4370_v52 = vsub.f32 %v52_v58, %v4360_v21  ;;  %v2984_v23 = vsel %vm231_vm0, 1.0, %v5911_v39 }
 0x12a   :  { %v706_v29 = vpop.f32.mrf.mxu3  ;;  %v1230_v12 = vsub.f32 %v2984_v23, %v2984_v23  ;;  %v49_v23 = vld [vmem:[%s5783_s4 + $0x60] sm:$0xff] }
 0x12b   :  { %v533_v55 = vpop.f32.mrf.mxu2  ;;  %v5831_v18 = vand.u32 4294901760, %v4370_v52 }
 0x12c   :  { %v4362_v62 = vpop.f32.mrf.mxu1  ;;  %v4364_v8 = vadd.f32 %v702_v7, %v533_v55  ;;  %v4452_v7 = vpop.permute.xlu1 %193  ;;  %v1240_v55 = vsub.f32 %v1238_v48, %v1239_v10 }
 0x12d   :  { %v4366_v56 = vpop.f32.mrf.mxu0  ;;  %v2167_v28 = vsub.f32 %v4370_v52, %v5831_v18  ;;  %5957 = vst [vmem:[#allocation21_spill] sm:$0xff] %v4452_v7  ;;  %vm234_vm3 = vcmp.eq.s32.totalorder %v4452_v7, %v3727_v6 }
 0x12f   :  { %967 = vmatmul.f32.gmra.mxu3 %v545_v51  ;;  %3063 = vmatmul.msk.f32.gmra.mxu1 %vm134_vm15, %v5912_v13  ;;  %v51_v51 = vld [vmem:[%s5783_s4 + $0x70] sm:$0xff]  ;;  %v2168_v14 = vand.u32 4294901760, %v2167_v28 }
 0x130   :  { %3046 = vmatmul.msk.f32.gmra.mxu0 %vm133_vm13, %v5912_v13  ;;  %v4398_v27 = vand.u32 4294901760, %v51_v51 }
 0x131   :  { %833 = vmatmul.f32.gmra.mxu2 %v4051_v33  ;;  %v1231_v33 = vand.u32 4294901760, %v1230_v12  ;;  %2169 = vmatpush.msrb.mxu1 %v2168_v14 }
 0x132   :  { %v710_v57 = vpop.f32.mrf.mxu3  ;;  %2006 = vmatpush.msrb.mxu0 %v4398_v27  ;;  %v4423_v37 = vsub.f32 %v51_v51, %v4398_v27  ;;  %v4466_v51 = vand.u32 4294901760, %v49_v23 }
 0x133   :  { %v541_v63 = vpop.f32.mrf.mxu2  ;;  %v1232_v60 = vsub.f32 %v1230_v12, %v1231_v33 }
 0x134   :  { %v4400_v45 = vpop.f32.mrf.mxu1  ;;  %v4402_v41 = vadd.f32 %v706_v29, %v541_v63  ;;  %v5829_v40 = vand.u32 4294901760, %v4423_v37  ;;  %2008 = vmatpush.msrb.mxu0 %v4432_v22  ;;  %v4455_v29 = vsub.f32 %v50_v25, %v4432_v22 }
 0x135   :  { %v4404_v0 = vpop.f32.mrf.mxu0  ;;  %v1233_v1 = vand.u32 4294901760, %v1232_v60 }
 0x136   :  { %v2173_v11 = vsub.f32 %v4423_v37, %v5829_v40  ;;  %2010 = vmatpush.msrb.mxu0 %v4466_v51  ;;  %v46_v40 = vld [vmem:[%s5783_s4 + $0x48] sm:$0xff] }
 0x137   :  { %3064 = vmatmul.msk.f32.vlgmr.msra.gmra.mxu3 %vm231_vm0, %v5912_v13  ;;  %1683 = vmatmul.f32.vlgmr.msra.gmra.mxu1 %v1231_v33 }
 0x138   :  { %3047 = vmatmul.msk.f32.gmra.mxu0 %vm134_vm15, %v5912_v13  ;;  %2455 = vmatpush.msra.mxu3 %v4360_v21  ;;  %v2174_v61 = vand.u32 4294901760, %v2173_v11 }
 0x139   :  { %838 = vmatmul.f32.gmra.mxu2 %v4095_v50 }
 0x13a   :  { %v878_v16 = vpop.f32.mrf.mxu3  ;;  %2457 = vmatpush.msra.mxu3 %v4398_v27  ;;  %2175 = vmatpush.msrb.mxu1 %v2174_v61  ;;  %v1248_v61 = vsub.f32 %v1246_v46, %v1247_v32 }
 0x13c   :  { %v549_v50 = vpop.f32.mrf.mxu2  ;;  %v4435_v4 = vpop.f32.mrf.mxu1  ;;  %2459 = vmatpush.msra.mxu3 %v4432_v22 }
 0x13d   :  { %v4437_v9 = vadd.f32 %v710_v57, %v549_v50  ;;  %v1037_v3 = vpop.f32.mrf.mxu0  ;;  %v5828_v57 = vand.u32 4294901760, %v4455_v29  ;;  %v1241_v50 = vand.u32 4294901760, %v1240_v55  ;;  %v655_v55 = vadd.f32 %v4253_v44, %v4272_v54  ;;  %v4515_v54 = vpop.permute.xlu0 %199 }
 0x13e   :  { %2461 = vmatpush.msra.mxu3 %v4466_v51  ;;  %5960 = vst [vmem:[#allocation6_spill] sm:$0xff] %v4515_v54  ;;  %vm236_vm5 = vcmp.eq.s32.totalorder %v4515_v54, %v3727_v6 }
 0x13f   :  { %5956 = vst [vmem:[#allocation19_spill] sm:$0xff] %v4437_v9  ;;  %3065 = vmatmul.msk.f32.gmra.mxu3 %vm232_vm1, %v5912_v13  ;;  %1689 = vmatmul.f32.gmra.mxu1 %v1239_v10  ;;  %v2179_v25 = vsub.f32 %v4455_v29, %v5828_v57 }
 0x140   :  { %1569 = vmatmul.f32.vlgmr.msra.gmra.mxu0 %v1230_v12  ;;  %v651_v12 = vadd.f32 %v4240_v31, %v4255_v53  ;;  %v2987_v31 = vsel %vm234_vm3, 1.0, %v5911_v39  ;;  %v4481_v53 = vpop.permute.xlu2 %196 }
 0x141   :  { %1234 = vmatmul.f32.vlgmr.msra.gmra.mxu2 %v1233_v1  ;;  %5958 = vst [vmem:[#allocation25_spill] sm:$0xff] %v4481_v53  ;;  %v2180_v10 = vand.u32 4294901760, %v2179_v25  ;;  %v1254_v11 = vsub.f32 %v2987_v31, %v2987_v31  ;;  %v4488_v1 = vsub.f32 %v49_v23, %v4466_v51  ;;  %vm235_vm4 = vcmp.eq.s32.totalorder %v4481_v53, %v3727_v6 }
 0x142   :  { %v884_v58 = vpop.f32.mrf.mxu3  ;;  %2327 = vmatpush.msra.mxu2 %v4370_v52  ;;  %v2988_v44 = vsel %vm235_vm4, 1.0, %v5911_v39 }
 0x143   :  { %2181 = vmatpush.msrb.mxu1 %v2180_v10  ;;  %v1255_v31 = vand.u32 4294901760, %v1254_v11 }
 0x144   :  { %v764_v28 = vpop.f32.mrf.mxu2  ;;  %v4468_v63 = vpop.f32.mrf.mxu1  ;;  %2330 = vmatpush.msra.mxu2 %v4423_v37 }
 0x145   :  { %v765_v33 = vadd.f32 %v764_v28, %v651_v12  ;;  %v1041_v14 = vpop.f32.mrf.mxu0  ;;  %v48_v12 = vld [vmem:[%s5783_s4 + $0x58] sm:$0xff] }
 0x146   :  { %2333 = vmatpush.msra.mxu2 %v4455_v29 }
 0x147   :  { %v879_v60 = vadd.f32 %v878_v16, %v765_v33  ;;  %3066 = vmatmul.msk.f32.gmra.mxu3 %vm233_vm2, %v5912_v13  ;;  %1695 = vmatmul.f32.gmra.mxu1 %v1247_v32 }
 0x148   :  { %1574 = vmatmul.f32.gmra.mxu0 %v1238_v48  ;;  %v5826_v48 = vand.u32 4294901760, %v4488_v1  ;;  %2336 = vmatpush.msra.mxu2 %v4488_v1 }
 0x149   :  { %v1038_v38 = vadd.f32 %v1037_v3, %v879_v60  ;;  %1242 = vmatmul.f32.gmra.mxu2 %v1241_v50  ;;  %v4498_v3 = vand.u32 4294901760, %v48_v12  ;;  %v1249_v50 = vand.u32 4294901760, %v1248_v61  ;;  %v659_v61 = vadd.f32 %v4268_v34, %v4289_v47  ;;  %v4549_v47 = vpop.permute.xlu1 %202 }
 0x14a   :  { %v890_v16 = vpop.f32.mrf.mxu3  ;;  %v2185_v60 = vsub.f32 %v4488_v1, %v5826_v48  ;;  %v47_v48 = vld [vmem:[%s5783_s4 + $0x50] sm:$0xff]  ;;  %v2989_v34 = vsel %vm236_vm5, 1.0, %v5911_v39  ;;  %5962 = vst [vmem:[#allocation8_spill] sm:$0xff] %v4549_v47  ;;  %vm237_vm6 = vcmp.eq.s32.totalorder %v4549_v47, %v3727_v6 }
 0x14b   :  { %v4502_v23 = vadd.f32 %v4400_v45, %v1038_v38  ;;  %2012 = vmatpush.msrb.mxu0 %v4498_v3  ;;  %2463 = vmatpush.msra.mxu3 %v4498_v3  ;;  %v1262_v38 = vsub.f32 %v2988_v44, %v2988_v44  ;;  %v39_v47 = vld [vmem:[%s5783_s4 + $0x10] sm:$0xff] }
 0x14c   :  { %v769_v28 = vpop.f32.mrf.mxu2  ;;  %v4504_v33 = vpop.f32.mrf.mxu1  ;;  %v2186_v10 = vand.u32 4294901760, %v2185_v60 }
 0x14d   :  { %5959 = vst [vmem:[#allocation5_spill] sm:$0xff] %v4502_v23  ;;  %v770_v32 = vadd.f32 %v769_v28, %v655_v55  ;;  %v1045_v25 = vpop.f32.mrf.mxu0  ;;  %v4522_v28 = vsub.f32 %v48_v12, %v4498_v3  ;;  %v43_v23 = vld [vmem:[%s5783_s4 + $0x30] sm:$0xff] }
 0x14e   :  { %2187 = vmatpush.msrb.mxu1 %v2186_v10 }
 0x14f   :  { %v885_v45 = vadd.f32 %v884_v58, %v770_v32  ;;  %3067 = vmatmul.msk.f32.gmra.mxu3 %vm234_vm3, %v5912_v13  ;;  %1701 = vmatmul.f32.gmra.mxu1 %v1255_v31  ;;  %v1256_v32 = vsub.f32 %v1254_v11, %v1255_v31 }
 0x150   :  { %1579 = vmatmul.f32.gmra.mxu0 %v1246_v46  ;;  %v5827_v46 = vand.u32 4294901760, %v4522_v28  ;;  %2339 = vmatpush.msra.mxu2 %v4522_v28 }
 0x151   :  { %v1042_v55 = vadd.f32 %v1041_v14, %v885_v45  ;;  %1250 = vmatmul.f32.gmra.mxu2 %v1249_v50  ;;  %v4532_v14 = vand.u32 4294901760, %v47_v48  ;;  %v1263_v50 = vand.u32 4294901760, %v1262_v38 }
 0x152   :  { %v896_v58 = vpop.f32.mrf.mxu3  ;;  %v2191_v10 = vsub.f32 %v4522_v28, %v5827_v46 }
 0x153   :  { %v4536_v12 = vadd.f32 %v4435_v4, %v1042_v55  ;;  %2014 = vmatpush.msrb.mxu0 %v4532_v14  ;;  %2465 = vmatpush.msra.mxu3 %v4532_v14  ;;  %v1257_v55 = vand.u32 4294901760, %v1256_v32  ;;  %v4556_v57 = vsub.f32 %v47_v48, %v4532_v14  ;;  %v663_v32 = vadd.f32 %v4285_v5, %v4306_v15  ;;  %v4583_v15 = vpop.permute.xlu2 %205 }
 0x154   :  { %v774_v60 = vpop.f32.mrf.mxu2  ;;  %v4538_v44 = vpop.f32.mrf.mxu1  ;;  %v2990_v5 = vsel %vm237_vm6, 1.0, %v5911_v39  ;;  %5964 = vst [vmem:[#allocation10_spill] sm:$0xff] %v4583_v15  ;;  %vm238_vm7 = vcmp.eq.s32.totalorder %v4583_v15, %v3727_v6 }
 0x155   :  { %5961 = vst [vmem:[#allocation7_spill] sm:$0xff] %v4536_v12  ;;  %v775_v31 = vadd.f32 %v774_v60, %v659_v61  ;;  %v1049_v45 = vpop.f32.mrf.mxu0  ;;  %v2192_v61 = vand.u32 4294901760, %v2191_v10  ;;  %v1270_v60 = vsub.f32 %v2989_v34, %v2989_v34  ;;  %2342 = vmatpush.msra.mxu2 %v4556_v57  ;;  %v44_v12 = vld [vmem:[%s5783_s4 + $0x38] sm:$0xff] }
 0x157   :  { %v891_v4 = vadd.f32 %v890_v16, %v775_v31  ;;  %3068 = vmatmul.msk.f32.gmra.mxu3 %vm235_vm4, %v5912_v13  ;;  %1707 = vmatmul.f32.gmra.mxu1 %v1263_v50  ;;  %v1264_v31 = vsub.f32 %v1262_v38, %v1263_v50 }
 0x158   :  { %1584 = vmatmul.f32.gmra.mxu0 %v1254_v11  ;;  %2193 = vmatpush.msrb.mxu1 %v2192_v61  ;;  %v5830_v11 = vand.u32 4294901760, %v4556_v57 }
 0x159   :  { %v1046_v46 = vadd.f32 %v1045_v25, %v891_v4  ;;  %1258 = vmatmul.f32.gmra.mxu2 %v1257_v55  ;;  %v4566_v25 = vand.u32 4294901760, %v46_v40  ;;  %v1271_v55 = vand.u32 4294901760, %v1270_v60 }
 0x15a   :  { %v902_v16 = vpop.f32.mrf.mxu3  ;;  %v2197_v61 = vsub.f32 %v4556_v57, %v5830_v11 }
 0x15b   :  { %v4570_v48 = vadd.f32 %v4468_v63, %v1046_v46  ;;  %2016 = vmatpush.msrb.mxu0 %v4566_v25  ;;  %2467 = vmatpush.msra.mxu3 %v4566_v25  ;;  %v1265_v46 = vand.u32 4294901760, %v1264_v31  ;;  %v4590_v18 = vsub.f32 %v46_v40, %v4566_v25  ;;  %v667_v31 = vadd.f32 %v4302_v17, %v4323_v30  ;;  %v4617_v30 = vpop.permute.xlu0 %208 }
 0x15c   :  { %v779_v10 = vpop.f32.mrf.mxu2  ;;  %v4572_v34 = vpop.f32.mrf.mxu1  ;;  %v2991_v17 = vsel %vm238_vm7, 1.0, %v5911_v39  ;;  %5966 = vst [vmem:[#allocation12_spill] sm:$0xff] %v4617_v30  ;;  %vm239_vm8 = vcmp.eq.s32.totalorder %v4617_v30, %v3727_v6  ;;  %v42_v30 = vld [vmem:[%s5783_s4 + $0x28] sm:$0xff] }
 0x15d   :  { %5963 = vst [vmem:[#allocation9_spill] sm:$0xff] %v4570_v48  ;;  %v780_v50 = vadd.f32 %v779_v10, %v663_v32  ;;  %v1053_v4 = vpop.f32.mrf.mxu0  ;;  %v2198_v32 = vand.u32 4294901760, %v2197_v61  ;;  %v1278_v10 = vsub.f32 %v2990_v5, %v2990_v5  ;;  %v45_v48 = vld [vmem:[%s5783_s4 + $0x40] sm:$0xff]  ;;  %2345 = vmatpush.msra.mxu2 %v4590_v18 }
 0x15f   :  { %v897_v63 = vadd.f32 %v896_v58, %v780_v50  ;;  %3069 = vmatmul.msk.f32.gmra.mxu3 %vm236_vm5, %v5912_v13  ;;  %1713 = vmatmul.f32.gmra.mxu1 %v1271_v55  ;;  %v1272_v50 = vsub.f32 %v1270_v60, %v1271_v55 }
 0x160   :  { %1589 = vmatmul.f32.gmra.mxu0 %v1262_v38  ;;  %2199 = vmatpush.msrb.mxu1 %v2198_v32  ;;  %v5832_v38 = vand.u32 4294901760, %v4590_v18 }
 0x161   :  { %v1050_v11 = vadd.f32 %v1049_v45, %v897_v63  ;;  %1266 = vmatmul.f32.gmra.mxu2 %v1265_v46  ;;  %v4600_v45 = vand.u32 4294901760, %v45_v48  ;;  %v1279_v46 = vand.u32 4294901760, %v1278_v10 }
 0x162   :  { %v908_v58 = vpop.f32.mrf.mxu3  ;;  %v2203_v32 = vsub.f32 %v4590_v18, %v5832_v38 }
 0x163   :  { %v4604_v40 = vadd.f32 %v4504_v33, %v1050_v11  ;;  %2018 = vmatpush.msrb.mxu0 %v4600_v45  ;;  %2469 = vmatpush.msra.mxu3 %v4600_v45  ;;  %v1273_v11 = vand.u32 4294901760, %v1272_v50  ;;  %v671_v50 = vadd.f32 %v4319_v20, %v4340_v49  ;;  %v2992_v20 = vsel %vm239_vm8, 1.0, %v5911_v39  ;;  %v4651_v49 = vpop.permute.xlu1 %211 }
 0x164   :  { %v784_v61 = vpop.f32.mrf.mxu2  ;;  %v4606_v5 = vpop.f32.mrf.mxu1  ;;  %5968 = vst [vmem:[#allocation15_spill] sm:$0xff] %v4651_v49  ;;  %vm240_vm9 = vcmp.eq.s32.totalorder %v4651_v49, %v3727_v6 }
 0x165   :  { %5965 = vst [vmem:[#allocation11_spill] sm:$0xff] %v4604_v40  ;;  %v785_v55 = vadd.f32 %v784_v61, %v667_v31  ;;  %v1057_v63 = vpop.f32.mrf.mxu0  ;;  %v2204_v31 = vand.u32 4294901760, %v2203_v32  ;;  %v1286_v61 = vsub.f32 %v2991_v17, %v2991_v17  ;;  %v4624_v40 = vsub.f32 %v45_v48, %v4600_v45 }
 0x167   :  { %v903_v33 = vadd.f32 %v902_v16, %v785_v55  ;;  %3070 = vmatmul.msk.f32.gmra.mxu3 %vm237_vm6, %v5912_v13  ;;  %1719 = vmatmul.f32.gmra.mxu1 %v1279_v46  ;;  %v1280_v55 = vsub.f32 %v1278_v10, %v1279_v46 }
 0x168   :  { %1594 = vmatmul.f32.gmra.mxu0 %v1270_v60  ;;  %2205 = vmatpush.msrb.mxu1 %v2204_v31  ;;  %v5833_v60 = vand.u32 4294901760, %v4624_v40 }
 0x169   :  { %v1054_v38 = vadd.f32 %v1053_v4, %v903_v33  ;;  %1274 = vmatmul.f32.gmra.mxu2 %v1273_v11  ;;  %v4634_v4 = vand.u32 4294901760, %v44_v12  ;;  %v1287_v11 = vand.u32 4294901760, %v1286_v61 }
 0x16a   :  { %v914_v16 = vpop.f32.mrf.mxu3  ;;  %2348 = vmatpush.msra.mxu2 %v4624_v40  ;;  %v2209_v31 = vsub.f32 %v4624_v40, %v5833_v60 }
 0x16b   :  { %v4638_v48 = vadd.f32 %v4538_v44, %v1054_v38  ;;  %2020 = vmatpush.msrb.mxu0 %v4634_v4  ;;  %2471 = vmatpush.msra.mxu3 %v4634_v4  ;;  %v1281_v38 = vand.u32 4294901760, %v1280_v55  ;;  %v675_v55 = vadd.f32 %v4336_v35, %v4366_v56  ;;  %v2993_v35 = vsel %vm240_vm9, 1.0, %v5911_v39  ;;  %v4685_v56 = vpop.permute.xlu2 %214 }
 0x16c   :  { %v789_v32 = vpop.f32.mrf.mxu2  ;;  %v4640_v17 = vpop.f32.mrf.mxu1  ;;  %5970 = vst [vmem:[#allocation20_spill] sm:$0xff] %v4685_v56  ;;  %vm241_vm10 = vcmp.eq.s32.totalorder %v4685_v56, %v3727_v6 }
 0x16d   :  { %5967 = vst [vmem:[#allocation14_spill] sm:$0xff] %v4638_v48  ;;  %v790_v46 = vadd.f32 %v789_v32, %v671_v50  ;;  %v1061_v33 = vpop.f32.mrf.mxu0  ;;  %v2210_v50 = vand.u32 4294901760, %v2209_v31  ;;  %v1294_v32 = vsub.f32 %v2992_v20, %v2992_v20  ;;  %v4658_v48 = vsub.f32 %v44_v12, %v4634_v4 }
 0x16f   :  { %v909_v44 = vadd.f32 %v908_v58, %v790_v46  ;;  %3071 = vmatmul.msk.f32.gmra.mxu3 %vm238_vm7, %v5912_v13  ;;  %1725 = vmatmul.f32.gmra.mxu1 %v1287_v11  ;;  %v1288_v46 = vsub.f32 %v1286_v61, %v1287_v11 }
 0x170   :  { %1599 = vmatmul.f32.gmra.mxu0 %v1278_v10  ;;  %2211 = vmatpush.msrb.mxu1 %v2210_v50  ;;  %v5834_v10 = vand.u32 4294901760, %v4658_v48 }
 0x171   :  { %v1058_v60 = vadd.f32 %v1057_v63, %v909_v44  ;;  %1282 = vmatmul.f32.gmra.mxu2 %v1281_v38  ;;  %v4668_v63 = vand.u32 4294901760, %v43_v23  ;;  %v1295_v38 = vand.u32 4294901760, %v1294_v32 }
 0x172   :  { %v920_v58 = vpop.f32.mrf.mxu3  ;;  %2351 = vmatpush.msra.mxu2 %v4658_v48  ;;  %v2215_v50 = vsub.f32 %v4658_v48, %v5834_v10 }
 0x173   :  { %v4672_v12 = vadd.f32 %v4572_v34, %v1058_v60  ;;  %2022 = vmatpush.msrb.mxu0 %v4668_v63  ;;  %2473 = vmatpush.msra.mxu3 %v4668_v63  ;;  %v1289_v60 = vand.u32 4294901760, %v1288_v46  ;;  %v679_v46 = vadd.f32 %v4362_v62, %v4404_v0  ;;  %v2994_v62 = vsel %vm241_vm10, 1.0, %v5911_v39  ;;  %v4719_v0 = vpop.permute.xlu0 %217 }
 0x174   :  { %v794_v31 = vpop.f32.mrf.mxu2  ;;  %v4674_v20 = vpop.f32.mrf.mxu1  ;;  %5972 = vst [vmem:[#allocation23_spill] sm:$0xff] %v4719_v0  ;;  %vm242_vm11 = vcmp.eq.s32.totalorder %v4719_v0, %v3727_v6 }
 0x175   :  { %5969 = vst [vmem:[#allocation18_spill] sm:$0xff] %v4672_v12  ;;  %v795_v11 = vadd.f32 %v794_v31, %v675_v55  ;;  %v1065_v44 = vpop.f32.mrf.mxu0  ;;  %v2216_v55 = vand.u32 4294901760, %v2215_v50  ;;  %v1302_v31 = vsub.f32 %v2993_v35, %v2993_v35  ;;  %v4692_v12 = vsub.f32 %v43_v23, %v4668_v63 }
 0x177   :  { %v915_v34 = vadd.f32 %v914_v16, %v795_v11  ;;  %3072 = vmatmul.msk.f32.gmra.mxu3 %vm239_vm8, %v5912_v13  ;;  %1731 = vmatmul.f32.gmra.mxu1 %v1295_v38  ;;  %v1296_v11 = vsub.f32 %v1294_v32, %v1295_v38 }
 0x178   :  { %1604 = vmatmul.f32.gmra.mxu0 %v1286_v61  ;;  %2217 = vmatpush.msrb.mxu1 %v2216_v55  ;;  %v5837_v61 = vand.u32 4294901760, %v4692_v12 }
 0x179   :  { %v1062_v10 = vadd.f32 %v1061_v33, %v915_v34  ;;  %1290 = vmatmul.f32.gmra.mxu2 %v1289_v60  ;;  %v4702_v33 = vand.u32 4294901760, %v42_v30  ;;  %v1303_v60 = vand.u32 4294901760, %v1302_v31 }
 0x17a   :  { %v926_v16 = vpop.f32.mrf.mxu3  ;;  %2354 = vmatpush.msra.mxu2 %v4692_v12  ;;  %v2221_v55 = vsub.f32 %v4692_v12, %v5837_v61 }
 0x17b   :  { %v4706_v23 = vadd.f32 %v4606_v5, %v1062_v10  ;;  %2024 = vmatpush.msrb.mxu0 %v4702_v33  ;;  %2475 = vmatpush.msra.mxu3 %v4702_v33  ;;  %v1297_v10 = vand.u32 4294901760, %v1296_v11  ;;  %v41_v11 = vld [vmem:[%s5783_s4 + $0x20] sm:$0xff] }
 0x17c   :  { %v799_v50 = vpop.f32.mrf.mxu2  ;;  %v4708_v35 = vpop.f32.mrf.mxu1 }
 0x17d   :  { %5971 = vst [vmem:[#allocation22_spill] sm:$0xff] %v4706_v23  ;;  %v800_v38 = vadd.f32 %v799_v50, %v679_v46  ;;  %v1069_v34 = vpop.f32.mrf.mxu0  ;;  %v2222_v46 = vand.u32 4294901760, %v2221_v55  ;;  %v4725_v50 = vsub.f32 %v2994_v62, %v2994_v62  ;;  %v4728_v23 = vsub.f32 %v42_v30, %v4702_v33 }
 0x17e   :  { %v4738_v55 = vand.u32 4294901760, %v41_v11 }
 0x17f   :  { %v921_v5 = vadd.f32 %v920_v58, %v800_v38  ;;  %3073 = vmatmul.msk.f32.gmra.mxu3 %vm240_vm9, %v5912_v13  ;;  %1737 = vmatmul.f32.gmra.mxu1 %v1303_v60  ;;  %v1304_v38 = vsub.f32 %v1302_v31, %v1303_v60  ;;  %v2995_v60 = vsel %vm242_vm11, 1.0, %v5911_v39 }
 0x180   :  { %1609 = vmatmul.f32.gmra.mxu0 %v1294_v32  ;;  %2223 = vmatpush.msrb.mxu1 %v2222_v46  ;;  %v5840_v32 = vand.u32 4294901760, %v4728_v23  ;;  %v1311_v46 = vand.u32 4294901760, %v4725_v50 }
 0x181   :  { %v1066_v61 = vadd.f32 %v1065_v44, %v921_v5  ;;  %1298 = vmatmul.f32.gmra.mxu2 %v1297_v10  ;;  %2026 = vmatpush.msrb.mxu0 %v4738_v55 }
 0x182   :  { %v4732_v58 = vpop.f32.mrf.mxu3  ;;  %2357 = vmatpush.msra.mxu2 %v4728_v23  ;;  %v2227_v49 = vsub.f32 %v4728_v23, %v5840_v32  ;;  %2477 = vmatpush.msra.mxu3 %v4738_v55  ;;  %v4769_v32 = vsub.f32 %v41_v11, %v4738_v55 }
 0x183   :  { %v4742_v44 = vadd.f32 %v4640_v17, %v1066_v61  ;;  %v1305_v17 = vand.u32 4294901760, %v1304_v38  ;;  %v40_v61 = vld [vmem:[%s5783_s4 + $0x18] sm:$0xff]  ;;  %v4773_v38 = vsub.f32 %v2995_v60, %v2995_v60 }
 0x184   :  { %v804_v30 = vpop.f32.mrf.mxu2  ;;  %v4744_v62 = vpop.f32.mrf.mxu1  ;;  %v4771_v15 = vand.u32 4294901760, %v40_v61  ;;  %2360 = vmatpush.msra.mxu2 %v4769_v32 }
 0x185   :  { %5973 = vst [vmem:[#allocation26_spill] sm:$0xff] %v4742_v44  ;;  %v805_v5 = vadd.f32 %v804_v30, %v4270_v19  ;;  %v4751_v10 = vpop.f32.mrf.mxu0  ;;  %v4762_v44 = vpop.permute.xlu1 %220  ;;  %v2228_v30 = vand.u32 4294901760, %v2227_v49  ;;  %v4782_v49 = vand.u32 4294901760, %v39_v47  ;;  %v1319_v54 = vand.u32 4294901760, %v4773_v38 }
 0x186   :  { %v4780_v56 = vsub.f32 %v40_v61, %v4771_v15  ;;  %vm243_vm12 = vcmp.eq.s32.totalorder %v4762_v44, %v3727_v6  ;;  %2028 = vmatpush.msrb.mxu0 %v4771_v15  ;;  %2479 = vmatpush.msra.mxu3 %v4771_v15 }
 0x187   :  { %v927_v19 = vadd.f32 %v926_v16, %v805_v5  ;;  %3074 = vmatmul.msk.f32.gmra.mxu3 %vm241_vm10, %v5912_v13  ;;  %1743 = vmatmul.f32.gmra.mxu1 %v1311_v46  ;;  %v5849_v5 = vand.u32 4294901760, %v4769_v32  ;;  %v4799_v61 = vsub.f32 %v39_v47, %v4782_v49  ;;  %v2996_v36 = vsel %vm243_vm12, 1.0, %v5911_v39 }
 0x188   :  { %1614 = vmatmul.f32.gmra.mxu0 %v1302_v31  ;;  %2229 = vmatpush.msrb.mxu1 %v2228_v30  ;;  %v1312_v31 = vsub.f32 %v4725_v50, %v1311_v46  ;;  %v5975_v59 = vand.u32 4294901760, %v4780_v56 }
 0x189   :  { %v1070_v16 = vadd.f32 %v1069_v34, %v927_v19  ;;  %1306 = vmatmul.f32.gmra.mxu2 %v1305_v17  ;;  %v38_v34 = vld [vmem:[%s5783_s4 + $0x8] sm:$0xff]  ;;  %v2233_v60 = vsub.f32 %v4769_v32, %v5849_v5  ;;  %2030 = vmatpush.msrb.mxu0 %v4782_v49  ;;  %v37_v5 = vld [vmem:[%s5783_s4] sm:$0xff]  ;;  %v5862_v9 = vand.u32 4294901760, %v4799_v61  ;;  %s3228_s4 = smov [#allocation2]  }
 0x18a   :  { %v4786_v11 = vpop.f32.mrf.mxu3  ;;  %v4801_v19 = vand.u32 4294901760, %v38_v34  ;;  %2363 = vmatpush.msra.mxu2 %v4780_v56  ;;  %v2239_v2 = vsub.f32 %v4780_v56, %v5975_v59  ;;  %2481 = vmatpush.msra.mxu3 %v4782_v49  ;;  %v1313_v59 = vand.u32 4294901760, %v1312_v31  ;;  %s2957_s15 = sshll.u32 %s3228_s4, 4  ;;  %s2958_s15 = int_to_ptr.vmem [resolvable:$true] %s2957_s15 }
 0x18b   :  { %v4813_v47 = vadd.f32 %v4674_v20, %v1070_v16  ;;  %v2234_v7 = vand.u32 4294901760, %v2233_v60  ;;  %v4828_v16 = vand.u32 4294901760, %v37_v5 }
 0x18c   :  { %v809_v46 = vpop.f32.mrf.mxu2  ;;  %v4804_v30 = vpop.f32.mrf.mxu1  ;;  %v4826_v20 = vsub.f32 %v38_v34, %v4801_v19  ;;  %2032 = vmatpush.msrb.mxu0 %v4801_v19  ;;  %2366 = vmatpush.msra.mxu2 %v4799_v61  ;;  %v2240_v60 = vand.u32 4294901760, %v2239_v2  ;;  %v2245_v34 = vsub.f32 %v4799_v61, %v5862_v9 }
 0x18d   :  { %5974 = vst [vmem:[#allocation24_spill] sm:$0xff] %v4813_v47  ;;  %v810_v17 = vadd.f32 %v809_v46, %v4287_v43  ;;  %v1077_v53 = vpop.f32.mrf.mxu0  ;;  %v4840_v46 = vpop.permute.xlu2 %223  ;;  %2235 = vmatpush.msrb.mxu1 %v2234_v7  ;;  %2483 = vmatpush.msra.mxu3 %v4801_v19 }
 0x18e   :  { %v2250_v47 = vand.u32 4294901760, %v4826_v20  ;;  %v2246_v31 = vand.u32 4294901760, %v2245_v34  ;;  %2034 = vmatpush.msrb.mxu0 %v4828_v16  ;;  %vm244_vm13 = vcmp.eq.s32.totalorder %v4840_v46, %v3727_v6  ;;  %2369 = vmatpush.msra.mxu2 %v4826_v20 }
 0x18f   :  { %v933_v43 = vadd.f32 %v4732_v58, %v810_v17  ;;  %3075 = vmatmul.msk.f32.gmra.mxu3 %vm242_vm11, %v5912_v13  ;;  %1749 = vmatmul.f32.gmra.mxu1 %v1319_v54  ;;  %v4845_v58 = vsub.f32 %v37_v5, %v4828_v16  ;;  %v1326_v17 = vsub.f32 %v2996_v36, %v2996_v36 }
 0x190   :  { %1619 = vmatmul.f32.gmra.mxu0 %v4725_v50  ;;  %2241 = vmatpush.msrb.mxu1 %v2240_v60  ;;  %v2251_v9 = vsub.f32 %v4826_v20, %v2250_v47  ;;  %v5976_v50 = vand.u32 4294901760, %v4370_v52  ;;  %v1320_v36 = vsub.f32 %v4773_v38, %v1319_v54  ;;  %v5978_v60 = vand.u32 4294901760, %v4423_v37 }
 0x191   :  { %v1074_v0 = vadd.f32 %v4751_v10, %v933_v43  ;;  %1314 = vmatmul.f32.gmra.mxu2 %v1313_v59  ;;  %v2256_v7 = vand.u32 4294901760, %v4845_v58  ;;  %2485 = vmatpush.msra.mxu3 %v4828_v16 }
 0x192   :  { %v944_v2 = vpop.f32.mrf.mxu3  ;;  %2586 = vmatpush.msra.mxu0 %v5976_v50  ;;  %2247 = vmatpush.msrb.mxu1 %v2246_v31  ;;  %v2252_v59 = vand.u32 4294901760, %v2251_v9  ;;  %v1327_v50 = vand.u32 4294901760, %v1326_v17  ;;  %v2997_v9 = vsel %vm244_vm13, 1.0, %v5911_v39  ;;  %v4884_v31 = vpop.permute.xlu0 %226 }
 0x193   :  { %v4861_v10 = vadd.f32 %v4708_v35, %v1074_v0  ;;  %v2257_v52 = vsub.f32 %v4845_v58, %v2256_v7  ;;  %2372 = vmatpush.msra.mxu2 %v4845_v58  ;;  %v5979_v0 = vand.u32 4294901760, %v4455_v29  ;;  %vm5863_vm14 = vcmp.eq.s32.totalorder %v4884_v31, %v3727_v6 }
 0x194   :  { %v814_v5 = vpop.f32.mrf.mxu2  ;;  %v4863_v43 = vpop.f32.mrf.mxu1  ;;  %2590 = vmatpush.msra.mxu0 %v5978_v60  ;;  %2253 = vmatpush.msrb.mxu1 %v2252_v59 }
 0x195   :  { %5977 = vst [vmem:[#allocation29_spill] sm:$0xff] %v4861_v10  ;;  %v815_v54 = vadd.f32 %v814_v5, %v4304_v24  ;;  %v1081_v34 = vpop.f32.mrf.mxu0  ;;  %v2258_v35 = vand.u32 4294901760, %v2257_v52  ;;  %v1321_v24 = vand.u32 4294901760, %v1320_v36  ;;  %v1334_v5 = vsub.f32 %v2997_v9, %v2997_v9 }
 0x196   :  { %2594 = vmatpush.msra.mxu0 %v5979_v0  ;;  %v1328_v52 = vsub.f32 %v1326_v17, %v1327_v50  ;;  %v5985_v0 = vand.u32 4294901760, %v4624_v40 }
 0x197   :  { %v939_v37 = vadd.f32 %v4786_v11, %v815_v54  ;;  %3076 = vmatmul.msk.f32.gmra.mxu3 %vm243_vm12, %v5912_v13  ;;  %1755 = vmatmul.f32.gmra.mxu1 %v1327_v50  ;;  %v5980_v11 = vand.u32 4294901760, %v4488_v1  ;;  %v1335_v1 = vand.u32 4294901760, %v1334_v5 }
 0x198   :  { %1624 = vmatmul.f32.gmra.mxu0 %v4773_v38  ;;  %2259 = vmatpush.msrb.mxu1 %v2258_v35  ;;  %v5984_v35 = vand.u32 4294901760, %v4590_v18 }
 0x199   :  { %v1078_v59 = vadd.f32 %v1077_v53, %v939_v37  ;;  %1322 = vmatmul.f32.gmra.mxu2 %v1321_v24  ;;  %2598 = vmatpush.msra.mxu0 %v5980_v11  ;;  %v5982_v53 = vand.u32 4294901760, %v4522_v28  ;;  %v4912_v28 = vpop.permute.xlu1 %229  ;;  %v5988_v11 = vand.u32 4294901760, %v4692_v12 }
 0x19a   :  { %2713 = vmatpush.msra.mxu1 %v4360_v21  ;;  %v950_v29 = vpop.f32.mrf.mxu3  ;;  %vm5864_vm15 = vcmp.eq.s32.totalorder %v4912_v28, %v3727_v6 }
 0x19b   :  { %v4894_v36 = vadd.f32 %v4744_v62, %v1078_v59  ;;  %2602 = vmatpush.msra.mxu0 %v5982_v53  ;;  %v5983_v62 = vand.u32 4294901760, %v4556_v57  ;;  %v2999_v40 = vsel %vm5864_vm15, 1.0, %v5911_v39 }
 0x19c   :  { %2715 = vmatpush.msra.mxu1 %v4398_v27  ;;  %v819_v38 = vpop.f32.mrf.mxu2  ;;  %v4896_v60 = vpop.f32.mrf.mxu1  ;;  %v2998_v27 = vsel %vm5863_vm14, 1.0, %v5911_v39 }
 0x19d   :  { %5981 = vst [vmem:[#allocation27_spill] sm:$0xff] %v4894_v36  ;;  %v820_v21 = vadd.f32 %v819_v38, %v4321_v26  ;;  %v1085_v54 = vpop.f32.mrf.mxu0  ;;  %2606 = vmatpush.msra.mxu0 %v5983_v62  ;;  %v1329_v26 = vand.u32 4294901760, %v1328_v52  ;;  %v5989_v52 = vand.u32 4294901760, %v4728_v23  ;;  %v5993_v62 = vand.u32 4294901760, %v4799_v61 }
 0x19e   :  { %2717 = vmatpush.msra.mxu1 %v4432_v22  ;;  %v1342_v22 = vsub.f32 %v2998_v27, %v2998_v27 }
 0x19f   :  { %v945_v50 = vadd.f32 %v944_v2, %v820_v21  ;;  %3077 = vmatmul.msk.f32.gmra.mxu3 %vm244_vm13, %v5912_v13  ;;  %1761 = vmatmul.f32.gmra.mxu1 %v1335_v1  ;;  %v1336_v2 = vsub.f32 %v1334_v5, %v1335_v1 }
 0x1a0   :  { %1629 = vmatmul.f32.gmra.mxu0 %v1326_v17  ;;  %2719 = vmatpush.msra.mxu1 %v4466_v51  ;;  %v1343_v24 = vand.u32 4294901760, %v1342_v22 }
 0x1a1   :  { %v1082_v9 = vadd.f32 %v1081_v34, %v945_v50  ;;  %1330 = vmatmul.f32.gmra.mxu2 %v1329_v26  ;;  %2610 = vmatpush.msra.mxu0 %v5984_v35 }
 0x1a2   :  { %v956_v57 = vpop.f32.mrf.mxu3  ;;  %2721 = vmatpush.msra.mxu1 %v4498_v3  ;;  %v5987_v3 = vand.u32 4294901760, %v4658_v48  ;;  %v1350_v48 = vsub.f32 %v2999_v40, %v2999_v40 }
 0x1a3   :  { %2614 = vmatpush.msra.mxu0 %v5985_v0  ;;  %v4923_v17 = vadd.f32 %v4804_v30, %v1082_v9  ;;  %v5997_v0 = vld [vmem:[#allocation19_spill] sm:$0xff] }
 0x1a4   :  { %v824_v51 = vpop.f32.mrf.mxu2  ;;  %v4925_v37 = vpop.f32.mrf.mxu1  ;;  %2723 = vmatpush.msra.mxu1 %v4532_v14  ;;  %v1351_v21 = vand.u32 4294901760, %v1350_v48 }
 0x1a5   :  { %5986 = vst [vmem:[#allocation28_spill] sm:$0xff] %v4923_v17  ;;  %v825_v18 = vadd.f32 %v824_v51, %v4338_v42  ;;  %v1089_v34 = vpop.f32.mrf.mxu0  ;;  %2618 = vmatpush.msra.mxu0 %v5987_v3  ;;  %v1337_v42 = vand.u32 4294901760, %v1336_v2  ;;  %v4941_v14 = vpop.permute.xlu2 %296 }
 0x1a6   :  { %2725 = vmatpush.msra.mxu1 %v4566_v25  ;;  %v1352_v27 = vsub.f32 %v1350_v48, %v1351_v21 }
 0x1a7   :  { %v951_v30 = vadd.f32 %v950_v29, %v825_v18  ;;  %3078 = vmatmul.msk.f32.gmra.mxu3 %vm5863_vm14, %v5912_v13  ;;  %1767 = vmatmul.f32.gmra.mxu1 %v1343_v24  ;;  %v1344_v29 = vsub.f32 %v1342_v22, %v1343_v24  ;;  %vm5865_vm14 = vcmp.eq.s32.totalorder %v4941_v14, %v3727_v6 }
 0x1a8   :  { %1634 = vmatmul.f32.gmra.mxu0 %v1334_v5  ;;  %2727 = vmatpush.msra.mxu1 %v4600_v45  ;;  %v3000_v23 = vsel %vm5865_vm14, 1.0, %v5911_v39 }
 0x1a9   :  { %v1086_v59 = vadd.f32 %v1085_v54, %v951_v30  ;;  %1338 = vmatmul.f32.gmra.mxu2 %v1337_v42  ;;  %2622 = vmatpush.msra.mxu0 %v5988_v11  ;;  %v4973_v54 = vsub.f32 %v3000_v23, %v3000_v23 }
 0x1aa   :  { %v962_v25 = vpop.f32.mrf.mxu3  ;;  %2729 = vmatpush.msra.mxu1 %v4634_v4  ;;  %v5991_v4 = vand.u32 4294901760, %v4769_v32 }
 0x1ab   :  { %2626 = vmatpush.msra.mxu0 %v5989_v52  ;;  %v4949_v38 = vadd.f32 %v4863_v43, %v1086_v59 }
 0x1ac   :  { %v829_v45 = vpop.f32.mrf.mxu2  ;;  %v4953_v5 = vpop.f32.mrf.mxu1  ;;  %2731 = vmatpush.msra.mxu1 %v4668_v63 }
 0x1ad   :  { %5990 = vst [vmem:[#allocation30_spill] sm:$0xff] %v4949_v38  ;;  %v830_v12 = vadd.f32 %v829_v45, %v4364_v8  ;;  %v1093_v53 = vpop.f32.mrf.mxu0  ;;  %2630 = vmatpush.msra.mxu0 %v5991_v4  ;;  %v1345_v8 = vand.u32 4294901760, %v1344_v29  ;;  %v4969_v63 = vpop.permute.xlu0 %299 }
 0x1ae   :  { %2733 = vmatpush.msra.mxu1 %v4702_v33  ;;  %v5992_v33 = vand.u32 4294901760, %v4780_v56  ;;  %v5030_v3 = vpop.permute.xlu2 %305 }
 0x1af   :  { %v957_v43 = vadd.f32 %v956_v57, %v830_v12  ;;  %3079 = vmatmul.msk.f32.gmra.mxu3 %vm5864_vm15, %v5912_v13  ;;  %1773 = vmatmul.f32.gmra.mxu1 %v1351_v21  ;;  %vm5866_vm15 = vcmp.eq.s32.totalorder %v4969_v63, %v3727_v6 }
 0x1b0   :  { %1639 = vmatmul.f32.gmra.mxu0 %v1342_v22  ;;  %2735 = vmatpush.msra.mxu1 %v4738_v55  ;;  %v3001_v61 = vsel %vm5866_vm15, 1.0, %v5911_v39 }
 0x1b1   :  { %v1090_v32 = vadd.f32 %v1089_v34, %v957_v43  ;;  %1346 = vmatmul.f32.gmra.mxu2 %v1345_v8  ;;  %2634 = vmatpush.msra.mxu0 %v5992_v33  ;;  %v5009_v20 = vsub.f32 %v3001_v61, %v3001_v61 }
 0x1b2   :  { %v968_v1 = vpop.f32.mrf.mxu3  ;;  %2737 = vmatpush.msra.mxu1 %v4771_v15  ;;  %v5876_v15 = vand.u32 4294901760, %v4973_v54 }
 0x1b3   :  { %2638 = vmatpush.msra.mxu0 %v5993_v62  ;;  %v4979_v50 = vadd.f32 %v4896_v60, %v1090_v32 }
 0x1b4   :  { %v834_v55 = vpop.f32.mrf.mxu2  ;;  %v1684_v26 = vpop.f32.mrf.mxu1  ;;  %2739 = vmatpush.msra.mxu1 %v4782_v49 }
 0x1b5   :  { %5994 = vst [vmem:[#allocation31_spill] sm:$0xff] %v4979_v50  ;;  %v835_v56 = vadd.f32 %v834_v55, %v4402_v41  ;;  %v1097_v22 = vpop.f32.mrf.mxu0  ;;  %2642 = vmatpush.msra.mxu0 %v2250_v47  ;;  %v1353_v41 = vand.u32 4294901760, %v1352_v27  ;;  %v5002_v49 = vpop.permute.xlu1 %302  ;;  %v2038_v47 = vsub.f32 %v4973_v54, %v5876_v15 }
 0x1b6   :  { %2741 = vmatpush.msra.mxu1 %v4801_v19 }
 0x1b7   :  { %v963_v60 = vadd.f32 %v962_v25, %v835_v56  ;;  %3096 = vmatmul.msk.f32.vlgmr.msrb.gmra.mxu3 %vm231_vm0, %v5912_v13  ;;  %3112 = vmatmul.msk.f32.vlgmr.msrb.gmra.mxu1 %vm5865_vm14, %v5912_v13  ;;  %vm345_vm14 = vcmp.eq.s32.totalorder %v5002_v49, %v3727_v6  ;;  %v2039_v58 = vand.u32 4294901760, %v2038_v47 }
 0x1b8   :  { %1644 = vmatmul.f32.gmra.mxu0 %v1350_v48  ;;  %2743 = vmatpush.msra.mxu1 %v4828_v16  ;;  %v3002_v34 = vsel %vm345_vm14, 1.0, %v5911_v39 }
 0x1b9   :  { %v1094_v19 = vadd.f32 %v1093_v53, %v963_v60  ;;  %1354 = vmatmul.f32.gmra.mxu2 %v1353_v41  ;;  %2646 = vmatpush.msra.mxu0 %v2256_v7  ;;  %v5875_v7 = vand.u32 4294901760, %v5009_v20  ;;  %v5036_v30 = vsub.f32 %v3002_v34, %v3002_v34 }
 0x1ba   :  { %v1456_v35 = vpop.f32.mrf.mxu3 }
 0x1bb   :  { %v5012_v57 = vadd.f32 %v4925_v37, %v1094_v19  ;;  %v2046_v48 = vsub.f32 %v5009_v20, %v5875_v7  ;;  %v5873_v12 = vand.u32 4294901760, %v5036_v30  ;;  %v5115_v37 = vpop.permute.xlu2 %314 }
 0x1bc   :  { %v839_v16 = vpop.f32.mrf.mxu2  ;;  %v1690_v2 = vpop.f32.mrf.mxu1 }
 0x1bd   :  { %5996 = vst [vmem:[#allocation13_spill] sm:$0xff] %v5012_v57  ;;  %v840_v51 = vadd.f32 %v839_v16, %v5997_v0  ;;  %v1570_v18 = vpop.f32.mrf.mxu0  ;;  %v2047_v45 = vand.u32 4294901760, %v2046_v48  ;;  %v2054_v32 = vsub.f32 %v5036_v30, %v5873_v12  ;;  %v5087_v60 = vpop.permute.xlu1 %311 }
 0x1bf   :  { %v969_v24 = vadd.f32 %v968_v1, %v840_v51  ;;  %3097 = vmatmul.msk.f32.gmra.mxu3 %vm232_vm1, %v5912_v13  ;;  %3113 = vmatmul.msk.f32.gmra.mxu1 %vm5866_vm15, %v5912_v13  ;;  %vm346_vm15 = vcmp.eq.s32.totalorder %v5030_v3, %v3727_v6  ;;  %v2055_v55 = vand.u32 4294901760, %v2054_v32 }
 0x1c0   :  { %2040 = vmatmul.f32.vlgmr.msrb.gmra.mxu0 %v2039_v58  ;;  %v3003_v53 = vsel %vm346_vm15, 1.0, %v5911_v39 }
 0x1c1   :  { %v1098_v40 = vadd.f32 %v1097_v22, %v969_v24  ;;  %3080 = vmatmul.msk.f32.vlgmr.msrb.gmra.mxu2 %vm231_vm0, %v5912_v13  ;;  %v5067_v43 = vsub.f32 %v3003_v53, %v3003_v53 }
 0x1c2   :  { %v1460_v42 = vpop.f32.mrf.mxu3 }
 0x1c3   :  { %v5042_v59 = vadd.f32 %v4953_v5, %v1098_v40  ;;  %v5059_v5 = vpop.permute.xlu0 %308  ;;  %v5872_v56 = vand.u32 4294901760, %v5067_v43 }
 0x1c4   :  { %v1235_v11 = vpop.f32.mrf.mxu2  ;;  %v1696_v25 = vpop.f32.mrf.mxu1  ;;  %vm347_vm0 = vcmp.eq.s32.totalorder %v5059_v5, %v3727_v6 }
 0x1c5   :  { %5999 = vst [vmem:[#allocation19_spill] sm:$0xff] %v5042_v59  ;;  %v1457_v29 = vadd.f32 %v1456_v35, %v1235_v11  ;;  %v1575_v52 = vpop.f32.mrf.mxu0  ;;  %v2062_v47 = vsub.f32 %v5067_v43, %v5872_v56 }
 0x1c7   :  { %v1571_v21 = vadd.f32 %v1570_v18, %v1457_v29  ;;  %3098 = vmatmul.msk.f32.gmra.mxu3 %vm233_vm2, %v5912_v13  ;;  %3114 = vmatmul.msk.f32.gmra.mxu1 %vm345_vm14, %v5912_v13  ;;  %v2063_v18 = vand.u32 4294901760, %v2062_v47 }
 0x1c8   :  { %2048 = vmatmul.f32.gmra.mxu0 %v2047_v45 }
 0x1c9   :  { %3081 = vmatmul.msk.f32.gmra.mxu2 %vm232_vm1, %v5912_v13  ;;  %v5065_v23 = vadd.f32 %v1684_v26, %v1571_v21  ;;  %v3004_v26 = vsel %vm347_vm0, 1.0, %v5911_v39  ;;  %vm348_vm1 = vcmp.eq.s32.totalorder %v5087_v60, %v3727_v6 }
 0x1ca   :  { %v1464_v8 = vpop.f32.mrf.mxu3  ;;  %v5095_v41 = vsub.f32 %v3004_v26, %v3004_v26 }
 0x1cc   :  { %v1243_v33 = vpop.f32.mrf.mxu2  ;;  %v1702_v1 = vpop.f32.mrf.mxu1  ;;  %v5871_v58 = vand.u32 4294901760, %v5095_v41 }
 0x1cd   :  { %v1461_v27 = vadd.f32 %v1460_v42, %v1243_v33  ;;  %v1580_v62 = vpop.f32.mrf.mxu0  ;;  %v5143_v33 = vpop.permute.xlu0 %317 }
 0x1ce   :  { %v2070_v11 = vsub.f32 %v5095_v41, %v5871_v58 }
 0x1cf   :  { %v1576_v22 = vadd.f32 %v1575_v52, %v1461_v27  ;;  %3099 = vmatmul.msk.f32.gmra.mxu3 %vm234_vm3, %v5912_v13  ;;  %3115 = vmatmul.msk.f32.gmra.mxu1 %vm346_vm15, %v5912_v13 }
 0x1d0   :  { %2056 = vmatmul.f32.gmra.mxu0 %v2055_v55  ;;  %v2071_v21 = vand.u32 4294901760, %v2070_v11 }
 0x1d1   :  { %3082 = vmatmul.msk.f32.gmra.mxu2 %vm233_vm2, %v5912_v13  ;;  %v5093_v9 = vadd.f32 %v1690_v2, %v1576_v22  ;;  %v3005_v2 = vsel %vm348_vm1, 1.0, %v5911_v39  ;;  %vm349_vm2 = vcmp.eq.s32.totalorder %v5115_v37, %v3727_v6 }
 0x1d2   :  { %v1468_v19 = vpop.f32.mrf.mxu3  ;;  %v5123_v42 = vsub.f32 %v3005_v2, %v3005_v2  ;;  %v5171_v2 = vpop.permute.xlu1 %320 }
 0x1d4   :  { %v1251_v35 = vpop.f32.mrf.mxu2  ;;  %v1708_v16 = vpop.f32.mrf.mxu1  ;;  %v5869_v4 = vand.u32 4294901760, %v5123_v42 }
 0x1d5   :  { %v1465_v0 = vadd.f32 %v1464_v8, %v1251_v35  ;;  %v1585_v51 = vpop.f32.mrf.mxu0 }
 0x1d6   :  { %v2078_v26 = vsub.f32 %v5123_v42, %v5869_v4 }
 0x1d7   :  { %v1581_v34 = vadd.f32 %v1580_v62, %v1465_v0  ;;  %3100 = vmatmul.msk.f32.gmra.mxu3 %vm235_vm4, %v5912_v13  ;;  %3116 = vmatmul.msk.f32.gmra.mxu1 %vm347_vm0, %v5912_v13 }
 0x1d8   :  { %2064 = vmatmul.f32.gmra.mxu0 %v2063_v18  ;;  %v2079_v35 = vand.u32 4294901760, %v2078_v26 }
 0x1d9   :  { %3083 = vmatmul.msk.f32.gmra.mxu2 %vm234_vm3, %v5912_v13  ;;  %v5121_v40 = vadd.f32 %v1696_v25, %v1581_v34  ;;  %v3006_v25 = vsel %vm349_vm2, 1.0, %v5911_v39  ;;  %vm350_vm3 = vcmp.eq.s32.totalorder %v5143_v33, %v3727_v6 }
 0x1da   :  { %v1472_v48 = vpop.f32.mrf.mxu3  ;;  %v5151_v62 = vsub.f32 %v3006_v25, %v3006_v25 }
 0x1dc   :  { %v1259_v29 = vpop.f32.mrf.mxu2  ;;  %v1714_v52 = vpop.f32.mrf.mxu1  ;;  %v5868_v0 = vand.u32 4294901760, %v5151_v62 }
 0x1dd   :  { %v1469_v45 = vadd.f32 %v1468_v19, %v1259_v29  ;;  %v1590_v53 = vpop.f32.mrf.mxu0 }
 0x1de   :  { %v2086_v11 = vsub.f32 %v5151_v62, %v5868_v0 }
 0x1df   :  { %v1586_v8 = vadd.f32 %v1585_v51, %v1469_v45  ;;  %3101 = vmatmul.msk.f32.gmra.mxu3 %vm236_vm5, %v5912_v13  ;;  %3117 = vmatmul.msk.f32.gmra.mxu1 %vm348_vm1, %v5912_v13 }
 0x1e0   :  { %2072 = vmatmul.f32.gmra.mxu0 %v2071_v21  ;;  %v2087_v25 = vand.u32 4294901760, %v2086_v11 }
 0x1e1   :  { %3084 = vmatmul.msk.f32.gmra.mxu2 %vm235_vm4, %v5912_v13  ;;  %v5149_v27 = vadd.f32 %v1702_v1, %v1586_v8  ;;  %v3007_v1 = vsel %vm350_vm3, 1.0, %v5911_v39  ;;  %vm351_vm4 = vcmp.eq.s32.totalorder %v5171_v2, %v3727_v6 }
 0x1e2   :  { %v1476_v55 = vpop.f32.mrf.mxu3  ;;  %v5179_v24 = vsub.f32 %v3007_v1, %v3007_v1 }
 0x1e4   :  { %v1267_v22 = vpop.f32.mrf.mxu2  ;;  %v1720_v61 = vpop.f32.mrf.mxu1  ;;  %v5867_v8 = vand.u32 4294901760, %v5179_v24 }
 0x1e5   :  { %v1473_v19 = vadd.f32 %v1472_v48, %v1267_v22  ;;  %v1595_v47 = vpop.f32.mrf.mxu0 }
 0x1e7   :  { %v1591_v51 = vadd.f32 %v1590_v53, %v1473_v19  ;;  %3102 = vmatmul.msk.f32.gmra.mxu3 %vm237_vm6, %v5912_v13  ;;  %3118 = vmatmul.msk.f32.gmra.mxu1 %vm349_vm2, %v5912_v13 }
 0x1e8   :  { %2080 = vmatmul.f32.gmra.mxu0 %v2079_v35  ;;  %v2094_v35 = vsub.f32 %v5179_v24, %v5867_v8 }
 0x1e9   :  { %3085 = vmatmul.msk.f32.gmra.mxu2 %vm236_vm5, %v5912_v13  ;;  %v5177_v34 = vadd.f32 %v1708_v16, %v1591_v51  ;;  %v3008_v16 = vsel %vm351_vm4, 1.0, %v5911_v39 }
 0x1ea   :  { %v1480_v48 = vpop.f32.mrf.mxu3  ;;  %v5207_v19 = vsub.f32 %v3008_v16, %v3008_v16 }
 0x1ec   :  { %v1275_v29 = vpop.f32.mrf.mxu2  ;;  %v1726_v45 = vpop.f32.mrf.mxu1  ;;  %v5870_v18 = vand.u32 4294901760, %v5207_v19 }
 0x1ed   :  { %v1477_v53 = vadd.f32 %v1476_v55, %v1275_v29  ;;  %v1600_v21 = vpop.f32.mrf.mxu0  ;;  %v5199_v55 = vpop.permute.xlu2 %323 }
 0x1ee   :  { %vm352_vm5 = vcmp.eq.s32.totalorder %v5199_v55, %v3727_v6 }
 0x1ef   :  { %v1596_v32 = vadd.f32 %v1595_v47, %v1477_v53  ;;  %3103 = vmatmul.msk.f32.gmra.mxu3 %vm238_vm7, %v5912_v13  ;;  %3119 = vmatmul.msk.f32.gmra.mxu1 %vm350_vm3, %v5912_v13  ;;  %v2095_v53 = vand.u32 4294901760, %v2094_v35 }
 0x1f0   :  { %2088 = vmatmul.f32.gmra.mxu0 %v2087_v25 }
 0x1f1   :  { %3086 = vmatmul.msk.f32.gmra.mxu2 %vm237_vm6, %v5912_v13  ;;  %v5205_v22 = vadd.f32 %v1714_v52, %v1596_v32  ;;  %v3009_v52 = vsel %vm352_vm5, 1.0, %v5911_v39 }
 0x1f2   :  { %v1484_v47 = vpop.f32.mrf.mxu3 }
 0x1f4   :  { %v1283_v1 = vpop.f32.mrf.mxu2  ;;  %v1732_v51 = vpop.f32.mrf.mxu1 }
 0x1f5   :  { %v1481_v11 = vadd.f32 %v1480_v48, %v1283_v1  ;;  %v1605_v29 = vpop.f32.mrf.mxu0  ;;  %v5227_v48 = vpop.permute.xlu0 %326  ;;  %v2102_v1 = vsub.f32 %v5207_v19, %v5870_v18 }
 0x1f6   :  { %vm353_vm6 = vcmp.eq.s32.totalorder %v5227_v48, %v3727_v6 }
 0x1f7   :  { %v1601_v25 = vadd.f32 %v1600_v21, %v1481_v11  ;;  %3104 = vmatmul.msk.f32.gmra.mxu3 %vm239_vm8, %v5912_v13  ;;  %3120 = vmatmul.msk.f32.gmra.mxu1 %vm351_vm4, %v5912_v13  ;;  %v5235_v21 = vsub.f32 %v3009_v52, %v3009_v52  ;;  %v2103_v4 = vand.u32 4294901760, %v2102_v1 }
 0x1f8   :  { %2096 = vmatmul.f32.gmra.mxu0 %v2095_v53 }
 0x1f9   :  { %3087 = vmatmul.msk.f32.gmra.mxu2 %vm238_vm7, %v5912_v13  ;;  %v5233_v32 = vadd.f32 %v1720_v61, %v1601_v25  ;;  %v5874_v26 = vand.u32 4294901760, %v5235_v21  ;;  %v3010_v61 = vsel %vm353_vm6, 1.0, %v5911_v39 }
 0x1fa   :  { %v1488_v35 = vpop.f32.mrf.mxu3 }
 0x1fc   :  { %v1291_v11 = vpop.f32.mrf.mxu2  ;;  %v1738_v53 = vpop.f32.mrf.mxu1 }
 0x1fd   :  { %v1485_v8 = vadd.f32 %v1484_v47, %v1291_v11  ;;  %v1610_v0 = vpop.f32.mrf.mxu0  ;;  %v5255_v47 = vpop.permute.xlu1 %329  ;;  %v2110_v11 = vsub.f32 %v5235_v21, %v5874_v26 }
 0x1fe   :  { %vm354_vm7 = vcmp.eq.s32.totalorder %v5255_v47, %v3727_v6 }
 0x1ff   :  { %v1606_v52 = vadd.f32 %v1605_v29, %v1485_v8  ;;  %3105 = vmatmul.msk.f32.gmra.mxu3 %vm240_vm9, %v5912_v13  ;;  %3121 = vmatmul.msk.f32.gmra.mxu1 %vm352_vm5, %v5912_v13  ;;  %v5263_v8 = vsub.f32 %v3010_v61, %v3010_v61  ;;  %v2111_v12 = vand.u32 4294901760, %v2110_v11 }
 0x200   :  { %2104 = vmatmul.f32.gmra.mxu0 %v2103_v4 }
 0x201   :  { %3088 = vmatmul.msk.f32.gmra.mxu2 %vm239_vm8, %v5912_v13  ;;  %v5261_v1 = vadd.f32 %v1726_v45, %v1606_v52  ;;  %v5877_v16 = vand.u32 4294901760, %v5263_v8  ;;  %v3011_v45 = vsel %vm354_vm7, 1.0, %v5911_v39 }
 0x202   :  { %v1492_v29 = vpop.f32.mrf.mxu3 }
 0x204   :  { %v1299_v4 = vpop.f32.mrf.mxu2  ;;  %v1744_v18 = vpop.f32.mrf.mxu1 }
 0x205   :  { %v1489_v58 = vadd.f32 %v1488_v35, %v1299_v4  ;;  %v1615_v56 = vpop.f32.mrf.mxu0  ;;  %v5283_v35 = vpop.permute.xlu2 %332  ;;  %v2118_v4 = vsub.f32 %v5263_v8, %v5877_v16 }
 0x206   :  { %vm355_vm8 = vcmp.eq.s32.totalorder %v5283_v35, %v3727_v6 }
 0x207   :  { %v1611_v61 = vadd.f32 %v1610_v0, %v1489_v58  ;;  %3106 = vmatmul.msk.f32.gmra.mxu3 %vm241_vm10, %v5912_v13  ;;  %3122 = vmatmul.msk.f32.gmra.mxu1 %vm353_vm6, %v5912_v13  ;;  %v5291_v58 = vsub.f32 %v3011_v45, %v3011_v45  ;;  %v2119_v59 = vand.u32 4294901760, %v2118_v4 }
 0x208   :  { %2112 = vmatmul.f32.gmra.mxu0 %v2111_v12 }
 0x209   :  { %3089 = vmatmul.msk.f32.gmra.mxu2 %vm240_vm9, %v5912_v13  ;;  %v5289_v11 = vadd.f32 %v1732_v51, %v1611_v61  ;;  %v5878_v25 = vand.u32 4294901760, %v5291_v58  ;;  %v3012_v51 = vsel %vm355_vm8, 1.0, %v5911_v39 }
 0x20a   :  { %v1496_v0 = vpop.f32.mrf.mxu3 }
 0x20c   :  { %v1307_v12 = vpop.f32.mrf.mxu2  ;;  %v1750_v26 = vpop.f32.mrf.mxu1 }
 0x20d   :  { %v1493_v7 = vadd.f32 %v1492_v29, %v1307_v12  ;;  %v1620_v15 = vpop.f32.mrf.mxu0  ;;  %v5311_v29 = vpop.permute.xlu0 %335  ;;  %v2126_v12 = vsub.f32 %v5291_v58, %v5878_v25 }
 0x20e   :  { %6010 = vst [vmem:[#allocation16_spill] sm:$0xff] %v5311_v29  ;;  %vm356_vm9 = vcmp.eq.s32.totalorder %v5311_v29, %v3727_v6 }
 0x20f   :  { %v1616_v45 = vadd.f32 %v1615_v56, %v1493_v7  ;;  %3107 = vmatmul.msk.f32.gmra.mxu3 %vm242_vm11, %v5912_v13  ;;  %3123 = vmatmul.msk.f32.gmra.mxu1 %vm354_vm7, %v5912_v13  ;;  %v5319_v7 = vsub.f32 %v3012_v51, %v3012_v51  ;;  %v2127_v38 = vand.u32 4294901760, %v2126_v12 }
 0x210   :  { %2120 = vmatmul.f32.gmra.mxu0 %v2119_v59 }
 0x211   :  { %3090 = vmatmul.msk.f32.gmra.mxu2 %vm241_vm10, %v5912_v13  ;;  %v5317_v4 = vadd.f32 %v1738_v53, %v1616_v45  ;;  %v5879_v52 = vand.u32 4294901760, %v5319_v7  ;;  %v3013_v53 = vsel %vm356_vm9, 1.0, %v5911_v39 }
 0x212   :  { %v1500_v56 = vpop.f32.mrf.mxu3 }
 0x213   :  { %v2134_v12 = vsub.f32 %v5319_v7, %v5879_v52 }
 0x214   :  { %v1315_v59 = vpop.f32.mrf.mxu2  ;;  %v1756_v16 = vpop.f32.mrf.mxu1 }
 0x215   :  { %v1497_v57 = vadd.f32 %v1496_v0, %v1315_v59  ;;  %v1625_v50 = vpop.f32.mrf.mxu0  ;;  %v5339_v0 = vpop.permute.xlu1 %338  ;;  %v2135_v36 = vand.u32 4294901760, %v2134_v12 }
 0x216   :  { %6011 = vst [vmem:[#allocation17_spill] sm:$0xff] %v5339_v0  ;;  %vm357_vm10 = vcmp.eq.s32.totalorder %v5339_v0, %v3727_v6 }
 0x217   :  { %v1621_v51 = vadd.f32 %v1620_v15, %v1497_v57  ;;  %3108 = vmatmul.msk.f32.gmra.mxu3 %vm243_vm12, %v5912_v13  ;;  %3124 = vmatmul.msk.f32.gmra.mxu1 %vm355_vm8, %v5912_v13  ;;  %v5347_v15 = vsub.f32 %v3013_v53, %v3013_v53 }
 0x218   :  { %2128 = vmatmul.f32.gmra.mxu0 %v2127_v38 }
 0x219   :  { %3091 = vmatmul.msk.f32.gmra.mxu2 %vm242_vm11, %v5912_v13  ;;  %v5345_v45 = vadd.f32 %v1744_v18, %v1621_v51  ;;  %6012 = vst [vmem:[#allocation21_spill] sm:$0xff] %v5347_v15  ;;  %v5882_v61 = vand.u32 4294901760, %v5347_v15  ;;  %v3014_v18 = vsel %vm357_vm10, 1.0, %v5911_v39 }
 0x21a   :  { %v1504_v57 = vpop.f32.mrf.mxu3 }
 0x21b   :  { %v2142_v12 = vsub.f32 %v5347_v15, %v5882_v61 }
 0x21c   :  { %v1323_v38 = vpop.f32.mrf.mxu2  ;;  %v1762_v59 = vpop.f32.mrf.mxu1 }
 0x21d   :  { %v1501_v25 = vadd.f32 %v1500_v56, %v1323_v38  ;;  %v1630_v17 = vpop.f32.mrf.mxu0  ;;  %v5367_v56 = vpop.permute.xlu2 %341  ;;  %v2143_v29 = vand.u32 4294901760, %v2142_v12 }
 0x21e   :  { %vm358_vm11 = vcmp.eq.s32.totalorder %v5367_v56, %v3727_v6 }
 0x21f   :  { %v1626_v53 = vadd.f32 %v1625_v50, %v1501_v25  ;;  %3109 = vmatmul.msk.f32.gmra.mxu3 %vm244_vm13, %v5912_v13  ;;  %3125 = vmatmul.msk.f32.gmra.mxu1 %vm356_vm9, %v5912_v13  ;;  %v5375_v50 = vsub.f32 %v3014_v18, %v3014_v18 }
 0x220   :  { %2136 = vmatmul.f32.gmra.mxu0 %v2135_v36 }
 0x221   :  { %3092 = vmatmul.msk.f32.gmra.mxu2 %vm243_vm12, %v5912_v13  ;;  %v5373_v51 = vadd.f32 %v1750_v26, %v1626_v53  ;;  %v2149_v44 = vand.u32 4294901760, %v5375_v50  ;;  %v3015_v26 = vsel %vm358_vm11, 1.0, %v5911_v39  ;;  %vm6013_vm12 = vcmp.eq.s32.totalorder %v4884_v31, %v3727_v6 }
 0x222   :  { %v1508_v25 = vpop.f32.mrf.mxu3  ;;  %v5401_v39 = vsub.f32 %v3015_v26, %v3015_v26 }
 0x224   :  { %v1331_v36 = vpop.f32.mrf.mxu2  ;;  %v1768_v38 = vpop.f32.mrf.mxu1 }
 0x225   :  { %v1505_v52 = vadd.f32 %v1504_v57, %v1331_v36  ;;  %v1635_v10 = vpop.f32.mrf.mxu0 }
 0x227   :  { %v1631_v18 = vadd.f32 %v1630_v17, %v1505_v52  ;;  %3110 = vmatmul.msk.f32.gmra.mxu3 %vm6013_vm12, %v5912_v13  ;;  %3126 = vmatmul.msk.f32.gmra.mxu1 %vm357_vm10, %v5912_v13  ;;  %v2150_v52 = vsub.f32 %v5375_v50, %v2149_v44 }
 0x228   :  { %2144 = vmatmul.f32.gmra.mxu0 %v2143_v29  ;;  %v2157_v29 = vand.u32 4294901760, %v5401_v39 }
 0x229   :  { %3093 = vmatmul.msk.f32.gmra.mxu2 %vm244_vm13, %v5912_v13  ;;  %v5399_v57 = vadd.f32 %v1756_v16, %v1631_v18  ;;  %v2151_v0 = vand.u32 4294901760, %v2150_v52  ;;  %vm6014_vm13 = vcmp.eq.s32.totalorder %v4912_v28, %v3727_v6 }
 0x22a   :  { %v1512_v17 = vpop.f32.mrf.mxu3 }
 0x22c   :  { %v1339_v53 = vpop.f32.mrf.mxu2  ;;  %v1774_v12 = vpop.f32.mrf.mxu1 }
 0x22d   :  { %v1509_v36 = vadd.f32 %v1508_v25, %v1339_v53  ;;  %v1640_v61 = vpop.f32.mrf.mxu0 }
 0x22f   :  { %v1636_v15 = vadd.f32 %v1635_v10, %v1509_v36  ;;  %3111 = vmatmul.msk.f32.gmra.mxu3 %vm6014_vm13, %v5912_v13  ;;  %3127 = vmatmul.msk.f32.gmra.mxu1 %vm358_vm11, %v5912_v13  ;;  %v2158_v10 = vsub.f32 %v5401_v39, %v2157_v29  ;;  %vm6016_vm13 = vcmp.eq.s32.totalorder %v4941_v14, %v3727_v6 }
 0x230   :  { %2152 = vmatmul.f32.gmra.mxu0 %v2151_v0  ;;  %v6015_v0 = vand.u32 4294901760, %v4973_v54 }
 0x231   :  { %3094 = vmatmul.msk.f32.gmra.mxu2 %vm6013_vm12, %v5912_v13  ;;  %v5419_v46 = vadd.f32 %v1762_v59, %v1636_v15  ;;  %v2159_v53 = vand.u32 4294901760, %v2158_v10  ;;  %vm6017_vm12 = vcmp.eq.s32.totalorder %v4912_v28, %v3727_v6 }
 0x232   :  { %v1516_v16 = vpop.f32.mrf.mxu3 }
 0x234   :  { %v1347_v25 = vpop.f32.mrf.mxu2  ;;  %v5424_v26 = vpop.f32.mrf.mxu1 }
 0x235   :  { %v1513_v18 = vadd.f32 %v1512_v17, %v1347_v25  ;;  %v1645_v52 = vpop.f32.mrf.mxu0 }
 0x237   :  { %v1641_v36 = vadd.f32 %v1640_v61, %v1513_v18  ;;  %2489 = vmatmul.f32.vlgmr.msra.gmra.mxu3 %v6015_v0  ;;  %3144 = vmatmul.msk.f32.vlgmr.msra.gmra.mxu1 %vm6016_vm13, %v5912_v13  ;;  %v6018_v18 = vand.u32 4294901760, %v5009_v20  ;;  %vm6019_vm13 = vcmp.eq.s32.totalorder %v4969_v63, %v3727_v6  ;;  %v6021_v0 = vand.u32 4294901760, %v5036_v30 }
 0x238   :  { %2160 = vmatmul.f32.gmra.mxu0 %v2159_v53 }
 0x239   :  { %3095 = vmatmul.msk.f32.gmra.mxu2 %vm6017_vm12, %v5912_v13  ;;  %v5436_v31 = vadd.f32 %v1768_v38, %v1641_v36  ;;  %vm6020_vm12 = vcmp.eq.s32.totalorder %v4941_v14, %v3727_v6 }
 0x23a   :  { %v1940_v15 = vpop.f32.mrf.mxu3 }
 0x23c   :  { %v1355_v59 = vpop.f32.mrf.mxu2  ;;  %v5438_v17 = vpop.f32.mrf.mxu1 }
 0x23d   :  { %v1517_v61 = vadd.f32 %v1516_v16, %v1355_v59  ;;  %v5440_v10 = vpop.f32.mrf.mxu0 }
 0x23f   :  { %v1646_v25 = vadd.f32 %v1645_v52, %v1517_v61  ;;  %2495 = vmatmul.f32.gmra.mxu3 %v6018_v18  ;;  %3145 = vmatmul.msk.f32.gmra.mxu1 %vm6019_vm13, %v5912_v13 }
 0x240   :  { %3128 = vmatmul.msk.f32.vlgmr.msra.gmra.mxu0 %vm6020_vm12, %v5912_v13  ;;  %vm2948_vm12 = vcmask 1048512  }
 0x241   :  { %2375 = vmatmul.f32.vlgmr.msra.gmra.mxu2 %v4973_v54  ;;  %v5453_v28 = vadd.f32 %v1774_v12, %v1646_v25  ;;  %v6022_v25 = vand.u32 4294901760, %v5067_v43 }
 0x242   :  { %v1944_v38 = vpop.f32.mrf.mxu3 }
 0x244   :  { %v1843_v16 = vpop.f32.mrf.mxu2  ;;  %v5455_v52 = vpop.f32.mrf.mxu1 }
 0x245   :  { %v1844_v53 = vadd.f32 %v1843_v16, %v5065_v23  ;;  %v5458_v36 = vpop.f32.mrf.mxu0 }
 0x247   :  { %2501 = vmatmul.f32.gmra.mxu3 %v6021_v0  ;;  %3146 = vmatmul.msk.f32.gmra.mxu1 %vm345_vm14, %v5912_v13  ;;  %v5466_v14 = vadd.f32 %v1940_v15, %v1844_v53  ;;  %v6023_v53 = vand.u32 4294901760, %v5095_v41 }
 0x248   :  { %3129 = vmatmul.msk.f32.gmra.mxu0 %vm6019_vm13, %v5912_v13 }
 0x249   :  { %2380 = vmatmul.f32.gmra.mxu2 %v5009_v20 }
 0x24a   :  { %v1948_v54 = vpop.f32.mrf.mxu3 }
 0x24c   :  { %v1847_v23 = vpop.f32.mrf.mxu2  ;;  %v5473_v12 = vpop.f32.mrf.mxu1 }
 0x24d   :  { %v1848_v59 = vadd.f32 %v1847_v23, %v5093_v9  ;;  %v5476_v61 = vpop.f32.mrf.mxu0 }
 0x24f   :  { %2507 = vmatmul.f32.gmra.mxu3 %v6022_v25  ;;  %3147 = vmatmul.msk.f32.gmra.mxu1 %vm346_vm15, %v5912_v13  ;;  %v5484_v63 = vadd.f32 %v1944_v38, %v1848_v59  ;;  %v6024_v59 = vand.u32 4294901760, %v5123_v42 }
 0x250   :  { %3130 = vmatmul.msk.f32.gmra.mxu0 %vm345_vm14, %v5912_v13  ;;  %vm2892_vm14 = vcmask 130112  }
 0x251   :  { %2385 = vmatmul.f32.gmra.mxu2 %v5036_v30 }
 0x252   :  { %v1952_v20 = vpop.f32.mrf.mxu3 }
 0x254   :  { %v1851_v9 = vpop.f32.mrf.mxu2  ;;  %v5491_v15 = vpop.f32.mrf.mxu1 }
 0x255   :  { %v1852_v18 = vadd.f32 %v1851_v9, %v5121_v40  ;;  %v5494_v16 = vpop.f32.mrf.mxu0 }
 0x257   :  { %2513 = vmatmul.f32.gmra.mxu3 %v6023_v53  ;;  %3148 = vmatmul.msk.f32.gmra.mxu1 %vm347_vm0, %v5912_v13  ;;  %v5502_v49 = vadd.f32 %v1948_v54, %v1852_v18  ;;  %v6025_v18 = vand.u32 4294901760, %v5151_v62 }
 0x258   :  { %3131 = vmatmul.msk.f32.gmra.mxu0 %vm346_vm15, %v5912_v13  ;;  %vm2896_vm15 = vcmask 195712  }
 0x259   :  { %2390 = vmatmul.f32.gmra.mxu2 %v5067_v43 }
 0x25a   :  { %v1956_v30 = vpop.f32.mrf.mxu3 }
 0x25c   :  { %v1855_v40 = vpop.f32.mrf.mxu2  ;;  %v5509_v38 = vpop.f32.mrf.mxu1 }
 0x25d   :  { %v1856_v0 = vadd.f32 %v1855_v40, %v5149_v27  ;;  %v5512_v23 = vpop.f32.mrf.mxu0 }
 0x25f   :  { %2519 = vmatmul.f32.gmra.mxu3 %v6024_v59  ;;  %3149 = vmatmul.msk.f32.gmra.mxu1 %vm348_vm1, %v5912_v13  ;;  %v5520_v3 = vadd.f32 %v1952_v20, %v1856_v0  ;;  %v6026_v0 = vand.u32 4294901760, %v5179_v24 }
 0x260   :  { %3132 = vmatmul.msk.f32.gmra.mxu0 %vm347_vm0, %v5912_v13  ;;  %vm2900_vm0 = vcmask 261312  }
 0x261   :  { %2395 = vmatmul.f32.gmra.mxu2 %v5095_v41 }
 0x262   :  { %v1960_v43 = vpop.f32.mrf.mxu3 }
 0x264   :  { %v1859_v27 = vpop.f32.mrf.mxu2  ;;  %v5527_v54 = vpop.f32.mrf.mxu1 }
 0x265   :  { %v1860_v25 = vadd.f32 %v1859_v27, %v5177_v34  ;;  %v5530_v9 = vpop.f32.mrf.mxu0 }
 0x267   :  { %2525 = vmatmul.f32.gmra.mxu3 %v6025_v18  ;;  %3150 = vmatmul.msk.f32.gmra.mxu1 %vm349_vm2, %v5912_v13  ;;  %v5538_v5 = vadd.f32 %v1956_v30, %v1860_v25  ;;  %v6027_v25 = vand.u32 4294901760, %v5207_v19 }
 0x268   :  { %3133 = vmatmul.msk.f32.gmra.mxu0 %vm348_vm1, %v5912_v13  ;;  %vm2904_vm1 = vcmask 326912  }
 0x269   :  { %2400 = vmatmul.f32.gmra.mxu2 %v5123_v42 }
 0x26a   :  { %v1964_v41 = vpop.f32.mrf.mxu3 }
 0x26c   :  { %v1863_v34 = vpop.f32.mrf.mxu2  ;;  %v5545_v20 = vpop.f32.mrf.mxu1 }
 0x26d   :  { %v1864_v53 = vadd.f32 %v1863_v34, %v5205_v22  ;;  %v5548_v40 = vpop.f32.mrf.mxu0 }
 0x26f   :  { %2531 = vmatmul.f32.gmra.mxu3 %v6026_v0  ;;  %3151 = vmatmul.msk.f32.gmra.mxu1 %vm350_vm3, %v5912_v13  ;;  %v5556_v60 = vadd.f32 %v1960_v43, %v1864_v53  ;;  %v6028_v0 = vand.u32 4294901760, %v5235_v21 }
 0x270   :  { %3134 = vmatmul.msk.f32.gmra.mxu0 %vm349_vm2, %v5912_v13  ;;  %vm2908_vm2 = vcmask 392512  }
 0x271   :  { %2405 = vmatmul.f32.gmra.mxu2 %v5151_v62 }
 0x272   :  { %v1968_v42 = vpop.f32.mrf.mxu3 }
 0x274   :  { %v1867_v22 = vpop.f32.mrf.mxu2  ;;  %v2294_v30 = vpop.f32.mrf.mxu1 }
 0x275   :  { %v1868_v59 = vadd.f32 %v1867_v22, %v5233_v32  ;;  %v5564_v27 = vpop.f32.mrf.mxu0 }
 0x277   :  { %2537 = vmatmul.f32.gmra.mxu3 %v6027_v25  ;;  %3152 = vmatmul.msk.f32.gmra.mxu1 %vm351_vm4, %v5912_v13  ;;  %v5572_v43 = vadd.f32 %v1964_v41, %v1868_v59 }
 0x278   :  { %3135 = vmatmul.msk.f32.gmra.mxu0 %vm350_vm3, %v5912_v13  ;;  %vm2912_vm3 = vcmask 458112  }
 0x279   :  { %2410 = vmatmul.f32.gmra.mxu2 %v5179_v24 }
 0x27a   :  { %v1972_v37 = vpop.f32.mrf.mxu3 }
 0x27c   :  { %v1871_v62 = vpop.f32.mrf.mxu2  ;;  %v2298_v32 = vpop.f32.mrf.mxu1 }
 0x27d   :  { %v1872_v18 = vadd.f32 %v1871_v62, %v5261_v1  ;;  %v2105_v34 = vpop.f32.mrf.mxu0 }
 0x27e   :  { %v5580_v53 = vadd.f32 %v2294_v30, %v2105_v34  ;;  %v6030_v34 = vand.u32 4294901760, %v5291_v58 }
 0x27f   :  { %2543 = vmatmul.f32.gmra.mxu3 %v6028_v0  ;;  %3153 = vmatmul.msk.f32.gmra.mxu1 %vm352_vm5, %v5912_v13  ;;  %v5588_v33 = vadd.f32 %v1968_v42, %v1872_v18  ;;  %v6029_v42 = vand.u32 4294901760, %v5263_v8 }
 0x280   :  { %3136 = vmatmul.msk.f32.gmra.mxu0 %vm351_vm4, %v5912_v13  ;;  %vm2916_vm4 = vcmask 523712  }
 0x281   :  { %2415 = vmatmul.f32.gmra.mxu2 %v5207_v19 }
 0x282   :  { %v1976_v24 = vpop.f32.mrf.mxu3 }
 0x284   :  { %v1875_v1 = vpop.f32.mrf.mxu2  ;;  %v2302_v41 = vpop.f32.mrf.mxu1 }
 0x285   :  { %v1876_v22 = vadd.f32 %v1875_v1, %v5289_v11  ;;  %v2113_v30 = vpop.f32.mrf.mxu0 }
 0x286   :  { %v5596_v59 = vadd.f32 %v2298_v32, %v2113_v30 }
 0x287   :  { %v5598_v25 = vadd.f32 %v1972_v37, %v1876_v22  ;;  %2549 = vmatmul.f32.gmra.mxu3 %v6029_v42  ;;  %3154 = vmatmul.msk.f32.gmra.mxu1 %vm353_vm6, %v5912_v13  ;;  %v6031_v22 = vand.u32 4294901760, %v5319_v7 }
 0x288   :  { %3137 = vmatmul.msk.f32.gmra.mxu0 %vm352_vm5, %v5912_v13  ;;  %vm2920_vm5 = vcmask 589312  }
 0x289   :  { %2420 = vmatmul.f32.gmra.mxu2 %v5235_v21 }
 0x28a   :  { %v1980_v2 = vpop.f32.mrf.mxu3 }
 0x28c   :  { %v1879_v19 = vpop.f32.mrf.mxu2  ;;  %v2306_v11 = vpop.f32.mrf.mxu1 }
 0x28d   :  { %v1880_v37 = vadd.f32 %v1879_v19, %v5317_v4  ;;  %v2121_v62 = vpop.f32.mrf.mxu0 }
 0x28e   :  { %v5612_v32 = vadd.f32 %v2302_v41, %v2121_v62 }
 0x28f   :  { %v5614_v18 = vadd.f32 %v1976_v24, %v1880_v37  ;;  %2555 = vmatmul.f32.gmra.mxu3 %v6030_v34  ;;  %3155 = vmatmul.msk.f32.gmra.mxu1 %vm354_vm7, %v5912_v13 }
 0x290   :  { %3138 = vmatmul.msk.f32.gmra.mxu0 %vm353_vm6, %v5912_v13  ;;  %vm2924_vm6 = vcmask 654912  }
 0x291   :  { %2425 = vmatmul.f32.gmra.mxu2 %v5263_v8 }
 0x292   :  { %v1984_v55 = vpop.f32.mrf.mxu3 }
 0x294   :  { %v1883_v21 = vpop.f32.mrf.mxu2  ;;  %v2310_v4 = vpop.f32.mrf.mxu1 }
 0x295   :  { %v1884_v0 = vadd.f32 %v1883_v21, %v5345_v45  ;;  %v2129_v24 = vpop.f32.mrf.mxu0 }
 0x296   :  { %v5628_v1 = vadd.f32 %v2306_v11, %v2129_v24  ;;  %v6032_v11 = vld [vmem:[#allocation21_spill] sm:$0xff] }
 0x297   :  { %v5630_v41 = vadd.f32 %v1980_v2, %v1884_v0  ;;  %2561 = vmatmul.f32.gmra.mxu3 %v6031_v22  ;;  %3156 = vmatmul.msk.f32.gmra.mxu1 %vm355_vm8, %v5912_v13  ;;  %v6033_v37 = vand.u32 4294901760, %v6032_v11 }
 0x298   :  { %3139 = vmatmul.msk.f32.gmra.mxu0 %vm354_vm7, %v5912_v13  ;;  %vm2928_vm7 = vcmask 720512  }
 0x299   :  { %2430 = vmatmul.f32.gmra.mxu2 %v5291_v58 }
 0x29a   :  { %v1988_v48 = vpop.f32.mrf.mxu3 }
 0x29c   :  { %v1887_v8 = vpop.f32.mrf.mxu2  ;;  %v2314_v45 = vpop.f32.mrf.mxu1 }
 0x29d   :  { %v1888_v30 = vadd.f32 %v1887_v8, %v5373_v51  ;;  %v2137_v42 = vpop.f32.mrf.mxu0 }
 0x29e   :  { %v5644_v2 = vadd.f32 %v2310_v4, %v2137_v42 }
 0x29f   :  { %v5646_v19 = vadd.f32 %v1984_v55, %v1888_v30  ;;  %2567 = vmatmul.f32.gmra.mxu3 %v6033_v37  ;;  %3157 = vmatmul.msk.f32.gmra.mxu1 %vm356_vm9, %v5912_v13 }
 0x2a0   :  { %3140 = vmatmul.msk.f32.gmra.mxu0 %vm355_vm8, %v5912_v13  ;;  %vm2932_vm8 = vcmask 786112  }
 0x2a1   :  { %2435 = vmatmul.f32.gmra.mxu2 %v5319_v7 }
 0x2a2   :  { %v1992_v47 = vpop.f32.mrf.mxu3 }
 0x2a4   :  { %v1891_v58 = vpop.f32.mrf.mxu2  ;;  %v2318_v51 = vpop.f32.mrf.mxu1 }
 0x2a5   :  { %v1892_v34 = vadd.f32 %v1891_v58, %v5399_v57  ;;  %v2145_v55 = vpop.f32.mrf.mxu0 }
 0x2a6   :  { %v5660_v21 = vadd.f32 %v2314_v45, %v2145_v55 }
 0x2a7   :  { %v5662_v4 = vadd.f32 %v1988_v48, %v1892_v34  ;;  %2573 = vmatmul.f32.gmra.mxu3 %v2149_v44  ;;  %3158 = vmatmul.msk.f32.gmra.mxu1 %vm357_vm10, %v5912_v13  ;;  %v2263_v34 = vadd.f32 %v5424_v26, %v5440_v10 }
 0x2a8   :  { %3141 = vmatmul.msk.f32.gmra.mxu0 %vm356_vm9, %v5912_v13  ;;  %vm2936_vm9 = vcmask 851712  }
 0x2a9   :  { %2440 = vmatmul.f32.gmra.mxu2 %v6032_v11 }
 0x2aa   :  { %v1996_v35 = vpop.f32.mrf.mxu3 }
 0x2ac   :  { %v1895_v7 = vpop.f32.mrf.mxu2  ;;  %v2322_v57 = vpop.f32.mrf.mxu1 }
 0x2ad   :  { %v1896_v24 = vadd.f32 %v1895_v7, %v5419_v46  ;;  %v2153_v22 = vpop.f32.mrf.mxu0 }
 0x2ae   :  { %v5676_v48 = vadd.f32 %v2318_v51, %v2153_v22 }
 0x2af   :  { %v5678_v44 = vadd.f32 %v1992_v47, %v1896_v24  ;;  %2579 = vmatmul.f32.gmra.mxu3 %v2157_v29  ;;  %3159 = vmatmul.msk.f32.gmra.mxu1 %vm358_vm11, %v5912_v13 }
 0x2b0   :  { %3142 = vmatmul.msk.f32.gmra.mxu0 %vm357_vm10, %v5912_v13  ;;  %vm2940_vm10 = vcmask 917312  }
 0x2b1   :  { %2445 = vmatmul.f32.gmra.mxu2 %v5375_v50 }
 0x2b2   :  { %v2000_v46 = vpop.f32.mrf.mxu3 }
 0x2b4   :  { %v1899_v8 = vpop.f32.mrf.mxu2  ;;  %v2746_v45 = vpop.f32.mrf.mxu1 }
 0x2b5   :  { %v1900_v30 = vadd.f32 %v1899_v8, %v5436_v31  ;;  %v2161_v42 = vpop.f32.mrf.mxu0 }
 0x2b6   :  { %v5692_v11 = vadd.f32 %v2322_v57, %v2161_v42 }
 0x2b7   :  { %v5694_v29 = vadd.f32 %v1996_v35, %v1900_v30  ;;  %v6036_v30 = vld [vmem:[#allocation5_spill] sm:$0xff] }
 0x2b8   :  { %3143 = vmatmul.msk.f32.gmra.mxu0 %vm358_vm11, %v5912_v13  ;;  %vm2944_vm11 = vcmask 982912  }
 0x2b9   :  { %2450 = vmatmul.f32.gmra.mxu2 %v5401_v39  ;;  %v2267_v39 = vadd.f32 %v5438_v17, %v5458_v36 }
 0x2ba   :  { %v2490_v37 = vpop.f32.mrf.mxu3 }
 0x2bc   :  { %v1903_v62 = vpop.f32.mrf.mxu2  ;;  %v2750_v50 = vpop.f32.mrf.mxu1 }
 0x2bd   :  { %v1904_v47 = vadd.f32 %v1903_v62, %v5453_v28  ;;  %v2649_v58 = vpop.f32.mrf.mxu0 }
 0x2bf   :  { %v5702_v51 = vadd.f32 %v2000_v46, %v1904_v47 }
 0x2c2   :  { %v2496_v31 = vpop.f32.mrf.mxu3 }
 0x2c4   :  { %v2376_v55 = vpop.f32.mrf.mxu2  ;;  %v2754_v0 = vpop.f32.mrf.mxu1 }
 0x2c5   :  { %v2377_v35 = vadd.f32 %v2376_v55, %v2263_v34  ;;  %v2653_v7 = vpop.f32.mrf.mxu0 }
 0x2c7   :  { %v2491_v56 = vadd.f32 %v2490_v37, %v2377_v35  ;;  %v2271_v37 = vadd.f32 %v5455_v52, %v5476_v61  ;;  %v6038_v61 = vld [vmem:[#allocation9_spill] sm:$0xff] }
 0x2c9   :  { %v2650_v13 = vadd.f32 %v2649_v58, %v2491_v56 }
 0x2ca   :  { %v2502_v57 = vpop.f32.mrf.mxu3 }
 0x2cb   :  { %v2747_v24 = vadd.f32 %v2746_v45, %v2650_v13  ;;  %v6037_v45 = vld [vmem:[#allocation7_spill] sm:$0xff] }
 0x2cc   :  { %v2381_v22 = vpop.f32.mrf.mxu2  ;;  %v2758_v28 = vpop.f32.mrf.mxu1 }
 0x2cd   :  { %v2382_v8 = vadd.f32 %v2381_v22, %v2267_v39  ;;  %v2657_v46 = vpop.f32.mrf.mxu0  ;;  %v2809_v42 = vmul.f32 %v2747_v24, %v6036_v30 }
 0x2cf   :  { %v2497_v62 = vadd.f32 %v2496_v31, %v2382_v8  ;;  %v2825_v26 = vmul.f32 %v2809_v42, %v5466_v14  ;;  %v2275_v14 = vadd.f32 %v5473_v12, %v5494_v16  ;;  %v6039_v16 = vld [vmem:[#allocation11_spill] sm:$0xff] }
 0x2d1   :  { %v2654_v10 = vadd.f32 %v2653_v7, %v2497_v62  ;;  %2841 = vadd.xlane.f32.xlu0 %v2825_v26 }
 0x2d2   :  { %v2508_v47 = vpop.f32.mrf.mxu3 }
 0x2d3   :  { %v2751_v58 = vadd.f32 %v2750_v50, %v2654_v10 }
 0x2d4   :  { %v2386_v34 = vpop.f32.mrf.mxu2  ;;  %v2762_v55 = vpop.f32.mrf.mxu1 }
 0x2d5   :  { %v2387_v17 = vadd.f32 %v2386_v34, %v2271_v37  ;;  %v2661_v36 = vpop.f32.mrf.mxu0  ;;  %v2810_v35 = vmul.f32 %v2751_v58, %v6037_v45 }
 0x2d7   :  { %v2503_v56 = vadd.f32 %v2502_v57, %v2387_v17  ;;  %v2826_v13 = vmul.f32 %v2810_v35, %v5484_v63  ;;  %v2279_v63 = vadd.f32 %v5491_v15, %v5512_v23  ;;  %v6040_v23 = vld [vmem:[#allocation14_spill] sm:$0xff] }
 0x2d9   :  { %v2658_v39 = vadd.f32 %v2657_v46, %v2503_v56  ;;  %2843 = vadd.xlane.f32.xlu1 %v2826_v13 }
 0x2da   :  { %v2514_v31 = vpop.f32.mrf.mxu3 }
 0x2db   :  { %v2755_v7 = vadd.f32 %v2754_v0, %v2658_v39 }
 0x2dc   :  { %v2391_v24 = vpop.f32.mrf.mxu2  ;;  %v2766_v8 = vpop.f32.mrf.mxu1 }
 0x2dd   :  { %v2392_v22 = vadd.f32 %v2391_v24, %v2275_v14  ;;  %v2665_v52 = vpop.f32.mrf.mxu0  ;;  %v2811_v50 = vmul.f32 %v2755_v7, %v6038_v61  ;;  %v2287_v14 = vadd.f32 %v5527_v54, %v5548_v40  ;;  %v6042_v40 = vld [vmem:[#allocation22_spill] sm:$0xff] }
 0x2df   :  { %v2509_v30 = vadd.f32 %v2508_v47, %v2392_v22  ;;  %v2827_v42 = vmul.f32 %v2811_v50, %v5502_v49  ;;  %v2283_v49 = vadd.f32 %v5509_v38, %v5530_v9  ;;  %v6041_v9 = vld [vmem:[#allocation18_spill] sm:$0xff] }
 0x2e1   :  { %v2662_v62 = vadd.f32 %v2661_v36, %v2509_v30  ;;  %2845 = vadd.xlane.f32.xlu2 %v2827_v42 }
 0x2e2   :  { %v2520_v57 = vpop.f32.mrf.mxu3 }
 0x2e3   :  { %v2759_v46 = vadd.f32 %v2758_v28, %v2662_v62 }
 0x2e4   :  { %v2396_v26 = vpop.f32.mrf.mxu2  ;;  %v2770_v34 = vpop.f32.mrf.mxu1 }
 0x2e5   :  { %v2397_v10 = vadd.f32 %v2396_v26, %v2279_v63  ;;  %v2669_v12 = vpop.f32.mrf.mxu0  ;;  %v2812_v0 = vmul.f32 %v2759_v46, %v6039_v16 }
 0x2e7   :  { %v2515_v37 = vadd.f32 %v2514_v31, %v2397_v10  ;;  %v2828_v58 = vmul.f32 %v2812_v0, %v5520_v3 }
 0x2e9   :  { %v2666_v17 = vadd.f32 %v2665_v52, %v2515_v37  ;;  %2847 = vadd.xlane.f32.xlu2 %v2828_v58  ;;  %v6043_v58 = vld [vmem:[#allocation26_spill] sm:$0xff] }
 0x2ea   :  { %v2526_v47 = vpop.f32.mrf.mxu3 }
 0x2eb   :  { %v2763_v36 = vadd.f32 %v2762_v55, %v2666_v17 }
 0x2ec   :  { %v2401_v45 = vpop.f32.mrf.mxu2  ;;  %v2774_v31 = vpop.f32.mrf.mxu1 }
 0x2ed   :  { %v2402_v35 = vadd.f32 %v2401_v45, %v2283_v49  ;;  %v2673_v15 = vpop.f32.mrf.mxu0  ;;  %v2813_v28 = vmul.f32 %v2763_v36, %v6040_v23 }
 0x2ef   :  { %v2521_v56 = vadd.f32 %v2520_v57, %v2402_v35  ;;  %v2829_v13 = vmul.f32 %v2813_v28, %v5538_v5  ;;  %v2291_v5 = vadd.f32 %v5545_v20, %v5564_v27  ;;  %v6044_v35 = vld [vmem:[#allocation24_spill] sm:$0xff] }
 0x2f1   :  { %v2670_v39 = vadd.f32 %v2669_v12, %v2521_v56  ;;  %2849 = vadd.xlane.f32.xlu0 %v2829_v13 }
 0x2f2   :  { %v2532_v3 = vpop.f32.mrf.mxu3 }
 0x2f3   :  { %v2767_v7 = vadd.f32 %v2766_v8, %v2670_v39 }
 0x2f4   :  { %v2406_v24 = vpop.f32.mrf.mxu2  ;;  %v2778_v62 = vpop.f32.mrf.mxu1 }
 0x2f5   :  { %v2407_v22 = vadd.f32 %v2406_v24, %v2287_v14  ;;  %v2677_v38 = vpop.f32.mrf.mxu0  ;;  %v2814_v55 = vmul.f32 %v2767_v7, %v6041_v9 }
 0x2f7   :  { %v2527_v52 = vadd.f32 %v2526_v47, %v2407_v22  ;;  %v2830_v61 = vmul.f32 %v2814_v55, %v5556_v60 }
 0x2f9   :  { %v2674_v50 = vadd.f32 %v2673_v15, %v2527_v52  ;;  %2851 = vadd.xlane.f32.xlu1 %v2830_v61  ;;  %v6046_v61 = vld [vmem:[#allocation27_spill] sm:$0xff] }
 0x2fa   :  { %v2538_v30 = vpop.f32.mrf.mxu3 }
 0x2fb   :  { %v2771_v42 = vadd.f32 %v2770_v34, %v2674_v50 }
 0x2fc   :  { %v2411_v57 = vpop.f32.mrf.mxu2  ;;  %v2782_v27 = vpop.f32.mrf.mxu1 }
 0x2fd   :  { %v2412_v63 = vadd.f32 %v2411_v57, %v2291_v5  ;;  %v2681_v54 = vpop.f32.mrf.mxu0  ;;  %v2815_v8 = vmul.f32 %v2771_v42, %v6042_v40  ;;  %v6047_v40 = vld [vmem:[#allocation28_spill] sm:$0xff] }
 0x2ff   :  { %v2533_v46 = vadd.f32 %v2532_v3, %v2412_v63  ;;  %v2831_v26 = vmul.f32 %v2815_v8, %v5572_v43  ;;  %v6045_v3 = vld [vmem:[#allocation29_spill] sm:$0xff] }
 0x301   :  { %v2678_v10 = vadd.f32 %v2677_v38, %v2533_v46  ;;  %2853 = vadd.xlane.f32.xlu2 %v2831_v26 }
 0x302   :  { %v2544_v12 = vpop.f32.mrf.mxu3 }
 0x303   :  { %v2775_v60 = vadd.f32 %v2774_v31, %v2678_v10 }
 0x304   :  { %v2416_v16 = vpop.f32.mrf.mxu2  ;;  %v2786_v56 = vpop.f32.mrf.mxu1 }
 0x305   :  { %v2417_v0 = vadd.f32 %v2416_v16, %v5580_v53  ;;  %v2685_v37 = vpop.f32.mrf.mxu0  ;;  %v2816_v20 = vmul.f32 %v2775_v60, %v6043_v58 }
 0x307   :  { %v2539_v34 = vadd.f32 %v2538_v30, %v2417_v0  ;;  %v2832_v17 = vmul.f32 %v2816_v20, %v5588_v33  ;;  %v6048_v0 = vld [vmem:[#allocation30_spill] sm:$0xff] }
 0x309   :  { %v2682_v47 = vadd.f32 %v2681_v54, %v2539_v34  ;;  %2855 = vadd.xlane.f32.xlu0 %v2832_v17 }
 0x30a   :  { %v2550_v36 = vpop.f32.mrf.mxu3 }
 0x30b   :  { %v2779_v49 = vadd.f32 %v2778_v62, %v2682_v47 }
 0x30c   :  { %v2421_v45 = vpop.f32.mrf.mxu2  ;;  %v2790_v9 = vpop.f32.mrf.mxu1 }
 0x30d   :  { %v2422_v43 = vadd.f32 %v2421_v45, %v5596_v59  ;;  %v2817_v15 = vmul.f32 %v2779_v49, %v6044_v35  ;;  %v2689_v23 = vpop.f32.mrf.mxu0  ;;  %v6049_v49 = vld [vmem:[#allocation31_spill] sm:$0xff] }
 0x30f   :  { %v2545_v28 = vadd.f32 %v2544_v12, %v2422_v43  ;;  %v2833_v53 = vmul.f32 %v2817_v15, %v5598_v25 }
 0x311   :  { %v2686_v13 = vadd.f32 %v2685_v37, %v2545_v28  ;;  %2857 = vadd.xlane.f32.xlu1 %v2833_v53  ;;  %v6050_v53 = vld [vmem:[#allocation13_spill] sm:$0xff] }
 0x312   :  { %v2556_v7 = vpop.f32.mrf.mxu3 }
 0x313   :  { %v2783_v39 = vadd.f32 %v2782_v27, %v2686_v13 }
 0x314   :  { %v2426_v31 = vpop.f32.mrf.mxu2  ;;  %v2794_v63 = vpop.f32.mrf.mxu1 }
 0x315   :  { %v2427_v33 = vadd.f32 %v2426_v31, %v5612_v32  ;;  %v2818_v14 = vmul.f32 %v2783_v39, %v6045_v3  ;;  %v2693_v59 = vpop.f32.mrf.mxu0 }
 0x317   :  { %v2551_v24 = vadd.f32 %v2550_v36, %v2427_v33  ;;  %v2834_v22 = vmul.f32 %v2818_v14, %v5614_v18 }
 0x319   :  { %v2690_v38 = vadd.f32 %v2689_v23, %v2551_v24  ;;  %2859 = vadd.xlane.f32.xlu2 %v2834_v22 }
 0x31a   :  { %v2562_v32 = vpop.f32.mrf.mxu3 }
 0x31b   :  { %v2787_v55 = vadd.f32 %v2786_v56, %v2690_v38 }
 0x31c   :  { %v2431_v52 = vpop.f32.mrf.mxu2  ;;  %v2798_v58 = vpop.f32.mrf.mxu1 }
 0x31d   :  { %v2432_v25 = vadd.f32 %v2431_v52, %v5628_v1  ;;  %v2819_v50 = vmul.f32 %v2787_v55, %v6046_v61  ;;  %v2697_v62 = vpop.f32.mrf.mxu0 }
 0x31f   :  { %v2557_v30 = vadd.f32 %v2556_v7, %v2432_v25  ;;  %v2835_v5 = vmul.f32 %v2819_v50, %v5630_v41  ;;  %v6051_v7 = vld [vmem:[#allocation19_spill] sm:$0xff]  ;;  %v2894_v50 = vadd.s32 4294967280, %v3727_v6 }
 0x321   :  { %v2694_v42 = vadd.f32 %v2693_v59, %v2557_v30  ;;  %2861 = vadd.xlane.f32.xlu0 %v2835_v5  ;;  %v2898_v30 = vadd.s32 4294967272, %v3727_v6  ;;  %v2902_v5 = vadd.s32 4294967264, %v3727_v6 }
 0x322   :  { %v2568_v10 = vpop.f32.mrf.mxu3 }
 0x323   :  { %v2791_v57 = vadd.f32 %v2790_v9, %v2694_v42  ;;  %v2906_v42 = vadd.s32 4294967256, %v3727_v6 }
 0x324   :  { %v2436_v18 = vpop.f32.mrf.mxu2 }
 0x325   :  { %v2437_v54 = vadd.f32 %v2436_v18, %v5644_v2  ;;  %v2820_v8 = vmul.f32 %v2791_v57, %v6047_v40  ;;  %v2701_v60 = vpop.f32.mrf.mxu0  ;;  %v2910_v57 = vadd.s32 4294967248, %v3727_v6  ;;  %v2914_v40 = vadd.s32 4294967240, %v3727_v6 }
 0x327   :  { %v2563_v46 = vadd.f32 %v2562_v32, %v2437_v54  ;;  %v2836_v26 = vmul.f32 %v2820_v8, %v5646_v19 }
 0x329   :  { %v2698_v1 = vadd.f32 %v2697_v62, %v2563_v46  ;;  %2863 = vadd.xlane.f32.xlu1 %v2836_v26  ;;  %v2918_v26 = vadd.s32 4294967232, %v3727_v6 }
 0x32a   :  { %v2574_v17 = vpop.f32.mrf.mxu3 }
 0x32b   :  { %v2795_v12 = vadd.f32 %v2794_v63, %v2698_v1 }
 0x32c   :  { %v2441_v41 = vpop.f32.mrf.mxu2 }
 0x32d   :  { %v2442_v16 = vadd.f32 %v2441_v41, %v5660_v21  ;;  %v2821_v37 = vmul.f32 %v2795_v12, %v6048_v0  ;;  %v2705_v45 = vpop.f32.mrf.mxu0  ;;  %v2802_v21 = vpop.f32.mrf.mxu1  ;;  %v2922_v12 = vadd.s32 4294967224, %v3727_v6 }
 0x32f   :  { %v2569_v20 = vadd.f32 %v2568_v10, %v2442_v16  ;;  %v2837_v27 = vmul.f32 %v2821_v37, %v5662_v4  ;;  %v2926_v16 = vadd.s32 4294967216, %v3727_v6 }
 0x331   :  { %v2702_v2 = vadd.f32 %v2701_v60, %v2569_v20  ;;  %2865 = vadd.xlane.f32.xlu2 %v2837_v27 }
 0x332   :  { %v2580_v13 = vpop.f32.mrf.mxu3 }
 0x333   :  { %v2799_v34 = vadd.f32 %v2798_v58, %v2702_v2  ;;  %v2930_v58 = vadd.s32 4294967208, %v3727_v6  ;;  %v2934_v2 = vadd.s32 4294967200, %v3727_v6 }
 0x334   :  { %v2446_v47 = vpop.f32.mrf.mxu2 }
 0x335   :  { %v2447_v19 = vadd.f32 %v2446_v47, %v5676_v48  ;;  %v2822_v36 = vmul.f32 %v2799_v34, %v6049_v49  ;;  %v2709_v48 = vpop.f32.mrf.mxu0  ;;  %v2806_v3 = vpop.f32.mrf.mxu1 }
 0x337   :  { %v2575_v43 = vadd.f32 %v2574_v17, %v2447_v19  ;;  %v2838_v35 = vmul.f32 %v2822_v36, %v5678_v44  ;;  %v2938_v19 = vadd.s32 4294967192, %v3727_v6 }
 0x339   :  { %v2706_v15 = vadd.f32 %v2705_v45, %v2575_v43  ;;  %2867 = vadd.xlane.f32.xlu0 %v2838_v35  ;;  %v2942_v43 = vadd.s32 4294967184, %v3727_v6 }
 0x33b   :  { %v2803_v23 = vadd.f32 %v2802_v21, %v2706_v15 }
 0x33c   :  { %v2451_v28 = vpop.f32.mrf.mxu2 }
 0x33d   :  { %v2452_v4 = vadd.f32 %v2451_v28, %v5692_v11  ;;  %v2823_v56 = vmul.f32 %v2803_v23, %v6050_v53 }
 0x33f   :  { %v2581_v39 = vadd.f32 %v2580_v13, %v2452_v4  ;;  %v2839_v31 = vmul.f32 %v2823_v56, %v5694_v29  ;;  %v2890_v29 = vadd.s32 4294967288, %v3727_v6  ;;  %v2946_v56 = vadd.s32 4294967176, %v3727_v6 }
 0x341   :  { %v2710_v33 = vadd.f32 %v2709_v48, %v2581_v39  ;;  %2869 = vadd.xlane.f32.xlu1 %v2839_v31 }
 0x343   :  { %v2807_v14 = vadd.f32 %v2806_v3, %v2710_v33 }
 0x344   :  { %v2842_v59 = vpop.xlane.xlu0 %2841 }
 0x345   :  { %v2824_v44 = vmul.f32 %v2807_v14, %v6051_v7  ;;  %v2889_v18 = vperm.slane %v2842_v59, %v3727_v6 }
 0x347   :  { %v2840_v24 = vmul.f32 %v2824_v44, %v5702_v51 }
 0x349   :  { %2871 = vadd.xlane.f32.xlu2 %v2840_v24 }
 0x34c   :  { %v2844_v38 = vpop.xlane.xlu1 %2843 }
 0x34d   :  { %v2891_v51 = vperm.slane %v2844_v38, %v2890_v29 }
 0x34f   :  { %v2893_v1 = vsel %vm2892_vm14, %v2891_v51, %v2889_v18 }
 0x354   :  { %v2846_v22 = vpop.xlane.xlu2 %2845 }
 0x355   :  { %v2895_v62 = vperm.slane %v2846_v22, %v2894_v50 }
 0x357   :  { %v2897_v60 = vsel %vm2896_vm15, %v2895_v62, %v2893_v1 }
 0x35c   :  { %v2848_v11 = vpop.xlane.xlu2 %2847 }
 0x35d   :  { %v2899_v54 = vperm.slane %v2848_v11, %v2898_v30 }
 0x35f   :  { %v2901_v0 = vsel %vm2900_vm0, %v2899_v54, %v2897_v60 }
 0x364   :  { %v2850_v9 = vpop.xlane.xlu0 %2849 }
 0x365   :  { %v2903_v46 = vperm.slane %v2850_v9, %v2902_v5 }
 0x367   :  { %v2905_v20 = vsel %vm2904_vm1, %v2903_v46, %v2901_v0 }
 0x36c   :  { %v2852_v55 = vpop.xlane.xlu1 %2851 }
 0x36d   :  { %v2907_v10 = vperm.slane %v2852_v55, %v2906_v42 }
 0x36f   :  { %v2909_v17 = vsel %vm2908_vm2, %v2907_v10, %v2905_v20 }
 0x374   :  { %v2854_v52 = vpop.xlane.xlu2 %2853 }
 0x375   :  { %v2911_v41 = vperm.slane %v2854_v52, %v2910_v57 }
 0x377   :  { %v2913_v49 = vsel %vm2912_vm3, %v2911_v41, %v2909_v17 }
 0x37c   :  { %v2856_v25 = vpop.xlane.xlu0 %2855 }
 0x37d   :  { %v2915_v37 = vperm.slane %v2856_v25, %v2914_v40 }
 0x37f   :  { %v2917_v35 = vsel %vm2916_vm4, %v2915_v37, %v2913_v49 }
 0x384   :  { %v2858_v61 = vpop.xlane.xlu1 %2857 }
 0x385   :  { %v2919_v27 = vperm.slane %v2858_v61, %v2918_v26 }
 0x387   :  { %v2921_v23 = vsel %vm2920_vm5, %v2919_v27, %v2917_v35 }
 0x38c   :  { %v2860_v32 = vpop.xlane.xlu2 %2859 }
 0x38d   :  { %v2923_v47 = vperm.slane %v2860_v32, %v2922_v12 }
 0x38f   :  { %v2925_v4 = vsel %vm2924_vm6, %v2923_v47, %v2921_v23 }
 0x394   :  { %v2862_v63 = vpop.xlane.xlu0 %2861 }
 0x395   :  { %v2927_v36 = vperm.slane %v2862_v63, %v2926_v16 }
 0x397   :  { %v2929_v13 = vsel %vm2928_vm7, %v2927_v36, %v2925_v4 }
 0x39c   :  { %v2864_v8 = vpop.xlane.xlu1 %2863 }
 0x39d   :  { %v2931_v21 = vperm.slane %v2864_v8, %v2930_v58 }
 0x39f   :  { %v2933_v31 = vsel %vm2932_vm8, %v2931_v21, %v2929_v13 }
 0x3a4   :  { %v2866_v34 = vpop.xlane.xlu2 %2865 }
 0x3a5   :  { %v2935_v28 = vperm.slane %v2866_v34, %v2934_v2 }
 0x3a7   :  { %v2937_v48 = vsel %vm2936_vm9, %v2935_v28, %v2933_v31 }
 0x3ac   :  { %v2868_v45 = vpop.xlane.xlu0 %2867 }
 0x3ad   :  { %v2939_v53 = vperm.slane %v2868_v45, %v2938_v19 }
 0x3af   :  { %v2941_v3 = vsel %vm2940_vm10, %v2939_v53, %v2937_v48 }
 0x3b4   :  { %v2870_v15 = vpop.xlane.xlu1 %2869 }
 0x3b5   :  { %v2943_v39 = vperm.slane %v2870_v15, %v2942_v43 }
 0x3b7   :  { %v2945_v7 = vsel %vm2944_vm11, %v2943_v39, %v2941_v3 }
 0x3bc   :  { %v2872_v33 = vpop.xlane.xlu2 %2871 }
 0x3bd   :  { %v2947_v14 = vperm.slane %v2872_v33, %v2946_v56 }
 0x3bf   :  { %v2949_v6 = vsel %vm2948_vm12, %v2947_v14, %v2945_v7 }
 0x3c0   :  { %2951 = vst [vmem:[#allocation2] sm:$0x1] %v2949_v6 }
 0x3c1   :  { %2962 = dma.vmem_to_hbm [thread:$0]  %s2958_s15, 16, %s2960_s18, [#allocation3]  }
 0x3c2   :  { %3223 = dma.done.wait [#allocation3], 16  }
 0x3c3   :  { %3224 = vsyncadd [#allocation3], 4294967280 }
 0x3c4   :  { %2967 = vsyncpa [#allocation3], 1 }

</bundles_post_ra>
